<compile_context>
chip_gen: v6e
topology: v6e:2x2x1
jax: 0.10.0
libtpu: 0.0.40
codegen_flags: <defaults>
</compile_context>

<pallas_src>
import math
import functools

import jax
import jax.numpy as jnp
from jax.experimental import pallas as pl
from jax.experimental.pallas import tpu as pltpu


# ---------------------------------------------------------------------------
# Fused per-layer decoder kernel (one pallas_call per DecoderLayer)
# ---------------------------------------------------------------------------

def _decoder_layer_kernel(
    x_ref, e_ref, tb_ref, sb_ref,
    ln1_g, ln1_b, ln2_g, ln2_b, ln3_g, ln3_b,
    a1_wqkv, a1_bqkv, a1_wo, a1_bo,
    a2_wq, a2_bq, a2_wkv, a2_bkv, a2_wo, a2_bo,
    ff_w1, ff_b1, ff_w2, ff_b2,
    o_ref, *, heads, d_head, eps):
    D = heads * d_head
    scale = 1.0 / math.sqrt(d_head)

    def layernorm(v, g_ref, b_ref):
        mu = jnp.mean(v, axis=-1, keepdims=True)
        var = jnp.mean((v - mu) ** 2, axis=-1, keepdims=True)
        return (v - mu) * jax.lax.rsqrt(var + eps) * g_ref[...] + b_ref[...]

    def linear(a, w_ref, b_ref):
        # bf16 operands on the MXU, f32 accumulation, f32 bias add.
        return jnp.dot(a.astype(jnp.bfloat16), w_ref[...].astype(jnp.bfloat16),
                       preferred_element_type=jnp.float32) + b_ref[...]

    def mha(q, k, v, bias):
        # q: (Sq, D), k/v: (Skv, D), bias: (Sq, Skv) additive mask bias (0 / -1e9).
        outs = []
        for h in range(heads):                      # static unrolled head loop
            sl = slice(h * d_head, (h + 1) * d_head)
            qh = q[:, sl].astype(jnp.bfloat16)
            kh = k[:, sl].astype(jnp.bfloat16)
            vh = v[:, sl].astype(jnp.bfloat16)
            # Q @ K^T without an explicit transpose (contract last dims).
            s = jax.lax.dot_general(qh, kh, (((1,), (1,)), ((), ())),
                                    preferred_element_type=jnp.float32)
            s = s * scale + bias
            s = s - jnp.max(s, axis=-1, keepdims=True)
            p = jnp.exp(s)
            p = p * pl.reciprocal(jnp.sum(p, axis=-1, keepdims=True), approx=True)
            outs.append(jnp.dot(p.astype(jnp.bfloat16), vh,
                                preferred_element_type=jnp.float32))
        return jnp.concatenate(outs, axis=-1)       # (Sq, D)

    x = x_ref[...].astype(jnp.float32)              # (S, D)   rows of this batch element
    e = e_ref[...].astype(jnp.float32)              # (Sk, D)  encoder rows of this batch
    trg_bias = tb_ref[0]                            # (S, S)
    src_bias = sb_ref[0]                            # (S, Sk)

    # ---- self-attention sub-layer (pre-norm, fused QKV GEMM) ----
    x2 = layernorm(x, ln1_g, ln1_b)
    qkv = linear(x2, a1_wqkv, a1_bqkv)              # (S, 3D)
    att = mha(qkv[:, :D], qkv[:, D:2 * D], qkv[:, 2 * D:], trg_bias)
    x = x + linear(att, a1_wo, a1_bo)

    # ---- cross-attention sub-layer (fused KV GEMM on encoder outputs) ----
    x2 = layernorm(x, ln2_g, ln2_b)
    q = linear(x2, a2_wq, a2_bq)                    # (S, D)
    kv = linear(e, a2_wkv, a2_bkv)                  # (Sk, 2D)
    att = mha(q, kv[:, :D], kv[:, D:], src_bias)
    x = x + linear(att, a2_wo, a2_bo)

    # ---- feed-forward sub-layer ----
    x2 = layernorm(x, ln3_g, ln3_b)
    h1 = jnp.maximum(linear(x2, ff_w1, ff_b1), 0.0)
    x = x + linear(h1, ff_w2, ff_b2)

    o_ref[...] = x.astype(o_ref.dtype)


def pallas_decoder_layer(p, x, e_outputs, trg_bias, src_bias, heads):
    B, S, D = x.shape
    Sk = e_outputs.shape[1]
    F = p["ff_w1"].shape[1]
    d_head = D // heads

    kernel = functools.partial(_decoder_layer_kernel,
                               heads=heads, d_head=d_head, eps=1e-6)

    def full2d(shape):
        # parameter blocks: whole array, resident across the (parallel) batch grid
        return pl.BlockSpec(shape, lambda b: (0, 0))

    out = pl.pallas_call(
        kernel,
        out_shape=jax.ShapeDtypeStruct((B * S, D), jnp.float32),
        grid=(B,),
        in_specs=[
            pl.BlockSpec((S, D), lambda b: (b, 0)),          # x rows of batch b
            pl.BlockSpec((Sk, D), lambda b: (b, 0)),         # encoder rows of batch b
            pl.BlockSpec((1, S, S), lambda b: (b, 0, 0)),    # trg additive bias
            pl.BlockSpec((1, S, Sk), lambda b: (b, 0, 0)),   # src additive bias
            full2d((1, D)), full2d((1, D)),                  # ln1 gamma/beta
            full2d((1, D)), full2d((1, D)),                  # ln2
            full2d((1, D)), full2d((1, D)),                  # ln3
            full2d((D, 3 * D)), full2d((1, 3 * D)),          # self-attn fused QKV
            full2d((D, D)), full2d((1, D)),                  # self-attn out proj
            full2d((D, D)), full2d((1, D)),                  # cross-attn Q
            full2d((D, 2 * D)), full2d((1, 2 * D)),          # cross-attn fused KV
            full2d((D, D)), full2d((1, D)),                  # cross-attn out proj
            full2d((D, F)), full2d((1, F)),                  # ffn w1/b1
            full2d((F, D)), full2d((1, D)),                  # ffn w2/b2
        ],
        out_specs=pl.BlockSpec((S, D), lambda b: (b, 0)),
        compiler_params=pltpu.CompilerParams(
            dimension_semantics=("parallel",)),
    )(
        x.reshape(B * S, D),
        e_outputs.reshape(B * Sk, D),
        trg_bias, src_bias,
        p["n1_g"].reshape(1, D), p["n1_b"].reshape(1, D),
        p["n2_g"].reshape(1, D), p["n2_b"].reshape(1, D),
        p["n3_g"].reshape(1, D), p["n3_b"].reshape(1, D),
        p["attn1"]["wqkv"], p["attn1"]["bqkv"].reshape(1, 3 * D),
        p["attn1"]["wo"], p["attn1"]["bo"].reshape(1, D),
        p["attn2"]["wq"], p["attn2"]["bq"].reshape(1, D),
        p["attn2"]["wkv"], p["attn2"]["bkv"].reshape(1, 2 * D),
        p["attn2"]["wo"], p["attn2"]["bo"].reshape(1, D),
        p["ff_w1"], p["ff_b1"].reshape(1, F),
        p["ff_w2"], p["ff_b2"].reshape(1, D),
    )
    return out.reshape(B, S, D)


# ---------------------------------------------------------------------------
# Final LayerNorm kernel
# ---------------------------------------------------------------------------

def _layernorm_kernel(x_ref, g_ref, b_ref, o_ref, *, eps):
    x = x_ref[...].astype(jnp.float32)
    mu = jnp.mean(x, axis=-1, keepdims=True)
    var = jnp.mean((x - mu) ** 2, axis=-1, keepdims=True)
    o_ref[...] = ((x - mu) * jax.lax.rsqrt(var + eps)
                  * g_ref[...] + b_ref[...]).astype(o_ref.dtype)


def pallas_layernorm(x, gamma, beta, eps=1e-6):
    B, S, D = x.shape
    out = pl.pallas_call(
        functools.partial(_layernorm_kernel, eps=eps),
        out_shape=jax.ShapeDtypeStruct((B * S, D), x.dtype),
        grid=(B,),
        in_specs=[
            pl.BlockSpec((S, D), lambda b: (b, 0)),
            pl.BlockSpec((1, D), lambda b: (0, 0)),
            pl.BlockSpec((1, D), lambda b: (0, 0)),
        ],
        out_specs=pl.BlockSpec((S, D), lambda b: (b, 0)),
        compiler_params=pltpu.CompilerParams(
            dimension_semantics=("parallel",)),
    )(x.reshape(B * S, D), gamma.reshape(1, D), beta.reshape(1, D))
    return out.reshape(B, S, D)


# ---------------------------------------------------------------------------
# Decoder forward (embedding gather + PE add are plain-JAX glue)
# ---------------------------------------------------------------------------

def decoder_forward(params, trg, e_outputs, src_mask, trg_mask, heads):
    d_model = params["embed"].shape[1]
    B, S = trg.shape
    Sk = e_outputs.shape[1]

    # TODO(synk): embedding gather + positional-encoding add kept as plain JAX
    # (data-dependent gather; not a kernel hot path at these sizes).
    x = jnp.take(params["embed"], trg, axis=0) * math.sqrt(d_model)
    x = x + params["pe"][:S][None, :, :]

    # Additive attention biases (0 where visible, -1e9 where masked), built once.
    trg_bias = jnp.where(jnp.broadcast_to(trg_mask, (B, S, S)) > 0,
                         0.0, -1e9).astype(jnp.float32)
    src_bias = jnp.where(jnp.broadcast_to(src_mask, (B, S, Sk)) > 0,
                         0.0, -1e9).astype(jnp.float32)

    for layer_p in params["layers"]:
        x = pallas_decoder_layer(layer_p, x, e_outputs, trg_bias, src_bias, heads)
    return pallas_layernorm(x, params["norm_g"], params["norm_b"])


# ---------------------------------------------------------------------------
# Pure-JAX reference (f32) for a correctness check
# ---------------------------------------------------------------------------

def _reference_forward(params, trg, e_outputs, src_mask, trg_mask, heads):
    d_model = params["embed"].shape[1]
    x = jnp.take(params["embed"], trg, axis=0) * math.sqrt(d_model)
    x = x + params["pe"][: x.shape[1]][None]

    def ln(v, g, b, eps=1e-6):
        mu = v.mean(-1, keepdims=True)
        var = ((v - mu) ** 2).mean(-1, keepdims=True)
        return (v - mu) * jax.lax.rsqrt(var + eps) * g + b

    def mha(q_in, k_in, v_in, mask, wq, bq, wk, bk, wv, bv, wo, bo):
        B, Sq, D = q_in.shape
        Sk = k_in.shape[1]
        dk = D // heads
        q = (q_in @ wq + bq).reshape(B, Sq, heads, dk).transpose(0, 2, 1, 3)
        k = (k_in @ wk + bk).reshape(B, Sk, heads, dk).transpose(0, 2, 1, 3)
        v = (v_in @ wv + bv).reshape(B, Sk, heads, dk).transpose(0, 2, 1, 3)
        s = jnp.einsum("bhqd,bhkd->bhqk", q, k) / math.sqrt(dk)
        m = jnp.broadcast_to(mask[:, None], s.shape)
        s = jnp.where(m > 0, s, -1e9)
        p = jax.nn.softmax(s, axis=-1)
        o = jnp.einsum("bhqk,bhkd->bhqd", p, v).transpose(0, 2, 1, 3).reshape(B, Sq, D)
        return o @ wo + bo

    D = d_model
    for p in params["layers"]:
        wqkv, bqkv = p["attn1"]["wqkv"], p["attn1"]["bqkv"]
        x2 = ln(x, p["n1_g"], p["n1_b"])
        x = x + mha(x2, x2, x2, trg_mask,
                    wqkv[:, :D], bqkv[:D], wqkv[:, D:2 * D], bqkv[D:2 * D],
                    wqkv[:, 2 * D:], bqkv[2 * D:], p["attn1"]["wo"], p["attn1"]["bo"])
        wkv, bkv = p["attn2"]["wkv"], p["attn2"]["bkv"]
        x2 = ln(x, p["n2_g"], p["n2_b"])
        x = x + mha(x2, e_outputs, e_outputs, src_mask,
                    p["attn2"]["wq"], p["attn2"]["bq"],
                    wkv[:, :D], bkv[:D], wkv[:, D:], bkv[D:],
                    p["attn2"]["wo"], p["attn2"]["bo"])
        x2 = ln(x, p["n3_g"], p["n3_b"])
        h = jnp.maximum(x2 @ p["ff_w1"] + p["ff_b1"], 0.0)
        x = x + h @ p["ff_w2"] + p["ff_b2"]
    return ln(x, params["norm_g"], params["norm_b"])


# ---------------------------------------------------------------------------
# Deterministic parameter init
# ---------------------------------------------------------------------------

def _dense(key, din, dout):
    kw, kb = jax.random.split(key)
    w = 0.02 * jax.random.normal(kw, (din, dout), jnp.float32)
    b = 0.02 * jax.random.normal(kb, (dout,), jnp.float32)
    return w, b


def _sinusoidal_pe(max_len, d_model):
    pos = jnp.arange(max_len, dtype=jnp.float32)[:, None]
    i = jnp.arange(0, d_model, 2, dtype=jnp.float32)[None, :]
    angle = pos / jnp.power(10000.0, i / d_model)
    pe = jnp.zeros((max_len, d_model), jnp.float32)
    pe = pe.at[:, 0::2].set(jnp.sin(angle))
    pe = pe.at[:, 1::2].set(jnp.cos(angle))
    return pe


def init_params(key, vocab_size, d_model, d_ff, N, max_len=64):
    keys = jax.random.split(key, 1 + N * 10)
    params = {
        "embed": 0.02 * jax.random.normal(keys[0], (vocab_size, d_model), jnp.float32),
        "pe": _sinusoidal_pe(max_len, d_model),
        "norm_g": jnp.ones((d_model,), jnp.float32),
        "norm_b": jnp.zeros((d_model,), jnp.float32),
        "layers": [],
    }
    idx = 1
    for _ in range(N):
        lk = keys[idx: idx + 10]
        idx += 10
        wq1, bq1 = _dense(lk[0], d_model, d_model)
        wk1, bk1 = _dense(lk[1], d_model, d_model)
        wv1, bv1 = _dense(lk[2], d_model, d_model)
        wo1, bo1 = _dense(lk[3], d_model, d_model)
        attn1 = {"wqkv": jnp.concatenate([wq1, wk1, wv1], axis=1),
                 "bqkv": jnp.concatenate([bq1, bk1, bv1]),
                 "wo": wo1, "bo": bo1}
        wq2, bq2 = _dense(lk[4], d_model, d_model)
        wk2, bk2 = _dense(lk[5], d_model, d_model)
        wv2, bv2 = _dense(lk[6], d_model, d_model)
        wo2, bo2 = _dense(lk[7], d_model, d_model)
        attn2 = {"wq": wq2, "bq": bq2,
                 "wkv": jnp.concatenate([wk2, wv2], axis=1),
                 "bkv": jnp.concatenate([bk2, bv2]),
                 "wo": wo2, "bo": bo2}
        ff_w1, ff_b1 = _dense(lk[8], d_model, d_ff)
        ff_w2, ff_b2 = _dense(lk[9], d_ff, d_model)
        params["layers"].append({
            "n1_g": jnp.ones((d_model,), jnp.float32), "n1_b": jnp.zeros((d_model,), jnp.float32),
            "n2_g": jnp.ones((d_model,), jnp.float32), "n2_b": jnp.zeros((d_model,), jnp.float32),
            "n3_g": jnp.ones((d_model,), jnp.float32), "n3_b": jnp.zeros((d_model,), jnp.float32),
            "attn1": attn1, "attn2": attn2,
            "ff_w1": ff_w1, "ff_b1": ff_b1, "ff_w2": ff_w2, "ff_b2": ff_b2,
        })
    return params


# ---------------------------------------------------------------------------
# main
# ---------------------------------------------------------------------------

if __name__ == "__main__":
    vocab_size, d_model, d_ff, N, heads = 50, 32, 64, 2, 4
    B, S_trg, S_src = 2, 8, 8

    key = jax.random.PRNGKey(0)
    k_params, k_trg, k_enc = jax.random.split(key, 3)

    params = init_params(k_params, vocab_size, d_model, d_ff, N)

    trg = jax.random.randint(k_trg, (B, S_trg), 0, vocab_size)
    e_outputs = jax.random.normal(k_enc, (B, S_src, d_model), jnp.float32)

    # trg_mask: causal (B, S_trg, S_trg); src_mask: all-visible padding mask (B, 1, S_src)
    trg_mask = jnp.tril(jnp.ones((S_trg, S_trg), jnp.float32))[None].repeat(B, axis=0)
    src_mask = jnp.ones((B, 1, S_src), jnp.float32)

    fwd = jax.jit(functools.partial(decoder_forward, heads=heads))
    out = fwd(params, trg, e_outputs, src_mask, trg_mask)
    out = jax.block_until_ready(out)

    ref = jax.block_until_ready(
        _reference_forward(params, trg, e_outputs, src_mask, trg_mask, heads))

    assert out.shape == (B, S_trg, d_model)
    assert bool(jnp.all(jnp.isfinite(out)))
    assert float(jnp.max(jnp.abs(out - ref))) < 0.1
    print("KERNEL_OK")
</pallas_src>

<mosaic_0001>
module attributes {stable_mosaic.version = 11 : i64} {
  func.func @_layernorm_kernel(%arg0: i32, %arg1: memref<8x32xf32, #tpu.memory_space<vmem>>, %arg2: memref<1x32xf32, #tpu.memory_space<vmem>>, %arg3: memref<1x32xf32, #tpu.memory_space<vmem>>, %arg4: memref<8x32xf32, #tpu.memory_space<vmem>>) attributes {dimension_semantics = [#tpu.dimension_semantics<parallel>], iteration_bounds = array<i64: 2>, scalar_prefetch = 0 : i64, scratch_operands = 0 : i64, tpu.core_type = #tpu.core_type<tc>, window_params = [{transform_indices = @transform_0, window_bounds = array<i64: 8, 32>}, {pipeline_mode = #tpu.pipeline_mode<synchronous>, transform_indices = @transform_1, window_bounds = array<i64: 1, 32>}, {pipeline_mode = #tpu.pipeline_mode<synchronous>, transform_indices = @transform_2, window_bounds = array<i64: 1, 32>}, {transform_indices = @transform_3, window_bounds = array<i64: 8, 32>}]} {
    %c0 = arith.constant 0 : index
    %c0_0 = arith.constant 0 : index
    %0 = vector.load %arg1[%c0, %c0_0] : memref<8x32xf32, #tpu.memory_space<vmem>>, vector<8x32xf32>
    %cst = arith.constant dense<0.000000e+00> : vector<8xf32>
    %1 = vector.multi_reduction <add>, %0, %cst [1] : vector<8x32xf32> to vector<8xf32>
    %2 = vector.shape_cast %1 : vector<8xf32> to vector<8x1xf32>
    %cst_1 = arith.constant 3.200000e+01 : f32
    %3 = vector.broadcast %cst_1 : f32 to vector<8x1xf32>
    %4 = arith.divf %2, %3 : vector<8x1xf32>
    %5 = vector.broadcast %4 : vector<8x1xf32> to vector<8x32xf32>
    %6 = arith.subf %0, %5 : vector<8x32xf32>
    %7 = arith.mulf %6, %6 : vector<8x32xf32>
    %cst_2 = arith.constant dense<0.000000e+00> : vector<8xf32>
    %8 = vector.multi_reduction <add>, %7, %cst_2 [1] : vector<8x32xf32> to vector<8xf32>
    %9 = vector.shape_cast %8 : vector<8xf32> to vector<8x1xf32>
    %cst_3 = arith.constant 3.200000e+01 : f32
    %10 = vector.broadcast %cst_3 : f32 to vector<8x1xf32>
    %11 = arith.divf %9, %10 : vector<8x1xf32>
    %12 = vector.broadcast %4 : vector<8x1xf32> to vector<8x32xf32>
    %13 = arith.subf %0, %12 : vector<8x32xf32>
    %cst_4 = arith.constant 9.99999997E-7 : f32
    %14 = vector.broadcast %cst_4 : f32 to vector<8x1xf32>
    %15 = arith.addf %11, %14 : vector<8x1xf32>
    %16 = math.rsqrt %15 : vector<8x1xf32>
    %17 = vector.broadcast %16 : vector<8x1xf32> to vector<8x32xf32>
    %18 = arith.mulf %13, %17 : vector<8x32xf32>
    %c0_5 = arith.constant 0 : index
    %c0_6 = arith.constant 0 : index
    %19 = vector.load %arg2[%c0_5, %c0_6] : memref<1x32xf32, #tpu.memory_space<vmem>>, vector<1x32xf32>
    %20 = vector.broadcast %19 : vector<1x32xf32> to vector<8x32xf32>
    %21 = arith.mulf %18, %20 : vector<8x32xf32>
    %c0_7 = arith.constant 0 : index
    %c0_8 = arith.constant 0 : index
    %22 = vector.load %arg3[%c0_7, %c0_8] : memref<1x32xf32, #tpu.memory_space<vmem>>, vector<1x32xf32>
    %23 = vector.broadcast %22 : vector<1x32xf32> to vector<8x32xf32>
    %24 = arith.addf %21, %23 : vector<8x32xf32>
    %c0_9 = arith.constant 0 : index
    %c0_10 = arith.constant 0 : index
    %25 = vector.load %arg4[%c0_9, %c0_10] : memref<8x32xf32, #tpu.memory_space<vmem>>, vector<8x32xf32>
    tpu.vector_store %arg4[%c0_9, %c0_10], %24 {strides = array<i32>} : memref<8x32xf32, #tpu.memory_space<vmem>>, vector<8x32xf32>,
    return
  }
  func.func @transform_0(%arg0: i32) -> (i32, i32) {
    %c0_i32 = arith.constant 0 : i32
    %c0_i32_0 = arith.constant 0 : i32
    return %arg0, %c0_i32 : i32, i32
  }
  func.func @transform_1(%arg0: i32) -> (i32, i32) {
    %c0_i32 = arith.constant 0 : i32
    %c0_i32_0 = arith.constant 0 : i32
    %c0_i32_1 = arith.constant 0 : i32
    return %c0_i32, %c0_i32_0 : i32, i32
  }
  func.func @transform_2(%arg0: i32) -> (i32, i32) {
    %c0_i32 = arith.constant 0 : i32
    %c0_i32_0 = arith.constant 0 : i32
    %c0_i32_1 = arith.constant 0 : i32
    return %c0_i32, %c0_i32_0 : i32, i32
  }
  func.func @transform_3(%arg0: i32) -> (i32, i32) {
    %c0_i32 = arith.constant 0 : i32
    %c0_i32_0 = arith.constant 0 : i32
    return %arg0, %c0_i32 : i32, i32
  }
}

module attributes {stable_mosaic.version = 11 : i64} {
  func.func @_decoder_layer_kernel(%arg0: i32, %arg1: memref<8x32xf32, #tpu.memory_space<vmem>>, %arg2: memref<8x32xf32, #tpu.memory_space<vmem>>, %arg3: memref<1x8x8xf32, #tpu.memory_space<vmem>>, %arg4: memref<1x8x8xf32, #tpu.memory_space<vmem>>, %arg5: memref<1x32xf32, #tpu.memory_space<vmem>>, %arg6: memref<1x32xf32, #tpu.memory_space<vmem>>, %arg7: memref<1x32xf32, #tpu.memory_space<vmem>>, %arg8: memref<1x32xf32, #tpu.memory_space<vmem>>, %arg9: memref<1x32xf32, #tpu.memory_space<vmem>>, %arg10: memref<1x32xf32, #tpu.memory_space<vmem>>, %arg11: memref<32x96xf32, #tpu.memory_space<vmem>>, %arg12: memref<1x96xf32, #tpu.memory_space<vmem>>, %arg13: memref<32x32xf32, #tpu.memory_space<vmem>>, %arg14: memref<1x32xf32, #tpu.memory_space<vmem>>, %arg15: memref<32x32xf32, #tpu.memory_space<vmem>>, %arg16: memref<1x32xf32, #tpu.memory_space<vmem>>, %arg17: memref<32x64xf32, #tpu.memory_space<vmem>>, %arg18: memref<1x64xf32, #tpu.memory_space<vmem>>, %arg19: memref<32x32xf32, #tpu.memory_space<vmem>>, %arg20: memref<1x32xf32, #tpu.memory_space<vmem>>, %arg21: memref<32x64xf32, #tpu.memory_space<vmem>>, %arg22: memref<1x64xf32, #tpu.memory_space<vmem>>, %arg23: memref<64x32xf32, #tpu.memory_space<vmem>>, %arg24: memref<1x32xf32, #tpu.memory_space<vmem>>, %arg25: memref<8x32xf32, #tpu.memory_space<vmem>>) attributes {dimension_semantics = [#tpu.dimension_semantics<parallel>], iteration_bounds = array<i64: 2>, scalar_prefetch = 0 : i64, scratch_operands = 0 : i64, tpu.core_type = #tpu.core_type<tc>, window_params = [{transform_indices = @transform_0, window_bounds = array<i64: 8, 32>}, {transform_indices = @transform_1, window_bounds = array<i64: 8, 32>}, {transform_indices = @transform_2, window_bounds = array<i64: 1, 8, 8>}, {transform_indices = @transform_3, window_bounds = array<i64: 1, 8, 8>}, {pipeline_mode = #tpu.pipeline_mode<synchronous>, transform_indices = @transform_4, window_bounds = array<i64: 1, 32>}, {pipeline_mode = #tpu.pipeline_mode<synchronous>, transform_indices = @transform_5, window_bounds = array<i64: 1, 32>}, {pipeline_mode = #tpu.pipeline_mode<synchronous>, transform_indices = @transform_6, window_bounds = array<i64: 1, 32>}, {pipeline_mode = #tpu.pipeline_mode<synchronous>, transform_indices = @transform_7, window_bounds = array<i64: 1, 32>}, {pipeline_mode = #tpu.pipeline_mode<synchronous>, transform_indices = @transform_8, window_bounds = array<i64: 1, 32>}, {pipeline_mode = #tpu.pipeline_mode<synchronous>, transform_indices = @transform_9, window_bounds = array<i64: 1, 32>}, {pipeline_mode = #tpu.pipeline_mode<synchronous>, transform_indices = @transform_10, window_bounds = array<i64: 32, 96>}, {pipeline_mode = #tpu.pipeline_mode<synchronous>, transform_indices = @transform_11, window_bounds = array<i64: 1, 96>}, {pipeline_mode = #tpu.pipeline_mode<synchronous>, transform_indices = @transform_12, window_bounds = array<i64: 32, 32>}, {pipeline_mode = #tpu.pipeline_mode<synchronous>, transform_indices = @transform_13, window_bounds = array<i64: 1, 32>}, {pipeline_mode = #tpu.pipeline_mode<synchronous>, transform_indices = @transform_14, window_bounds = array<i64: 32, 32>}, {pipeline_mode = #tpu.pipeline_mode<synchronous>, transform_indices = @transform_15, window_bounds = array<i64: 1, 32>}, {pipeline_mode = #tpu.pipeline_mode<synchronous>, transform_indices = @transform_16, window_bounds = array<i64: 32, 64>}, {pipeline_mode = #tpu.pipeline_mode<synchronous>, transform_indices = @transform_17, window_bounds = array<i64: 1, 64>}, {pipeline_mode = #tpu.pipeline_mode<synchronous>, transform_indices = @transform_18, window_bounds = array<i64: 32, 32>}, {pipeline_mode = #tpu.pipeline_mode<synchronous>, transform_indices = @transform_19, window_bounds = array<i64: 1, 32>}, {pipeline_mode = #tpu.pipeline_mode<synchronous>, transform_indices = @transform_20, window_bounds = array<i64: 32, 64>}, {pipeline_mode = #tpu.pipeline_mode<synchronous>, transform_indices = @transform_21, window_bounds = array<i64: 1, 64>}, {pipeline_mode = #tpu.pipeline_mode<synchronous>, transform_indices = @transform_22, window_bounds = array<i64: 64, 32>}, {pipeline_mode = #tpu.pipeline_mode<synchronous>, transform_indices = @transform_23, window_bounds = array<i64: 1, 32>}, {transform_indices = @transform_24, window_bounds = array<i64: 8, 32>}]} {
    %c0 = arith.constant 0 : index
    %c0_0 = arith.constant 0 : index
    %0 = vector.load %arg1[%c0, %c0_0] : memref<8x32xf32, #tpu.memory_space<vmem>>, vector<8x32xf32>
    %c0_1 = arith.constant 0 : index
    %c0_2 = arith.constant 0 : index
    %1 = vector.load %arg2[%c0_1, %c0_2] : memref<8x32xf32, #tpu.memory_space<vmem>>, vector<8x32xf32>
    %c0_3 = arith.constant 0 : index
    %c0_4 = arith.constant 0 : index
    %c0_5 = arith.constant 0 : index
    %2 = vector.load %arg3[%c0_3, %c0_4, %c0_5] : memref<1x8x8xf32, #tpu.memory_space<vmem>>, vector<1x8x8xf32>
    %3 = vector.shape_cast %2 : vector<1x8x8xf32> to vector<8x8xf32>
    %c0_6 = arith.constant 0 : index
    %c0_7 = arith.constant 0 : index
    %c0_8 = arith.constant 0 : index
    %4 = vector.load %arg4[%c0_6, %c0_7, %c0_8] : memref<1x8x8xf32, #tpu.memory_space<vmem>>, vector<1x8x8xf32>
    %5 = vector.shape_cast %4 : vector<1x8x8xf32> to vector<8x8xf32>
    %cst = arith.constant dense<0.000000e+00> : vector<8xf32>
    %6 = vector.multi_reduction <add>, %0, %cst [1] : vector<8x32xf32> to vector<8xf32>
    %7 = vector.shape_cast %6 : vector<8xf32> to vector<8x1xf32>
    %cst_9 = arith.constant 3.200000e+01 : f32
    %8 = vector.broadcast %cst_9 : f32 to vector<8x1xf32>
    %9 = arith.divf %7, %8 : vector<8x1xf32>
    %10 = vector.broadcast %9 : vector<8x1xf32> to vector<8x32xf32>
    %11 = arith.subf %0, %10 : vector<8x32xf32>
    %12 = arith.mulf %11, %11 : vector<8x32xf32>
    %cst_10 = arith.constant dense<0.000000e+00> : vector<8xf32>
    %13 = vector.multi_reduction <add>, %12, %cst_10 [1] : vector<8x32xf32> to vector<8xf32>
    %14 = vector.shape_cast %13 : vector<8xf32> to vector<8x1xf32>
    %cst_11 = arith.constant 3.200000e+01 : f32
    %15 = vector.broadcast %cst_11 : f32 to vector<8x1xf32>
    %16 = arith.divf %14, %15 : vector<8x1xf32>
    %17 = vector.broadcast %9 : vector<8x1xf32> to vector<8x32xf32>
    %18 = arith.subf %0, %17 : vector<8x32xf32>
    %cst_12 = arith.constant 9.99999997E-7 : f32
    %19 = vector.broadcast %cst_12 : f32 to vector<8x1xf32>
    %20 = arith.addf %16, %19 : vector<8x1xf32>
    %21 = math.rsqrt %20 : vector<8x1xf32>
    %22 = vector.broadcast %21 : vector<8x1xf32> to vector<8x32xf32>
    %23 = arith.mulf %18, %22 : vector<8x32xf32>
    %c0_13 = arith.constant 0 : index
    %c0_14 = arith.constant 0 : index
    %24 = vector.load %arg5[%c0_13, %c0_14] : memref<1x32xf32, #tpu.memory_space<vmem>>, vector<1x32xf32>
    %25 = vector.broadcast %24 : vector<1x32xf32> to vector<8x32xf32>
    %26 = arith.mulf %23, %25 : vector<8x32xf32>
    %c0_15 = arith.constant 0 : index
    %c0_16 = arith.constant 0 : index
    %27 = vector.load %arg6[%c0_15, %c0_16] : memref<1x32xf32, #tpu.memory_space<vmem>>, vector<1x32xf32>
    %28 = vector.broadcast %27 : vector<1x32xf32> to vector<8x32xf32>
    %29 = arith.addf %26, %28 : vector<8x32xf32>
    %30 = arith.truncf %29 : vector<8x32xf32> to vector<8x32xbf16>
    %c0_17 = arith.constant 0 : index
    %c0_18 = arith.constant 0 : index
    %31 = vector.load %arg11[%c0_17, %c0_18] : memref<32x96xf32, #tpu.memory_space<vmem>>, vector<32x96xf32>
    %32 = arith.truncf %31 : vector<32x96xf32> to vector<32x96xbf16>
    %cst_19 = arith.constant dense<0.000000e+00> : vector<8x96xf32>
    %33 = tpu.matmul %30, %32, %cst_19 {dimension_numbers = #tpu.dot_dimension_numbers<[1], [0], [0], [1], [0, 0, 1, 1], [], []>} : vector<8x32xbf16>, vector<32x96xbf16>, vector<8x96xf32> -> vector<8x96xf32>
    %c0_20 = arith.constant 0 : index
    %c0_21 = arith.constant 0 : index
    %34 = vector.load %arg12[%c0_20, %c0_21] : memref<1x96xf32, #tpu.memory_space<vmem>>, vector<1x96xf32>
    %35 = vector.broadcast %34 : vector<1x96xf32> to vector<8x96xf32>
    %36 = arith.addf %33, %35 : vector<8x96xf32>
    %37 = vector.extract_strided_slice %36 {offsets = [0, 0], sizes = [8, 32], strides = [1, 1]} : vector<8x96xf32> to vector<8x32xf32>
    %38 = vector.extract_strided_slice %36 {offsets = [0, 32], sizes = [8, 32], strides = [1, 1]} : vector<8x96xf32> to vector<8x32xf32>
    %39 = vector.extract_strided_slice %36 {offsets = [0, 64], sizes = [8, 32], strides = [1, 1]} : vector<8x96xf32> to vector<8x32xf32>
    %40 = vector.extract_strided_slice %37 {offsets = [0, 0], sizes = [8, 8], strides = [1, 1]} : vector<8x32xf32> to vector<8x8xf32>
    %41 = arith.truncf %40 : vector<8x8xf32> to vector<8x8xbf16>
    %42 = vector.extract_strided_slice %38 {offsets = [0, 0], sizes = [8, 8], strides = [1, 1]} : vector<8x32xf32> to vector<8x8xf32>
    %43 = arith.truncf %42 : vector<8x8xf32> to vector<8x8xbf16>
    %44 = vector.extract_strided_slice %39 {offsets = [0, 0], sizes = [8, 8], strides = [1, 1]} : vector<8x32xf32> to vector<8x8xf32>
    %45 = arith.truncf %44 : vector<8x8xf32> to vector<8x8xbf16>
    %cst_22 = arith.constant dense<0.000000e+00> : vector<8x8xf32>
    %46 = tpu.matmul %41, %43, %cst_22 {dimension_numbers = #tpu.dot_dimension_numbers<[1], [1], [0], [0], [0, 0, 1, 0], [], []>} : vector<8x8xbf16>, vector<8x8xbf16>, vector<8x8xf32> -> vector<8x8xf32>
    %cst_23 = arith.constant 0.353553385 : f32
    %47 = vector.broadcast %cst_23 : f32 to vector<8x8xf32>
    %48 = arith.mulf %46, %47 : vector<8x8xf32>
    %49 = arith.addf %48, %3 : vector<8x8xf32>
    %cst_24 = arith.constant dense<0xFF800000> : vector<8xf32>
    %50 = vector.multi_reduction <maximumf>, %49, %cst_24 [1] : vector<8x8xf32> to vector<8xf32>
    %51 = vector.shape_cast %50 : vector<8xf32> to vector<8x1xf32>
    %52 = vector.broadcast %51 : vector<8x1xf32> to vector<8x8xf32>
    %53 = arith.subf %49, %52 : vector<8x8xf32>
    %54 = math.exp %53 : vector<8x8xf32>
    %cst_25 = arith.constant dense<0.000000e+00> : vector<8xf32>
    %55 = vector.multi_reduction <add>, %54, %cst_25 [1] : vector<8x8xf32> to vector<8xf32>
    %56 = vector.shape_cast %55 : vector<8xf32> to vector<8x1xf32>
    %57 = tpu.reciprocal %56 {approx = true} : vector<8x1xf32> -> vector<8x1xf32>
    %58 = vector.broadcast %57 : vector<8x1xf32> to vector<8x8xf32>
    %59 = arith.mulf %54, %58 : vector<8x8xf32>
    %60 = arith.truncf %59 : vector<8x8xf32> to vector<8x8xbf16>
    %cst_26 = arith.constant dense<0.000000e+00> : vector<8x8xf32>
    %61 = tpu.matmul %60, %45, %cst_26 {dimension_numbers = #tpu.dot_dimension_numbers<[1], [0], [0], [1], [0, 0, 1, 1], [], []>} : vector<8x8xbf16>, vector<8x8xbf16>, vector<8x8xf32> -> vector<8x8xf32>
    %62 = vector.extract_strided_slice %37 {offsets = [0, 8], sizes = [8, 8], strides = [1, 1]} : vector<8x32xf32> to vector<8x8xf32>
    %63 = arith.truncf %62 : vector<8x8xf32> to vector<8x8xbf16>
    %64 = vector.extract_strided_slice %38 {offsets = [0, 8], sizes = [8, 8], strides = [1, 1]} : vector<8x32xf32> to vector<8x8xf32>
    %65 = arith.truncf %64 : vector<8x8xf32> to vector<8x8xbf16>
    %66 = vector.extract_strided_slice %39 {offsets = [0, 8], sizes = [8, 8], strides = [1, 1]} : vector<8x32xf32> to vector<8x8xf32>
    %67 = arith.truncf %66 : vector<8x8xf32> to vector<8x8xbf16>
    %cst_27 = arith.constant dense<0.000000e+00> : vector<8x8xf32>
    %68 = tpu.matmul %63, %65, %cst_27 {dimension_numbers = #tpu.dot_dimension_numbers<[1], [1], [0], [0], [0, 0, 1, 0], [], []>} : vector<8x8xbf16>, vector<8x8xbf16>, vector<8x8xf32> -> vector<8x8xf32>
    %cst_28 = arith.constant 0.353553385 : f32
    %69 = vector.broadcast %cst_28 : f32 to vector<8x8xf32>
    %70 = arith.mulf %68, %69 : vector<8x8xf32>
    %71 = arith.addf %70, %3 : vector<8x8xf32>
    %cst_29 = arith.constant dense<0xFF800000> : vector<8xf32>
    %72 = vector.multi_reduction <maximumf>, %71, %cst_29 [1] : vector<8x8xf32> to vector<8xf32>
    %73 = vector.shape_cast %72 : vector<8xf32> to vector<8x1xf32>
    %74 = vector.broadcast %73 : vector<8x1xf32> to vector<8x8xf32>
    %75 = arith.subf %71, %74 : vector<8x8xf32>
    %76 = math.exp %75 : vector<8x8xf32>
    %cst_30 = arith.constant dense<0.000000e+00> : vector<8xf32>
    %77 = vector.multi_reduction <add>, %76, %cst_30 [1] : vector<8x8xf32> to vector<8xf32>
    %78 = vector.shape_cast %77 : vector<8xf32> to vector<8x1xf32>
    %79 = tpu.reciprocal %78 {approx = true} : vector<8x1xf32> -> vector<8x1xf32>
    %80 = vector.broadcast %79 : vector<8x1xf32> to vector<8x8xf32>
    %81 = arith.mulf %76, %80 : vector<8x8xf32>
    %82 = arith.truncf %81 : vector<8x8xf32> to vector<8x8xbf16>
    %cst_31 = arith.constant dense<0.000000e+00> : vector<8x8xf32>
    %83 = tpu.matmul %82, %67, %cst_31 {dimension_numbers = #tpu.dot_dimension_numbers<[1], [0], [0], [1], [0, 0, 1, 1], [], []>} : vector<8x8xbf16>, vector<8x8xbf16>, vector<8x8xf32> -> vector<8x8xf32>
    %84 = vector.extract_strided_slice %37 {offsets = [0, 16], sizes = [8, 8], strides = [1, 1]} : vector<8x32xf32> to vector<8x8xf32>
    %85 = arith.truncf %84 : vector<8x8xf32> to vector<8x8xbf16>
    %86 = vector.extract_strided_slice %38 {offsets = [0, 16], sizes = [8, 8], strides = [1, 1]} : vector<8x32xf32> to vector<8x8xf32>
    %87 = arith.truncf %86 : vector<8x8xf32> to vector<8x8xbf16>
    %88 = vector.extract_strided_slice %39 {offsets = [0, 16], sizes = [8, 8], strides = [1, 1]} : vector<8x32xf32> to vector<8x8xf32>
    %89 = arith.truncf %88 : vector<8x8xf32> to vector<8x8xbf16>
    %cst_32 = arith.constant dense<0.000000e+00> : vector<8x8xf32>
    %90 = tpu.matmul %85, %87, %cst_32 {dimension_numbers = #tpu.dot_dimension_numbers<[1], [1], [0], [0], [0, 0, 1, 0], [], []>} : vector<8x8xbf16>, vector<8x8xbf16>, vector<8x8xf32> -> vector<8x8xf32>
    %cst_33 = arith.constant 0.353553385 : f32
    %91 = vector.broadcast %cst_33 : f32 to vector<8x8xf32>
    %92 = arith.mulf %90, %91 : vector<8x8xf32>
    %93 = arith.addf %92, %3 : vector<8x8xf32>
    %cst_34 = arith.constant dense<0xFF800000> : vector<8xf32>
    %94 = vector.multi_reduction <maximumf>, %93, %cst_34 [1] : vector<8x8xf32> to vector<8xf32>
    %95 = vector.shape_cast %94 : vector<8xf32> to vector<8x1xf32>
    %96 = vector.broadcast %95 : vector<8x1xf32> to vector<8x8xf32>
    %97 = arith.subf %93, %96 : vector<8x8xf32>
    %98 = math.exp %97 : vector<8x8xf32>
    %cst_35 = arith.constant dense<0.000000e+00> : vector<8xf32>
    %99 = vector.multi_reduction <add>, %98, %cst_35 [1] : vector<8x8xf32> to vector<8xf32>
    %100 = vector.shape_cast %99 : vector<8xf32> to vector<8x1xf32>
    %101 = tpu.reciprocal %100 {approx = true} : vector<8x1xf32> -> vector<8x1xf32>
    %102 = vector.broadcast %101 : vector<8x1xf32> to vector<8x8xf32>
    %103 = arith.mulf %98, %102 : vector<8x8xf32>
    %104 = arith.truncf %103 : vector<8x8xf32> to vector<8x8xbf16>
    %cst_36 = arith.constant dense<0.000000e+00> : vector<8x8xf32>
    %105 = tpu.matmul %104, %89, %cst_36 {dimension_numbers = #tpu.dot_dimension_numbers<[1], [0], [0], [1], [0, 0, 1, 1], [], []>} : vector<8x8xbf16>, vector<8x8xbf16>, vector<8x8xf32> -> vector<8x8xf32>
    %106 = vector.extract_strided_slice %37 {offsets = [0, 24], sizes = [8, 8], strides = [1, 1]} : vector<8x32xf32> to vector<8x8xf32>
    %107 = arith.truncf %106 : vector<8x8xf32> to vector<8x8xbf16>
    %108 = vector.extract_strided_slice %38 {offsets = [0, 24], sizes = [8, 8], strides = [1, 1]} : vector<8x32xf32> to vector<8x8xf32>
    %109 = arith.truncf %108 : vector<8x8xf32> to vector<8x8xbf16>
    %110 = vector.extract_strided_slice %39 {offsets = [0, 24], sizes = [8, 8], strides = [1, 1]} : vector<8x32xf32> to vector<8x8xf32>
    %111 = arith.truncf %110 : vector<8x8xf32> to vector<8x8xbf16>
    %cst_37 = arith.constant dense<0.000000e+00> : vector<8x8xf32>
    %112 = tpu.matmul %107, %109, %cst_37 {dimension_numbers = #tpu.dot_dimension_numbers<[1], [1], [0], [0], [0, 0, 1, 0], [], []>} : vector<8x8xbf16>, vector<8x8xbf16>, vector<8x8xf32> -> vector<8x8xf32>
    %cst_38 = arith.constant 0.353553385 : f32
    %113 = vector.broadcast %cst_38 : f32 to vector<8x8xf32>
    %114 = arith.mulf %112, %113 : vector<8x8xf32>
    %115 = arith.addf %114, %3 : vector<8x8xf32>
    %cst_39 = arith.constant dense<0xFF800000> : vector<8xf32>
    %116 = vector.multi_reduction <maximumf>, %115, %cst_39 [1] : vector<8x8xf32> to vector<8xf32>
    %117 = vector.shape_cast %116 : vector<8xf32> to vector<8x1xf32>
    %118 = vector.broadcast %117 : vector<8x1xf32> to vector<8x8xf32>
    %119 = arith.subf %115, %118 : vector<8x8xf32>
    %120 = math.exp %119 : vector<8x8xf32>
    %cst_40 = arith.constant dense<0.000000e+00> : vector<8xf32>
    %121 = vector.multi_reduction <add>, %120, %cst_40 [1] : vector<8x8xf32> to vector<8xf32>
    %122 = vector.shape_cast %121 : vector<8xf32> to vector<8x1xf32>
    %123 = tpu.reciprocal %122 {approx = true} : vector<8x1xf32> -> vector<8x1xf32>
    %124 = vector.broadcast %123 : vector<8x1xf32> to vector<8x8xf32>
    %125 = arith.mulf %120, %124 : vector<8x8xf32>
    %126 = arith.truncf %125 : vector<8x8xf32> to vector<8x8xbf16>
    %cst_41 = arith.constant dense<0.000000e+00> : vector<8x8xf32>
    %127 = tpu.matmul %126, %111, %cst_41 {dimension_numbers = #tpu.dot_dimension_numbers<[1], [0], [0], [1], [0, 0, 1, 1], [], []>} : vector<8x8xbf16>, vector<8x8xbf16>, vector<8x8xf32> -> vector<8x8xf32>
    %128 = tpu.concatenate %61, %83, %105, %127 in 1 : vector<8x8xf32>, vector<8x8xf32>, vector<8x8xf32>, vector<8x8xf32> -> vector<8x32xf32>
    %129 = arith.truncf %128 : vector<8x32xf32> to vector<8x32xbf16>
    %c0_42 = arith.constant 0 : index
    %c0_43 = arith.constant 0 : index
    %130 = vector.load %arg13[%c0_42, %c0_43] : memref<32x32xf32, #tpu.memory_space<vmem>>, vector<32x32xf32>
    %131 = arith.truncf %130 : vector<32x32xf32> to vector<32x32xbf16>
    %cst_44 = arith.constant dense<0.000000e+00> : vector<8x32xf32>
    %132 = tpu.matmul %129, %131, %cst_44 {dimension_numbers = #tpu.dot_dimension_numbers<[1], [0], [0], [1], [0, 0, 1, 1], [], []>} : vector<8x32xbf16>, vector<32x32xbf16>, vector<8x32xf32> -> vector<8x32xf32>
    %c0_45 = arith.constant 0 : index
    %c0_46 = arith.constant 0 : index
    %133 = vector.load %arg14[%c0_45, %c0_46] : memref<1x32xf32, #tpu.memory_space<vmem>>, vector<1x32xf32>
    %134 = vector.broadcast %133 : vector<1x32xf32> to vector<8x32xf32>
    %135 = arith.addf %132, %134 : vector<8x32xf32>
    %136 = arith.addf %0, %135 : vector<8x32xf32>
    %cst_47 = arith.constant dense<0.000000e+00> : vector<8xf32>
    %137 = vector.multi_reduction <add>, %136, %cst_47 [1] : vector<8x32xf32> to vector<8xf32>
    %138 = vector.shape_cast %137 : vector<8xf32> to vector<8x1xf32>
    %cst_48 = arith.constant 3.200000e+01 : f32
    %139 = vector.broadcast %cst_48 : f32 to vector<8x1xf32>
    %140 = arith.divf %138, %139 : vector<8x1xf32>
    %141 = vector.broadcast %140 : vector<8x1xf32> to vector<8x32xf32>
    %142 = arith.subf %136, %141 : vector<8x32xf32>
    %143 = arith.mulf %142, %142 : vector<8x32xf32>
    %cst_49 = arith.constant dense<0.000000e+00> : vector<8xf32>
    %144 = vector.multi_reduction <add>, %143, %cst_49 [1] : vector<8x32xf32> to vector<8xf32>
    %145 = vector.shape_cast %144 : vector<8xf32> to vector<8x1xf32>
    %cst_50 = arith.constant 3.200000e+01 : f32
    %146 = vector.broadcast %cst_50 : f32 to vector<8x1xf32>
    %147 = arith.divf %145, %146 : vector<8x1xf32>
    %148 = vector.broadcast %140 : vector<8x1xf32> to vector<8x32xf32>
    %149 = arith.subf %136, %148 : vector<8x32xf32>
    %cst_51 = arith.constant 9.99999997E-7 : f32
    %150 = vector.broadcast %cst_51 : f32 to vector<8x1xf32>
    %151 = arith.addf %147, %150 : vector<8x1xf32>
    %152 = math.rsqrt %151 : vector<8x1xf32>
    %153 = vector.broadcast %152 : vector<8x1xf32> to vector<8x32xf32>
    %154 = arith.mulf %149, %153 : vector<8x32xf32>
    %c0_52 = arith.constant 0 : index
    %c0_53 = arith.constant 0 : index
    %155 = vector.load %arg7[%c0_52, %c0_53] : memref<1x32xf32, #tpu.memory_space<vmem>>, vector<1x32xf32>
    %156 = vector.broadcast %155 : vector<1x32xf32> to vector<8x32xf32>
    %157 = arith.mulf %154, %156 : vector<8x32xf32>
    %c0_54 = arith.constant 0 : index
    %c0_55 = arith.constant 0 : index
    %158 = vector.load %arg8[%c0_54, %c0_55] : memref<1x32xf32, #tpu.memory_space<vmem>>, vector<1x32xf32>
    %159 = vector.broadcast %158 : vector<1x32xf32> to vector<8x32xf32>
    %160 = arith.addf %157, %159 : vector<8x32xf32>
    %161 = arith.truncf %160 : vector<8x32xf32> to vector<8x32xbf16>
    %c0_56 = arith.constant 0 : index
    %c0_57 = arith.constant 0 : index
    %162 = vector.load %arg15[%c0_56, %c0_57] : memref<32x32xf32, #tpu.memory_space<vmem>>, vector<32x32xf32>
    %163 = arith.truncf %162 : vector<32x32xf32> to vector<32x32xbf16>
    %cst_58 = arith.constant dense<0.000000e+00> : vector<8x32xf32>
    %164 = tpu.matmul %161, %163, %cst_58 {dimension_numbers = #tpu.dot_dimension_numbers<[1], [0], [0], [1], [0, 0, 1, 1], [], []>} : vector<8x32xbf16>, vector<32x32xbf16>, vector<8x32xf32> -> vector<8x32xf32>
    %c0_59 = arith.constant 0 : index
    %c0_60 = arith.constant 0 : index
    %165 = vector.load %arg16[%c0_59, %c0_60] : memref<1x32xf32, #tpu.memory_space<vmem>>, vector<1x32xf32>
    %166 = vector.broadcast %165 : vector<1x32xf32> to vector<8x32xf32>
    %167 = arith.addf %164, %166 : vector<8x32xf32>
    %168 = arith.truncf %1 : vector<8x32xf32> to vector<8x32xbf16>
    %c0_61 = arith.constant 0 : index
    %c0_62 = arith.constant 0 : index
    %169 = vector.load %arg17[%c0_61, %c0_62] : memref<32x64xf32, #tpu.memory_space<vmem>>, vector<32x64xf32>
    %170 = arith.truncf %169 : vector<32x64xf32> to vector<32x64xbf16>
    %cst_63 = arith.constant dense<0.000000e+00> : vector<8x64xf32>
    %171 = tpu.matmul %168, %170, %cst_63 {dimension_numbers = #tpu.dot_dimension_numbers<[1], [0], [0], [1], [0, 0, 1, 1], [], []>} : vector<8x32xbf16>, vector<32x64xbf16>, vector<8x64xf32> -> vector<8x64xf32>
    %c0_64 = arith.constant 0 : index
    %c0_65 = arith.constant 0 : index
    %172 = vector.load %arg18[%c0_64, %c0_65] : memref<1x64xf32, #tpu.memory_space<vmem>>, vector<1x64xf32>
    %173 = vector.broadcast %172 : vector<1x64xf32> to vector<8x64xf32>
    %174 = arith.addf %171, %173 : vector<8x64xf32>
    %175 = vector.extract_strided_slice %174 {offsets = [0, 0], sizes = [8, 32], strides = [1, 1]} : vector<8x64xf32> to vector<8x32xf32>
    %176 = vector.extract_strided_slice %174 {offsets = [0, 32], sizes = [8, 32], strides = [1, 1]} : vector<8x64xf32> to vector<8x32xf32>
    %177 = vector.extract_strided_slice %167 {offsets = [0, 0], sizes = [8, 8], strides = [1, 1]} : vector<8x32xf32> to vector<8x8xf32>
    %178 = arith.truncf %177 : vector<8x8xf32> to vector<8x8xbf16>
    %179 = vector.extract_strided_slice %175 {offsets = [0, 0], sizes = [8, 8], strides = [1, 1]} : vector<8x32xf32> to vector<8x8xf32>
    %180 = arith.truncf %179 : vector<8x8xf32> to vector<8x8xbf16>
    %181 = vector.extract_strided_slice %176 {offsets = [0, 0], sizes = [8, 8], strides = [1, 1]} : vector<8x32xf32> to vector<8x8xf32>
    %182 = arith.truncf %181 : vector<8x8xf32> to vector<8x8xbf16>
    %cst_66 = arith.constant dense<0.000000e+00> : vector<8x8xf32>
    %183 = tpu.matmul %178, %180, %cst_66 {dimension_numbers = #tpu.dot_dimension_numbers<[1], [1], [0], [0], [0, 0, 1, 0], [], []>} : vector<8x8xbf16>, vector<8x8xbf16>, vector<8x8xf32> -> vector<8x8xf32>
    %cst_67 = arith.constant 0.353553385 : f32
    %184 = vector.broadcast %cst_67 : f32 to vector<8x8xf32>
    %185 = arith.mulf %183, %184 : vector<8x8xf32>
    %186 = arith.addf %185, %5 : vector<8x8xf32>
    %cst_68 = arith.constant dense<0xFF800000> : vector<8xf32>
    %187 = vector.multi_reduction <maximumf>, %186, %cst_68 [1] : vector<8x8xf32> to vector<8xf32>
    %188 = vector.shape_cast %187 : vector<8xf32> to vector<8x1xf32>
    %189 = vector.broadcast %188 : vector<8x1xf32> to vector<8x8xf32>
    %190 = arith.subf %186, %189 : vector<8x8xf32>
    %191 = math.exp %190 : vector<8x8xf32>
    %cst_69 = arith.constant dense<0.000000e+00> : vector<8xf32>
    %192 = vector.multi_reduction <add>, %191, %cst_69 [1] : vector<8x8xf32> to vector<8xf32>
    %193 = vector.shape_cast %192 : vector<8xf32> to vector<8x1xf32>
    %194 = tpu.reciprocal %193 {approx = true} : vector<8x1xf32> -> vector<8x1xf32>
    %195 = vector.broadcast %194 : vector<8x1xf32> to vector<8x8xf32>
    %196 = arith.mulf %191, %195 : vector<8x8xf32>
    %197 = arith.truncf %196 : vector<8x8xf32> to vector<8x8xbf16>
    %cst_70 = arith.constant dense<0.000000e+00> : vector<8x8xf32>
    %198 = tpu.matmul %197, %182, %cst_70 {dimension_numbers = #tpu.dot_dimension_numbers<[1], [0], [0], [1], [0, 0, 1, 1], [], []>} : vector<8x8xbf16>, vector<8x8xbf16>, vector<8x8xf32> -> vector<8x8xf32>
    %199 = vector.extract_strided_slice %167 {offsets = [0, 8], sizes = [8, 8], strides = [1, 1]} : vector<8x32xf32> to vector<8x8xf32>
    %200 = arith.truncf %199 : vector<8x8xf32> to vector<8x8xbf16>
    %201 = vector.extract_strided_slice %175 {offsets = [0, 8], sizes = [8, 8], strides = [1, 1]} : vector<8x32xf32> to vector<8x8xf32>
    %202 = arith.truncf %201 : vector<8x8xf32> to vector<8x8xbf16>
    %203 = vector.extract_strided_slice %176 {offsets = [0, 8], sizes = [8, 8], strides = [1, 1]} : vector<8x32xf32> to vector<8x8xf32>
    %204 = arith.truncf %203 : vector<8x8xf32> to vector<8x8xbf16>
    %cst_71 = arith.constant dense<0.000000e+00> : vector<8x8xf32>
    %205 = tpu.matmul %200, %202, %cst_71 {dimension_numbers = #tpu.dot_dimension_numbers<[1], [1], [0], [0], [0, 0, 1, 0], [], []>} : vector<8x8xbf16>, vector<8x8xbf16>, vector<8x8xf32> -> vector<8x8xf32>
    %cst_72 = arith.constant 0.353553385 : f32
    %206 = vector.broadcast %cst_72 : f32 to vector<8x8xf32>
    %207 = arith.mulf %205, %206 : vector<8x8xf32>
    %208 = arith.addf %207, %5 : vector<8x8xf32>
    %cst_73 = arith.constant dense<0xFF800000> : vector<8xf32>
    %209 = vector.multi_reduction <maximumf>, %208, %cst_73 [1] : vector<8x8xf32> to vector<8xf32>
    %210 = vector.shape_cast %209 : vector<8xf32> to vector<8x1xf32>
    %211 = vector.broadcast %210 : vector<8x1xf32> to vector<8x8xf32>
    %212 = arith.subf %208, %211 : vector<8x8xf32>
    %213 = math.exp %212 : vector<8x8xf32>
    %cst_74 = arith.constant dense<0.000000e+00> : vector<8xf32>
    %214 = vector.multi_reduction <add>, %213, %cst_74 [1] : vector<8x8xf32> to vector<8xf32>
    %215 = vector.shape_cast %214 : vector<8xf32> to vector<8x1xf32>
    %216 = tpu.reciprocal %215 {approx = true} : vector<8x1xf32> -> vector<8x1xf32>
    %217 = vector.broadcast %216 : vector<8x1xf32> to vector<8x8xf32>
    %218 = arith.mulf %213, %217 : vector<8x8xf32>
    %219 = arith.truncf %218 : vector<8x8xf32> to vector<8x8xbf16>
    %cst_75 = arith.constant dense<0.000000e+00> : vector<8x8xf32>
    %220 = tpu.matmul %219, %204, %cst_75 {dimension_numbers = #tpu.dot_dimension_numbers<[1], [0], [0], [1], [0, 0, 1, 1], [], []>} : vector<8x8xbf16>, vector<8x8xbf16>, vector<8x8xf32> -> vector<8x8xf32>
    %221 = vector.extract_strided_slice %167 {offsets = [0, 16], sizes = [8, 8], strides = [1, 1]} : vector<8x32xf32> to vector<8x8xf32>
    %222 = arith.truncf %221 : vector<8x8xf32> to vector<8x8xbf16>
    %223 = vector.extract_strided_slice %175 {offsets = [0, 16], sizes = [8, 8], strides = [1, 1]} : vector<8x32xf32> to vector<8x8xf32>
    %224 = arith.truncf %223 : vector<8x8xf32> to vector<8x8xbf16>
    %225 = vector.extract_strided_slice %176 {offsets = [0, 16], sizes = [8, 8], strides = [1, 1]} : vector<8x32xf32> to vector<8x8xf32>
    %226 = arith.truncf %225 : vector<8x8xf32> to vector<8x8xbf16>
    %cst_76 = arith.constant dense<0.000000e+00> : vector<8x8xf32>
    %227 = tpu.matmul %222, %224, %cst_76 {dimension_numbers = #tpu.dot_dimension_numbers<[1], [1], [0], [0], [0, 0, 1, 0], [], []>} : vector<8x8xbf16>, vector<8x8xbf16>, vector<8x8xf32> -> vector<8x8xf32>
    %cst_77 = arith.constant 0.353553385 : f32
    %228 = vector.broadcast %cst_77 : f32 to vector<8x8xf32>
    %229 = arith.mulf %227, %228 : vector<8x8xf32>
    %230 = arith.addf %229, %5 : vector<8x8xf32>
    %cst_78 = arith.constant dense<0xFF800000> : vector<8xf32>
    %231 = vector.multi_reduction <maximumf>, %230, %cst_78 [1] : vector<8x8xf32> to vector<8xf32>
    %232 = vector.shape_cast %231 : vector<8xf32> to vector<8x1xf32>
    %233 = vector.broadcast %232 : vector<8x1xf32> to vector<8x8xf32>
    %234 = arith.subf %230, %233 : vector<8x8xf32>
    %235 = math.exp %234 : vector<8x8xf32>
    %cst_79 = arith.constant dense<0.000000e+00> : vector<8xf32>
    %236 = vector.multi_reduction <add>, %235, %cst_79 [1] : vector<8x8xf32> to vector<8xf32>
    %237 = vector.shape_cast %236 : vector<8xf32> to vector<8x1xf32>
    %238 = tpu.reciprocal %237 {approx = true} : vector<8x1xf32> -> vector<8x1xf32>
    %239 = vector.broadcast %238 : vector<8x1xf32> to vector<8x8xf32>
    %240 = arith.mulf %235, %239 : vector<8x8xf32>
    %241 = arith.truncf %240 : vector<8x8xf32> to vector<8x8xbf16>
    %cst_80 = arith.constant dense<0.000000e+00> : vector<8x8xf32>
    %242 = tpu.matmul %241, %226, %cst_80 {dimension_numbers = #tpu.dot_dimension_numbers<[1], [0], [0], [1], [0, 0, 1, 1], [], []>} : vector<8x8xbf16>, vector<8x8xbf16>, vector<8x8xf32> -> vector<8x8xf32>
    %243 = vector.extract_strided_slice %167 {offsets = [0, 24], sizes = [8, 8], strides = [1, 1]} : vector<8x32xf32> to vector<8x8xf32>
    %244 = arith.truncf %243 : vector<8x8xf32> to vector<8x8xbf16>
    %245 = vector.extract_strided_slice %175 {offsets = [0, 24], sizes = [8, 8], strides = [1, 1]} : vector<8x32xf32> to vector<8x8xf32>
    %246 = arith.truncf %245 : vector<8x8xf32> to vector<8x8xbf16>
    %247 = vector.extract_strided_slice %176 {offsets = [0, 24], sizes = [8, 8], strides = [1, 1]} : vector<8x32xf32> to vector<8x8xf32>
    %248 = arith.truncf %247 : vector<8x8xf32> to vector<8x8xbf16>
    %cst_81 = arith.constant dense<0.000000e+00> : vector<8x8xf32>
    %249 = tpu.matmul %244, %246, %cst_81 {dimension_numbers = #tpu.dot_dimension_numbers<[1], [1], [0], [0], [0, 0, 1, 0], [], []>} : vector<8x8xbf16>, vector<8x8xbf16>, vector<8x8xf32> -> vector<8x8xf32>
    %cst_82 = arith.constant 0.353553385 : f32
    %250 = vector.broadcast %cst_82 : f32 to vector<8x8xf32>
    %251 = arith.mulf %249, %250 : vector<8x8xf32>
    %252 = arith.addf %251, %5 : vector<8x8xf32>
    %cst_83 = arith.constant dense<0xFF800000> : vector<8xf32>
    %253 = vector.multi_reduction <maximumf>, %252, %cst_83 [1] : vector<8x8xf32> to vector<8xf32>
    %254 = vector.shape_cast %253 : vector<8xf32> to vector<8x1xf32>
    %255 = vector.broadcast %254 : vector<8x1xf32> to vector<8x8xf32>
    %256 = arith.subf %252, %255 : vector<8x8xf32>
    %257 = math.exp %256 : vector<8x8xf32>
    %cst_84 = arith.constant dense<0.000000e+00> : vector<8xf32>
    %258 = vector.multi_reduction <add>, %257, %cst_84 [1] : vector<8x8xf32> to vector<8xf32>
    %259 = vector.shape_cast %258 : vector<8xf32> to vector<8x1xf32>
    %260 = tpu.reciprocal %259 {approx = true} : vector<8x1xf32> -> vector<8x1xf32>
    %261 = vector.broadcast %260 : vector<8x1xf32> to vector<8x8xf32>
    %262 = arith.mulf %257, %261 : vector<8x8xf32>
    %263 = arith.truncf %262 : vector<8x8xf32> to vector<8x8xbf16>
    %cst_85 = arith.constant dense<0.000000e+00> : vector<8x8xf32>
    %264 = tpu.matmul %263, %248, %cst_85 {dimension_numbers = #tpu.dot_dimension_numbers<[1], [0], [0], [1], [0, 0, 1, 1], [], []>} : vector<8x8xbf16>, vector<8x8xbf16>, vector<8x8xf32> -> vector<8x8xf32>
    %265 = tpu.concatenate %198, %220, %242, %264 in 1 : vector<8x8xf32>, vector<8x8xf32>, vector<8x8xf32>, vector<8x8xf32> -> vector<8x32xf32>
    %266 = arith.truncf %265 : vector<8x32xf32> to vector<8x32xbf16>
    %c0_86 = arith.constant 0 : index
    %c0_87 = arith.constant 0 : index
    %267 = vector.load %arg19[%c0_86, %c0_87] : memref<32x32xf32, #tpu.memory_space<vmem>>, vector<32x32xf32>
    %268 = arith.truncf %267 : vector<32x32xf32> to vector<32x32xbf16>
    %cst_88 = arith.constant dense<0.000000e+00> : vector<8x32xf32>
    %269 = tpu.matmul %266, %268, %cst_88 {dimension_numbers = #tpu.dot_dimension_numbers<[1], [0], [0], [1], [0, 0, 1, 1], [], []>} : vector<8x32xbf16>, vector<32x32xbf16>, vector<8x32xf32> -> vector<8x32xf32>
    %c0_89 = arith.constant 0 : index
    %c0_90 = arith.constant 0 : index
    %270 = vector.load %arg20[%c0_89, %c0_90] : memref<1x32xf32, #tpu.memory_space<vmem>>, vector<1x32xf32>
    %271 = vector.broadcast %270 : vector<1x32xf32> to vector<8x32xf32>
    %272 = arith.addf %269, %271 : vector<8x32xf32>
    %273 = arith.addf %136, %272 : vector<8x32xf32>
    %cst_91 = arith.constant dense<0.000000e+00> : vector<8xf32>
    %274 = vector.multi_reduction <add>, %273, %cst_91 [1] : vector<8x32xf32> to vector<8xf32>
    %275 = vector.shape_cast %274 : vector<8xf32> to vector<8x1xf32>
    %cst_92 = arith.constant 3.200000e+01 : f32
    %276 = vector.broadcast %cst_92 : f32 to vector<8x1xf32>
    %277 = arith.divf %275, %276 : vector<8x1xf32>
    %278 = vector.broadcast %277 : vector<8x1xf32> to vector<8x32xf32>
    %279 = arith.subf %273, %278 : vector<8x32xf32>
    %280 = arith.mulf %279, %279 : vector<8x32xf32>
    %cst_93 = arith.constant dense<0.000000e+00> : vector<8xf32>
    %281 = vector.multi_reduction <add>, %280, %cst_93 [1] : vector<8x32xf32> to vector<8xf32>
    %282 = vector.shape_cast %281 : vector<8xf32> to vector<8x1xf32>
    %cst_94 = arith.constant 3.200000e+01 : f32
    %283 = vector.broadcast %cst_94 : f32 to vector<8x1xf32>
    %284 = arith.divf %282, %283 : vector<8x1xf32>
    %285 = vector.broadcast %277 : vector<8x1xf32> to vector<8x32xf32>
    %286 = arith.subf %273, %285 : vector<8x32xf32>
    %cst_95 = arith.constant 9.99999997E-7 : f32
    %287 = vector.broadcast %cst_95 : f32 to vector<8x1xf32>
    %288 = arith.addf %284, %287 : vector<8x1xf32>
    %289 = math.rsqrt %288 : vector<8x1xf32>
    %290 = vector.broadcast %289 : vector<8x1xf32> to vector<8x32xf32>
    %291 = arith.mulf %286, %290 : vector<8x32xf32>
    %c0_96 = arith.constant 0 : index
    %c0_97 = arith.constant 0 : index
    %292 = vector.load %arg9[%c0_96, %c0_97] : memref<1x32xf32, #tpu.memory_space<vmem>>, vector<1x32xf32>
    %293 = vector.broadcast %292 : vector<1x32xf32> to vector<8x32xf32>
    %294 = arith.mulf %291, %293 : vector<8x32xf32>
    %c0_98 = arith.constant 0 : index
    %c0_99 = arith.constant 0 : index
    %295 = vector.load %arg10[%c0_98, %c0_99] : memref<1x32xf32, #tpu.memory_space<vmem>>, vector<1x32xf32>
    %296 = vector.broadcast %295 : vector<1x32xf32> to vector<8x32xf32>
    %297 = arith.addf %294, %296 : vector<8x32xf32>
    %298 = arith.truncf %297 : vector<8x32xf32> to vector<8x32xbf16>
    %c0_100 = arith.constant 0 : index
    %c0_101 = arith.constant 0 : index
    %299 = vector.load %arg21[%c0_100, %c0_101] : memref<32x64xf32, #tpu.memory_space<vmem>>, vector<32x64xf32>
    %300 = arith.truncf %299 : vector<32x64xf32> to vector<32x64xbf16>
    %cst_102 = arith.constant dense<0.000000e+00> : vector<8x64xf32>
    %301 = tpu.matmul %298, %300, %cst_102 {dimension_numbers = #tpu.dot_dimension_numbers<[1], [0], [0], [1], [0, 0, 1, 1], [], []>} : vector<8x32xbf16>, vector<32x64xbf16>, vector<8x64xf32> -> vector<8x64xf32>
    %c0_103 = arith.constant 0 : index
    %c0_104 = arith.constant 0 : index
    %302 = vector.load %arg22[%c0_103, %c0_104] : memref<1x64xf32, #tpu.memory_space<vmem>>, vector<1x64xf32>
    %303 = vector.broadcast %302 : vector<1x64xf32> to vector<8x64xf32>
    %304 = arith.addf %301, %303 : vector<8x64xf32>
    %cst_105 = arith.constant 0.000000e+00 : f32
    %305 = vector.broadcast %cst_105 : f32 to vector<8x64xf32>
    %306 = arith.maximumf %304, %305 : vector<8x64xf32>
    %307 = arith.truncf %306 : vector<8x64xf32> to vector<8x64xbf16>
    %c0_106 = arith.constant 0 : index
    %c0_107 = arith.constant 0 : index
    %308 = vector.load %arg23[%c0_106, %c0_107] : memref<64x32xf32, #tpu.memory_space<vmem>>, vector<64x32xf32>
    %309 = arith.truncf %308 : vector<64x32xf32> to vector<64x32xbf16>
    %cst_108 = arith.constant dense<0.000000e+00> : vector<8x32xf32>
    %310 = tpu.matmul %307, %309, %cst_108 {dimension_numbers = #tpu.dot_dimension_numbers<[1], [0], [0], [1], [0, 0, 1, 1], [], []>} : vector<8x64xbf16>, vector<64x32xbf16>, vector<8x32xf32> -> vector<8x32xf32>
    %c0_109 = arith.constant 0 : index
    %c0_110 = arith.constant 0 : index
    %311 = vector.load %arg24[%c0_109, %c0_110] : memref<1x32xf32, #tpu.memory_space<vmem>>, vector<1x32xf32>
    %312 = vector.broadcast %311 : vector<1x32xf32> to vector<8x32xf32>
    %313 = arith.addf %310, %312 : vector<8x32xf32>
    %314 = arith.addf %273, %313 : vector<8x32xf32>
    %c0_111 = arith.constant 0 : index
    %c0_112 = arith.constant 0 : index
    %315 = vector.load %arg25[%c0_111, %c0_112] : memref<8x32xf32, #tpu.memory_space<vmem>>, vector<8x32xf32>
    tpu.vector_store %arg25[%c0_111, %c0_112], %314 {strides = array<i32>} : memref<8x32xf32, #tpu.memory_space<vmem>>, vector<8x32xf32>,
    return
  }
  func.func @transform_0(%arg0: i32) -> (i32, i32) {
    %c0_i32 = arith.constant 0 : i32
    %c0_i32_0 = arith.constant 0 : i32
    return %arg0, %c0_i32 : i32, i32
  }
  func.func @transform_1(%arg0: i32) -> (i32, i32) {
    %c0_i32 = arith.constant 0 : i32
    %c0_i32_0 = arith.constant 0 : i32
    return %arg0, %c0_i32 : i32, i32
  }
  func.func @transform_2(%arg0: i32) -> (i32, i32, i32) {
    %c0_i32 = arith.constant 0 : i32
    %c0_i32_0 = arith.constant 0 : i32
    %c0_i32_1 = arith.constant 0 : i32
    return %arg0, %c0_i32, %c0_i32_0 : i32, i32, i32
  }
  func.func @transform_3(%arg0: i32) -> (i32, i32, i32) {
    %c0_i32 = arith.constant 0 : i32
    %c0_i32_0 = arith.constant 0 : i32
    %c0_i32_1 = arith.constant 0 : i32
    return %arg0, %c0_i32, %c0_i32_0 : i32, i32, i32
  }
  func.func @transform_4(%arg0: i32) -> (i32, i32) {
    %c0_i32 = arith.constant 0 : i32
    %c0_i32_0 = arith.constant 0 : i32
    %c0_i32_1 = arith.constant 0 : i32
    return %c0_i32, %c0_i32_0 : i32, i32
  }
  func.func @transform_5(%arg0: i32) -> (i32, i32) {
    %c0_i32 = arith.constant 0 : i32
    %c0_i32_0 = arith.constant 0 : i32
    %c0_i32_1 = arith.constant 0 : i32
    return %c0_i32, %c0_i32_0 : i32, i32
  }
  func.func @transform_6(%arg0: i32) -> (i32, i32) {
    %c0_i32 = arith.constant 0 : i32
    %c0_i32_0 = arith.constant 0 : i32
    %c0_i32_1 = arith.constant 0 : i32
    return %c0_i32, %c0_i32_0 : i32, i32
  }
  func.func @transform_7(%arg0: i32) -> (i32, i32) {
    %c0_i32 = arith.constant 0 : i32
    %c0_i32_0 = arith.constant 0 : i32
    %c0_i32_1 = arith.constant 0 : i32
    return %c0_i32, %c0_i32_0 : i32, i32
  }
  func.func @transform_8(%arg0: i32) -> (i32, i32) {
    %c0_i32 = arith.constant 0 : i32
    %c0_i32_0 = arith.constant 0 : i32
    %c0_i32_1 = arith.constant 0 : i32
    return %c0_i32, %c0_i32_0 : i32, i32
  }
  func.func @transform_9(%arg0: i32) -> (i32, i32) {
    %c0_i32 = arith.constant 0 : i32
    %c0_i32_0 = arith.constant 0 : i32
    %c0_i32_1 = arith.constant 0 : i32
    return %c0_i32, %c0_i32_0 : i32, i32
  }
  func.func @transform_10(%arg0: i32) -> (i32, i32) {
    %c0_i32 = arith.constant 0 : i32
    %c0_i32_0 = arith.constant 0 : i32
    %c0_i32_1 = arith.constant 0 : i32
    return %c0_i32, %c0_i32_0 : i32, i32
  }
  func.func @transform_11(%arg0: i32) -> (i32, i32) {
    %c0_i32 = arith.constant 0 : i32
    %c0_i32_0 = arith.constant 0 : i32
    %c0_i32_1 = arith.constant 0 : i32
    return %c0_i32, %c0_i32_0 : i32, i32
  }
  func.func @transform_12(%arg0: i32) -> (i32, i32) {
    %c0_i32 = arith.constant 0 : i32
    %c0_i32_0 = arith.constant 0 : i32
    %c0_i32_1 = arith.constant 0 : i32
    return %c0_i32, %c0_i32_0 : i32, i32
  }
  func.func @transform_13(%arg0: i32) -> (i32, i32) {
    %c0_i32 = arith.constant 0 : i32
    %c0_i32_0 = arith.constant 0 : i32
    %c0_i32_1 = arith.constant 0 : i32
    return %c0_i32, %c0_i32_0 : i32, i32
  }
  func.func @transform_14(%arg0: i32) -> (i32, i32) {
    %c0_i32 = arith.constant 0 : i32
    %c0_i32_0 = arith.constant 0 : i32
    %c0_i32_1 = arith.constant 0 : i32
    return %c0_i32, %c0_i32_0 : i32, i32
  }
  func.func @transform_15(%arg0: i32) -> (i32, i32) {
    %c0_i32 = arith.constant 0 : i32
    %c0_i32_0 = arith.constant 0 : i32
    %c0_i32_1 = arith.constant 0 : i32
    return %c0_i32, %c0_i32_0 : i32, i32
  }
  func.func @transform_16(%arg0: i32) -> (i32, i32) {
    %c0_i32 = arith.constant 0 : i32
    %c0_i32_0 = arith.constant 0 : i32
    %c0_i32_1 = arith.constant 0 : i32
    return %c0_i32, %c0_i32_0 : i32, i32
  }
  func.func @transform_17(%arg0: i32) -> (i32, i32) {
    %c0_i32 = arith.constant 0 : i32
    %c0_i32_0 = arith.constant 0 : i32
    %c0_i32_1 = arith.constant 0 : i32
    return %c0_i32, %c0_i32_0 : i32, i32
  }
  func.func @transform_18(%arg0: i32) -> (i32, i32) {
    %c0_i32 = arith.constant 0 : i32
    %c0_i32_0 = arith.constant 0 : i32
    %c0_i32_1 = arith.constant 0 : i32
    return %c0_i32, %c0_i32_0 : i32, i32
  }
  func.func @transform_19(%arg0: i32) -> (i32, i32) {
    %c0_i32 = arith.constant 0 : i32
    %c0_i32_0 = arith.constant 0 : i32
    %c0_i32_1 = arith.constant 0 : i32
    return %c0_i32, %c0_i32_0 : i32, i32
  }
  func.func @transform_20(%arg0: i32) -> (i32, i32) {
    %c0_i32 = arith.constant 0 : i32
    %c0_i32_0 = arith.constant 0 : i32
    %c0_i32_1 = arith.constant 0 : i32
    return %c0_i32, %c0_i32_0 : i32, i32
  }
  func.func @transform_21(%arg0: i32) -> (i32, i32) {
    %c0_i32 = arith.constant 0 : i32
    %c0_i32_0 = arith.constant 0 : i32
    %c0_i32_1 = arith.constant 0 : i32
    return %c0_i32, %c0_i32_0 : i32, i32
  }
  func.func @transform_22(%arg0: i32) -> (i32, i32) {
    %c0_i32 = arith.constant 0 : i32
    %c0_i32_0 = arith.constant 0 : i32
    %c0_i32_1 = arith.constant 0 : i32
    return %c0_i32, %c0_i32_0 : i32, i32
  }
  func.func @transform_23(%arg0: i32) -> (i32, i32) {
    %c0_i32 = arith.constant 0 : i32
    %c0_i32_0 = arith.constant 0 : i32
    %c0_i32_1 = arith.constant 0 : i32
    return %c0_i32, %c0_i32_0 : i32, i32
  }
  func.func @transform_24(%arg0: i32) -> (i32, i32) {
    %c0_i32 = arith.constant 0 : i32
    %c0_i32_0 = arith.constant 0 : i32
    return %arg0, %c0_i32 : i32, i32
  }
}

module attributes {stable_mosaic.version = 11 : i64} {
  func.func @_decoder_layer_kernel(%arg0: i32, %arg1: memref<8x32xf32, #tpu.memory_space<vmem>>, %arg2: memref<8x32xf32, #tpu.memory_space<vmem>>, %arg3: memref<1x8x8xf32, #tpu.memory_space<vmem>>, %arg4: memref<1x8x8xf32, #tpu.memory_space<vmem>>, %arg5: memref<1x32xf32, #tpu.memory_space<vmem>>, %arg6: memref<1x32xf32, #tpu.memory_space<vmem>>, %arg7: memref<1x32xf32, #tpu.memory_space<vmem>>, %arg8: memref<1x32xf32, #tpu.memory_space<vmem>>, %arg9: memref<1x32xf32, #tpu.memory_space<vmem>>, %arg10: memref<1x32xf32, #tpu.memory_space<vmem>>, %arg11: memref<32x96xf32, #tpu.memory_space<vmem>>, %arg12: memref<1x96xf32, #tpu.memory_space<vmem>>, %arg13: memref<32x32xf32, #tpu.memory_space<vmem>>, %arg14: memref<1x32xf32, #tpu.memory_space<vmem>>, %arg15: memref<32x32xf32, #tpu.memory_space<vmem>>, %arg16: memref<1x32xf32, #tpu.memory_space<vmem>>, %arg17: memref<32x64xf32, #tpu.memory_space<vmem>>, %arg18: memref<1x64xf32, #tpu.memory_space<vmem>>, %arg19: memref<32x32xf32, #tpu.memory_space<vmem>>, %arg20: memref<1x32xf32, #tpu.memory_space<vmem>>, %arg21: memref<32x64xf32, #tpu.memory_space<vmem>>, %arg22: memref<1x64xf32, #tpu.memory_space<vmem>>, %arg23: memref<64x32xf32, #tpu.memory_space<vmem>>, %arg24: memref<1x32xf32, #tpu.memory_space<vmem>>, %arg25: memref<8x32xf32, #tpu.memory_space<vmem>>) attributes {dimension_semantics = [#tpu.dimension_semantics<parallel>], iteration_bounds = array<i64: 2>, scalar_prefetch = 0 : i64, scratch_operands = 0 : i64, tpu.core_type = #tpu.core_type<tc>, window_params = [{transform_indices = @transform_0, window_bounds = array<i64: 8, 32>}, {transform_indices = @transform_1, window_bounds = array<i64: 8, 32>}, {transform_indices = @transform_2, window_bounds = array<i64: 1, 8, 8>}, {transform_indices = @transform_3, window_bounds = array<i64: 1, 8, 8>}, {pipeline_mode = #tpu.pipeline_mode<synchronous>, transform_indices = @transform_4, window_bounds = array<i64: 1, 32>}, {pipeline_mode = #tpu.pipeline_mode<synchronous>, transform_indices = @transform_5, window_bounds = array<i64: 1, 32>}, {pipeline_mode = #tpu.pipeline_mode<synchronous>, transform_indices = @transform_6, window_bounds = array<i64: 1, 32>}, {pipeline_mode = #tpu.pipeline_mode<synchronous>, transform_indices = @transform_7, window_bounds = array<i64: 1, 32>}, {pipeline_mode = #tpu.pipeline_mode<synchronous>, transform_indices = @transform_8, window_bounds = array<i64: 1, 32>}, {pipeline_mode = #tpu.pipeline_mode<synchronous>, transform_indices = @transform_9, window_bounds = array<i64: 1, 32>}, {pipeline_mode = #tpu.pipeline_mode<synchronous>, transform_indices = @transform_10, window_bounds = array<i64: 32, 96>}, {pipeline_mode = #tpu.pipeline_mode<synchronous>, transform_indices = @transform_11, window_bounds = array<i64: 1, 96>}, {pipeline_mode = #tpu.pipeline_mode<synchronous>, transform_indices = @transform_12, window_bounds = array<i64: 32, 32>}, {pipeline_mode = #tpu.pipeline_mode<synchronous>, transform_indices = @transform_13, window_bounds = array<i64: 1, 32>}, {pipeline_mode = #tpu.pipeline_mode<synchronous>, transform_indices = @transform_14, window_bounds = array<i64: 32, 32>}, {pipeline_mode = #tpu.pipeline_mode<synchronous>, transform_indices = @transform_15, window_bounds = array<i64: 1, 32>}, {pipeline_mode = #tpu.pipeline_mode<synchronous>, transform_indices = @transform_16, window_bounds = array<i64: 32, 64>}, {pipeline_mode = #tpu.pipeline_mode<synchronous>, transform_indices = @transform_17, window_bounds = array<i64: 1, 64>}, {pipeline_mode = #tpu.pipeline_mode<synchronous>, transform_indices = @transform_18, window_bounds = array<i64: 32, 32>}, {pipeline_mode = #tpu.pipeline_mode<synchronous>, transform_indices = @transform_19, window_bounds = array<i64: 1, 32>}, {pipeline_mode = #tpu.pipeline_mode<synchronous>, transform_indices = @transform_20, window_bounds = array<i64: 32, 64>}, {pipeline_mode = #tpu.pipeline_mode<synchronous>, transform_indices = @transform_21, window_bounds = array<i64: 1, 64>}, {pipeline_mode = #tpu.pipeline_mode<synchronous>, transform_indices = @transform_22, window_bounds = array<i64: 64, 32>}, {pipeline_mode = #tpu.pipeline_mode<synchronous>, transform_indices = @transform_23, window_bounds = array<i64: 1, 32>}, {transform_indices = @transform_24, window_bounds = array<i64: 8, 32>}]} {
    %c0 = arith.constant 0 : index
    %c0_0 = arith.constant 0 : index
    %0 = vector.load %arg1[%c0, %c0_0] : memref<8x32xf32, #tpu.memory_space<vmem>>, vector<8x32xf32>
    %c0_1 = arith.constant 0 : index
    %c0_2 = arith.constant 0 : index
    %1 = vector.load %arg2[%c0_1, %c0_2] : memref<8x32xf32, #tpu.memory_space<vmem>>, vector<8x32xf32>
    %c0_3 = arith.constant 0 : index
    %c0_4 = arith.constant 0 : index
    %c0_5 = arith.constant 0 : index
    %2 = vector.load %arg3[%c0_3, %c0_4, %c0_5] : memref<1x8x8xf32, #tpu.memory_space<vmem>>, vector<1x8x8xf32>
    %3 = vector.shape_cast %2 : vector<1x8x8xf32> to vector<8x8xf32>
    %c0_6 = arith.constant 0 : index
    %c0_7 = arith.constant 0 : index
    %c0_8 = arith.constant 0 : index
    %4 = vector.load %arg4[%c0_6, %c0_7, %c0_8] : memref<1x8x8xf32, #tpu.memory_space<vmem>>, vector<1x8x8xf32>
    %5 = vector.shape_cast %4 : vector<1x8x8xf32> to vector<8x8xf32>
    %cst = arith.constant dense<0.000000e+00> : vector<8xf32>
    %6 = vector.multi_reduction <add>, %0, %cst [1] : vector<8x32xf32> to vector<8xf32>
    %7 = vector.shape_cast %6 : vector<8xf32> to vector<8x1xf32>
    %cst_9 = arith.constant 3.200000e+01 : f32
    %8 = vector.broadcast %cst_9 : f32 to vector<8x1xf32>
    %9 = arith.divf %7, %8 : vector<8x1xf32>
    %10 = vector.broadcast %9 : vector<8x1xf32> to vector<8x32xf32>
    %11 = arith.subf %0, %10 : vector<8x32xf32>
    %12 = arith.mulf %11, %11 : vector<8x32xf32>
    %cst_10 = arith.constant dense<0.000000e+00> : vector<8xf32>
    %13 = vector.multi_reduction <add>, %12, %cst_10 [1] : vector<8x32xf32> to vector<8xf32>
    %14 = vector.shape_cast %13 : vector<8xf32> to vector<8x1xf32>
    %cst_11 = arith.constant 3.200000e+01 : f32
    %15 = vector.broadcast %cst_11 : f32 to vector<8x1xf32>
    %16 = arith.divf %14, %15 : vector<8x1xf32>
    %17 = vector.broadcast %9 : vector<8x1xf32> to vector<8x32xf32>
    %18 = arith.subf %0, %17 : vector<8x32xf32>
    %cst_12 = arith.constant 9.99999997E-7 : f32
    %19 = vector.broadcast %cst_12 : f32 to vector<8x1xf32>
    %20 = arith.addf %16, %19 : vector<8x1xf32>
    %21 = math.rsqrt %20 : vector<8x1xf32>
    %22 = vector.broadcast %21 : vector<8x1xf32> to vector<8x32xf32>
    %23 = arith.mulf %18, %22 : vector<8x32xf32>
    %c0_13 = arith.constant 0 : index
    %c0_14 = arith.constant 0 : index
    %24 = vector.load %arg5[%c0_13, %c0_14] : memref<1x32xf32, #tpu.memory_space<vmem>>, vector<1x32xf32>
    %25 = vector.broadcast %24 : vector<1x32xf32> to vector<8x32xf32>
    %26 = arith.mulf %23, %25 : vector<8x32xf32>
    %c0_15 = arith.constant 0 : index
    %c0_16 = arith.constant 0 : index
    %27 = vector.load %arg6[%c0_15, %c0_16] : memref<1x32xf32, #tpu.memory_space<vmem>>, vector<1x32xf32>
    %28 = vector.broadcast %27 : vector<1x32xf32> to vector<8x32xf32>
    %29 = arith.addf %26, %28 : vector<8x32xf32>
    %30 = arith.truncf %29 : vector<8x32xf32> to vector<8x32xbf16>
    %c0_17 = arith.constant 0 : index
    %c0_18 = arith.constant 0 : index
    %31 = vector.load %arg11[%c0_17, %c0_18] : memref<32x96xf32, #tpu.memory_space<vmem>>, vector<32x96xf32>
    %32 = arith.truncf %31 : vector<32x96xf32> to vector<32x96xbf16>
    %cst_19 = arith.constant dense<0.000000e+00> : vector<8x96xf32>
    %33 = tpu.matmul %30, %32, %cst_19 {dimension_numbers = #tpu.dot_dimension_numbers<[1], [0], [0], [1], [0, 0, 1, 1], [], []>} : vector<8x32xbf16>, vector<32x96xbf16>, vector<8x96xf32> -> vector<8x96xf32>
    %c0_20 = arith.constant 0 : index
    %c0_21 = arith.constant 0 : index
    %34 = vector.load %arg12[%c0_20, %c0_21] : memref<1x96xf32, #tpu.memory_space<vmem>>, vector<1x96xf32>
    %35 = vector.broadcast %34 : vector<1x96xf32> to vector<8x96xf32>
    %36 = arith.addf %33, %35 : vector<8x96xf32>
    %37 = vector.extract_strided_slice %36 {offsets = [0, 0], sizes = [8, 32], strides = [1, 1]} : vector<8x96xf32> to vector<8x32xf32>
    %38 = vector.extract_strided_slice %36 {offsets = [0, 32], sizes = [8, 32], strides = [1, 1]} : vector<8x96xf32> to vector<8x32xf32>
    %39 = vector.extract_strided_slice %36 {offsets = [0, 64], sizes = [8, 32], strides = [1, 1]} : vector<8x96xf32> to vector<8x32xf32>
    %40 = vector.extract_strided_slice %37 {offsets = [0, 0], sizes = [8, 8], strides = [1, 1]} : vector<8x32xf32> to vector<8x8xf32>
    %41 = arith.truncf %40 : vector<8x8xf32> to vector<8x8xbf16>
    %42 = vector.extract_strided_slice %38 {offsets = [0, 0], sizes = [8, 8], strides = [1, 1]} : vector<8x32xf32> to vector<8x8xf32>
    %43 = arith.truncf %42 : vector<8x8xf32> to vector<8x8xbf16>
    %44 = vector.extract_strided_slice %39 {offsets = [0, 0], sizes = [8, 8], strides = [1, 1]} : vector<8x32xf32> to vector<8x8xf32>
    %45 = arith.truncf %44 : vector<8x8xf32> to vector<8x8xbf16>
    %cst_22 = arith.constant dense<0.000000e+00> : vector<8x8xf32>
    %46 = tpu.matmul %41, %43, %cst_22 {dimension_numbers = #tpu.dot_dimension_numbers<[1], [1], [0], [0], [0, 0, 1, 0], [], []>} : vector<8x8xbf16>, vector<8x8xbf16>, vector<8x8xf32> -> vector<8x8xf32>
    %cst_23 = arith.constant 0.353553385 : f32
    %47 = vector.broadcast %cst_23 : f32 to vector<8x8xf32>
    %48 = arith.mulf %46, %47 : vector<8x8xf32>
    %49 = arith.addf %48, %3 : vector<8x8xf32>
    %cst_24 = arith.constant dense<0xFF800000> : vector<8xf32>
    %50 = vector.multi_reduction <maximumf>, %49, %cst_24 [1] : vector<8x8xf32> to vector<8xf32>
    %51 = vector.shape_cast %50 : vector<8xf32> to vector<8x1xf32>
    %52 = vector.broadcast %51 : vector<8x1xf32> to vector<8x8xf32>
    %53 = arith.subf %49, %52 : vector<8x8xf32>
    %54 = math.exp %53 : vector<8x8xf32>
    %cst_25 = arith.constant dense<0.000000e+00> : vector<8xf32>
    %55 = vector.multi_reduction <add>, %54, %cst_25 [1] : vector<8x8xf32> to vector<8xf32>
    %56 = vector.shape_cast %55 : vector<8xf32> to vector<8x1xf32>
    %57 = tpu.reciprocal %56 {approx = true} : vector<8x1xf32> -> vector<8x1xf32>
    %58 = vector.broadcast %57 : vector<8x1xf32> to vector<8x8xf32>
    %59 = arith.mulf %54, %58 : vector<8x8xf32>
    %60 = arith.truncf %59 : vector<8x8xf32> to vector<8x8xbf16>
    %cst_26 = arith.constant dense<0.000000e+00> : vector<8x8xf32>
    %61 = tpu.matmul %60, %45, %cst_26 {dimension_numbers = #tpu.dot_dimension_numbers<[1], [0], [0], [1], [0, 0, 1, 1], [], []>} : vector<8x8xbf16>, vector<8x8xbf16>, vector<8x8xf32> -> vector<8x8xf32>
    %62 = vector.extract_strided_slice %37 {offsets = [0, 8], sizes = [8, 8], strides = [1, 1]} : vector<8x32xf32> to vector<8x8xf32>
    %63 = arith.truncf %62 : vector<8x8xf32> to vector<8x8xbf16>
    %64 = vector.extract_strided_slice %38 {offsets = [0, 8], sizes = [8, 8], strides = [1, 1]} : vector<8x32xf32> to vector<8x8xf32>
    %65 = arith.truncf %64 : vector<8x8xf32> to vector<8x8xbf16>
    %66 = vector.extract_strided_slice %39 {offsets = [0, 8], sizes = [8, 8], strides = [1, 1]} : vector<8x32xf32> to vector<8x8xf32>
    %67 = arith.truncf %66 : vector<8x8xf32> to vector<8x8xbf16>
    %cst_27 = arith.constant dense<0.000000e+00> : vector<8x8xf32>
    %68 = tpu.matmul %63, %65, %cst_27 {dimension_numbers = #tpu.dot_dimension_numbers<[1], [1], [0], [0], [0, 0, 1, 0], [], []>} : vector<8x8xbf16>, vector<8x8xbf16>, vector<8x8xf32> -> vector<8x8xf32>
    %cst_28 = arith.constant 0.353553385 : f32
    %69 = vector.broadcast %cst_28 : f32 to vector<8x8xf32>
    %70 = arith.mulf %68, %69 : vector<8x8xf32>
    %71 = arith.addf %70, %3 : vector<8x8xf32>
    %cst_29 = arith.constant dense<0xFF800000> : vector<8xf32>
    %72 = vector.multi_reduction <maximumf>, %71, %cst_29 [1] : vector<8x8xf32> to vector<8xf32>
    %73 = vector.shape_cast %72 : vector<8xf32> to vector<8x1xf32>
    %74 = vector.broadcast %73 : vector<8x1xf32> to vector<8x8xf32>
    %75 = arith.subf %71, %74 : vector<8x8xf32>
    %76 = math.exp %75 : vector<8x8xf32>
    %cst_30 = arith.constant dense<0.000000e+00> : vector<8xf32>
    %77 = vector.multi_reduction <add>, %76, %cst_30 [1] : vector<8x8xf32> to vector<8xf32>
    %78 = vector.shape_cast %77 : vector<8xf32> to vector<8x1xf32>
    %79 = tpu.reciprocal %78 {approx = true} : vector<8x1xf32> -> vector<8x1xf32>
    %80 = vector.broadcast %79 : vector<8x1xf32> to vector<8x8xf32>
    %81 = arith.mulf %76, %80 : vector<8x8xf32>
    %82 = arith.truncf %81 : vector<8x8xf32> to vector<8x8xbf16>
    %cst_31 = arith.constant dense<0.000000e+00> : vector<8x8xf32>
    %83 = tpu.matmul %82, %67, %cst_31 {dimension_numbers = #tpu.dot_dimension_numbers<[1], [0], [0], [1], [0, 0, 1, 1], [], []>} : vector<8x8xbf16>, vector<8x8xbf16>, vector<8x8xf32> -> vector<8x8xf32>
    %84 = vector.extract_strided_slice %37 {offsets = [0, 16], sizes = [8, 8], strides = [1, 1]} : vector<8x32xf32> to vector<8x8xf32>
    %85 = arith.truncf %84 : vector<8x8xf32> to vector<8x8xbf16>
    %86 = vector.extract_strided_slice %38 {offsets = [0, 16], sizes = [8, 8], strides = [1, 1]} : vector<8x32xf32> to vector<8x8xf32>
    %87 = arith.truncf %86 : vector<8x8xf32> to vector<8x8xbf16>
    %88 = vector.extract_strided_slice %39 {offsets = [0, 16], sizes = [8, 8], strides = [1, 1]} : vector<8x32xf32> to vector<8x8xf32>
    %89 = arith.truncf %88 : vector<8x8xf32> to vector<8x8xbf16>
    %cst_32 = arith.constant dense<0.000000e+00> : vector<8x8xf32>
    %90 = tpu.matmul %85, %87, %cst_32 {dimension_numbers = #tpu.dot_dimension_numbers<[1], [1], [0], [0], [0, 0, 1, 0], [], []>} : vector<8x8xbf16>, vector<8x8xbf16>, vector<8x8xf32> -> vector<8x8xf32>
    %cst_33 = arith.constant 0.353553385 : f32
    %91 = vector.broadcast %cst_33 : f32 to vector<8x8xf32>
    %92 = arith.mulf %90, %91 : vector<8x8xf32>
    %93 = arith.addf %92, %3 : vector<8x8xf32>
    %cst_34 = arith.constant dense<0xFF800000> : vector<8xf32>
    %94 = vector.multi_reduction <maximumf>, %93, %cst_34 [1] : vector<8x8xf32> to vector<8xf32>
    %95 = vector.shape_cast %94 : vector<8xf32> to vector<8x1xf32>
    %96 = vector.broadcast %95 : vector<8x1xf32> to vector<8x8xf32>
    %97 = arith.subf %93, %96 : vector<8x8xf32>
    %98 = math.exp %97 : vector<8x8xf32>
    %cst_35 = arith.constant dense<0.000000e+00> : vector<8xf32>
    %99 = vector.multi_reduction <add>, %98, %cst_35 [1] : vector<8x8xf32> to vector<8xf32>
    %100 = vector.shape_cast %99 : vector<8xf32> to vector<8x1xf32>
    %101 = tpu.reciprocal %100 {approx = true} : vector<8x1xf32> -> vector<8x1xf32>
    %102 = vector.broadcast %101 : vector<8x1xf32> to vector<8x8xf32>
    %103 = arith.mulf %98, %102 : vector<8x8xf32>
    %104 = arith.truncf %103 : vector<8x8xf32> to vector<8x8xbf16>
    %cst_36 = arith.constant dense<0.000000e+00> : vector<8x8xf32>
    %105 = tpu.matmul %104, %89, %cst_36 {dimension_numbers = #tpu.dot_dimension_numbers<[1], [0], [0], [1], [0, 0, 1, 1], [], []>} : vector<8x8xbf16>, vector<8x8xbf16>, vector<8x8xf32> -> vector<8x8xf32>
    %106 = vector.extract_strided_slice %37 {offsets = [0, 24], sizes = [8, 8], strides = [1, 1]} : vector<8x32xf32> to vector<8x8xf32>
    %107 = arith.truncf %106 : vector<8x8xf32> to vector<8x8xbf16>
    %108 = vector.extract_strided_slice %38 {offsets = [0, 24], sizes = [8, 8], strides = [1, 1]} : vector<8x32xf32> to vector<8x8xf32>
    %109 = arith.truncf %108 : vector<8x8xf32> to vector<8x8xbf16>
    %110 = vector.extract_strided_slice %39 {offsets = [0, 24], sizes = [8, 8], strides = [1, 1]} : vector<8x32xf32> to vector<8x8xf32>
    %111 = arith.truncf %110 : vector<8x8xf32> to vector<8x8xbf16>
    %cst_37 = arith.constant dense<0.000000e+00> : vector<8x8xf32>
    %112 = tpu.matmul %107, %109, %cst_37 {dimension_numbers = #tpu.dot_dimension_numbers<[1], [1], [0], [0], [0, 0, 1, 0], [], []>} : vector<8x8xbf16>, vector<8x8xbf16>, vector<8x8xf32> -> vector<8x8xf32>
    %cst_38 = arith.constant 0.353553385 : f32
    %113 = vector.broadcast %cst_38 : f32 to vector<8x8xf32>
    %114 = arith.mulf %112, %113 : vector<8x8xf32>
    %115 = arith.addf %114, %3 : vector<8x8xf32>
    %cst_39 = arith.constant dense<0xFF800000> : vector<8xf32>
    %116 = vector.multi_reduction <maximumf>, %115, %cst_39 [1] : vector<8x8xf32> to vector<8xf32>
    %117 = vector.shape_cast %116 : vector<8xf32> to vector<8x1xf32>
    %118 = vector.broadcast %117 : vector<8x1xf32> to vector<8x8xf32>
    %119 = arith.subf %115, %118 : vector<8x8xf32>
    %120 = math.exp %119 : vector<8x8xf32>
    %cst_40 = arith.constant dense<0.000000e+00> : vector<8xf32>
    %121 = vector.multi_reduction <add>, %120, %cst_40 [1] : vector<8x8xf32> to vector<8xf32>
    %122 = vector.shape_cast %121 : vector<8xf32> to vector<8x1xf32>
    %123 = tpu.reciprocal %122 {approx = true} : vector<8x1xf32> -> vector<8x1xf32>
    %124 = vector.broadcast %123 : vector<8x1xf32> to vector<8x8xf32>
    %125 = arith.mulf %120, %124 : vector<8x8xf32>
    %126 = arith.truncf %125 : vector<8x8xf32> to vector<8x8xbf16>
    %cst_41 = arith.constant dense<0.000000e+00> : vector<8x8xf32>
    %127 = tpu.matmul %126, %111, %cst_41 {dimension_numbers = #tpu.dot_dimension_numbers<[1], [0], [0], [1], [0, 0, 1, 1], [], []>} : vector<8x8xbf16>, vector<8x8xbf16>, vector<8x8xf32> -> vector<8x8xf32>
    %128 = tpu.concatenate %61, %83, %105, %127 in 1 : vector<8x8xf32>, vector<8x8xf32>, vector<8x8xf32>, vector<8x8xf32> -> vector<8x32xf32>
    %129 = arith.truncf %128 : vector<8x32xf32> to vector<8x32xbf16>
    %c0_42 = arith.constant 0 : index
    %c0_43 = arith.constant 0 : index
    %130 = vector.load %arg13[%c0_42, %c0_43] : memref<32x32xf32, #tpu.memory_space<vmem>>, vector<32x32xf32>
    %131 = arith.truncf %130 : vector<32x32xf32> to vector<32x32xbf16>
    %cst_44 = arith.constant dense<0.000000e+00> : vector<8x32xf32>
    %132 = tpu.matmul %129, %131, %cst_44 {dimension_numbers = #tpu.dot_dimension_numbers<[1], [0], [0], [1], [0, 0, 1, 1], [], []>} : vector<8x32xbf16>, vector<32x32xbf16>, vector<8x32xf32> -> vector<8x32xf32>
    %c0_45 = arith.constant 0 : index
    %c0_46 = arith.constant 0 : index
    %133 = vector.load %arg14[%c0_45, %c0_46] : memref<1x32xf32, #tpu.memory_space<vmem>>, vector<1x32xf32>
    %134 = vector.broadcast %133 : vector<1x32xf32> to vector<8x32xf32>
    %135 = arith.addf %132, %134 : vector<8x32xf32>
    %136 = arith.addf %0, %135 : vector<8x32xf32>
    %cst_47 = arith.constant dense<0.000000e+00> : vector<8xf32>
    %137 = vector.multi_reduction <add>, %136, %cst_47 [1] : vector<8x32xf32> to vector<8xf32>
    %138 = vector.shape_cast %137 : vector<8xf32> to vector<8x1xf32>
    %cst_48 = arith.constant 3.200000e+01 : f32
    %139 = vector.broadcast %cst_48 : f32 to vector<8x1xf32>
    %140 = arith.divf %138, %139 : vector<8x1xf32>
    %141 = vector.broadcast %140 : vector<8x1xf32> to vector<8x32xf32>
    %142 = arith.subf %136, %141 : vector<8x32xf32>
    %143 = arith.mulf %142, %142 : vector<8x32xf32>
    %cst_49 = arith.constant dense<0.000000e+00> : vector<8xf32>
    %144 = vector.multi_reduction <add>, %143, %cst_49 [1] : vector<8x32xf32> to vector<8xf32>
    %145 = vector.shape_cast %144 : vector<8xf32> to vector<8x1xf32>
    %cst_50 = arith.constant 3.200000e+01 : f32
    %146 = vector.broadcast %cst_50 : f32 to vector<8x1xf32>
    %147 = arith.divf %145, %146 : vector<8x1xf32>
    %148 = vector.broadcast %140 : vector<8x1xf32> to vector<8x32xf32>
    %149 = arith.subf %136, %148 : vector<8x32xf32>
    %cst_51 = arith.constant 9.99999997E-7 : f32
    %150 = vector.broadcast %cst_51 : f32 to vector<8x1xf32>
    %151 = arith.addf %147, %150 : vector<8x1xf32>
    %152 = math.rsqrt %151 : vector<8x1xf32>
    %153 = vector.broadcast %152 : vector<8x1xf32> to vector<8x32xf32>
    %154 = arith.mulf %149, %153 : vector<8x32xf32>
    %c0_52 = arith.constant 0 : index
    %c0_53 = arith.constant 0 : index
    %155 = vector.load %arg7[%c0_52, %c0_53] : memref<1x32xf32, #tpu.memory_space<vmem>>, vector<1x32xf32>
    %156 = vector.broadcast %155 : vector<1x32xf32> to vector<8x32xf32>
    %157 = arith.mulf %154, %156 : vector<8x32xf32>
    %c0_54 = arith.constant 0 : index
    %c0_55 = arith.constant 0 : index
    %158 = vector.load %arg8[%c0_54, %c0_55] : memref<1x32xf32, #tpu.memory_space<vmem>>, vector<1x32xf32>
    %159 = vector.broadcast %158 : vector<1x32xf32> to vector<8x32xf32>
    %160 = arith.addf %157, %159 : vector<8x32xf32>
    %161 = arith.truncf %160 : vector<8x32xf32> to vector<8x32xbf16>
    %c0_56 = arith.constant 0 : index
    %c0_57 = arith.constant 0 : index
    %162 = vector.load %arg15[%c0_56, %c0_57] : memref<32x32xf32, #tpu.memory_space<vmem>>, vector<32x32xf32>
    %163 = arith.truncf %162 : vector<32x32xf32> to vector<32x32xbf16>
    %cst_58 = arith.constant dense<0.000000e+00> : vector<8x32xf32>
    %164 = tpu.matmul %161, %163, %cst_58 {dimension_numbers = #tpu.dot_dimension_numbers<[1], [0], [0], [1], [0, 0, 1, 1], [], []>} : vector<8x32xbf16>, vector<32x32xbf16>, vector<8x32xf32> -> vector<8x32xf32>
    %c0_59 = arith.constant 0 : index
    %c0_60 = arith.constant 0 : index
    %165 = vector.load %arg16[%c0_59, %c0_60] : memref<1x32xf32, #tpu.memory_space<vmem>>, vector<1x32xf32>
    %166 = vector.broadcast %165 : vector<1x32xf32> to vector<8x32xf32>
    %167 = arith.addf %164, %166 : vector<8x32xf32>
    %168 = arith.truncf %1 : vector<8x32xf32> to vector<8x32xbf16>
    %c0_61 = arith.constant 0 : index
    %c0_62 = arith.constant 0 : index
    %169 = vector.load %arg17[%c0_61, %c0_62] : memref<32x64xf32, #tpu.memory_space<vmem>>, vector<32x64xf32>
    %170 = arith.truncf %169 : vector<32x64xf32> to vector<32x64xbf16>
    %cst_63 = arith.constant dense<0.000000e+00> : vector<8x64xf32>
    %171 = tpu.matmul %168, %170, %cst_63 {dimension_numbers = #tpu.dot_dimension_numbers<[1], [0], [0], [1], [0, 0, 1, 1], [], []>} : vector<8x32xbf16>, vector<32x64xbf16>, vector<8x64xf32> -> vector<8x64xf32>
    %c0_64 = arith.constant 0 : index
    %c0_65 = arith.constant 0 : index
    %172 = vector.load %arg18[%c0_64, %c0_65] : memref<1x64xf32, #tpu.memory_space<vmem>>, vector<1x64xf32>
    %173 = vector.broadcast %172 : vector<1x64xf32> to vector<8x64xf32>
    %174 = arith.addf %171, %173 : vector<8x64xf32>
    %175 = vector.extract_strided_slice %174 {offsets = [0, 0], sizes = [8, 32], strides = [1, 1]} : vector<8x64xf32> to vector<8x32xf32>
    %176 = vector.extract_strided_slice %174 {offsets = [0, 32], sizes = [8, 32], strides = [1, 1]} : vector<8x64xf32> to vector<8x32xf32>
    %177 = vector.extract_strided_slice %167 {offsets = [0, 0], sizes = [8, 8], strides = [1, 1]} : vector<8x32xf32> to vector<8x8xf32>
    %178 = arith.truncf %177 : vector<8x8xf32> to vector<8x8xbf16>
    %179 = vector.extract_strided_slice %175 {offsets = [0, 0], sizes = [8, 8], strides = [1, 1]} : vector<8x32xf32> to vector<8x8xf32>
    %180 = arith.truncf %179 : vector<8x8xf32> to vector<8x8xbf16>
    %181 = vector.extract_strided_slice %176 {offsets = [0, 0], sizes = [8, 8], strides = [1, 1]} : vector<8x32xf32> to vector<8x8xf32>
    %182 = arith.truncf %181 : vector<8x8xf32> to vector<8x8xbf16>
    %cst_66 = arith.constant dense<0.000000e+00> : vector<8x8xf32>
    %183 = tpu.matmul %178, %180, %cst_66 {dimension_numbers = #tpu.dot_dimension_numbers<[1], [1], [0], [0], [0, 0, 1, 0], [], []>} : vector<8x8xbf16>, vector<8x8xbf16>, vector<8x8xf32> -> vector<8x8xf32>
    %cst_67 = arith.constant 0.353553385 : f32
    %184 = vector.broadcast %cst_67 : f32 to vector<8x8xf32>
    %185 = arith.mulf %183, %184 : vector<8x8xf32>
    %186 = arith.addf %185, %5 : vector<8x8xf32>
    %cst_68 = arith.constant dense<0xFF800000> : vector<8xf32>
    %187 = vector.multi_reduction <maximumf>, %186, %cst_68 [1] : vector<8x8xf32> to vector<8xf32>
    %188 = vector.shape_cast %187 : vector<8xf32> to vector<8x1xf32>
    %189 = vector.broadcast %188 : vector<8x1xf32> to vector<8x8xf32>
    %190 = arith.subf %186, %189 : vector<8x8xf32>
    %191 = math.exp %190 : vector<8x8xf32>
    %cst_69 = arith.constant dense<0.000000e+00> : vector<8xf32>
    %192 = vector.multi_reduction <add>, %191, %cst_69 [1] : vector<8x8xf32> to vector<8xf32>
    %193 = vector.shape_cast %192 : vector<8xf32> to vector<8x1xf32>
    %194 = tpu.reciprocal %193 {approx = true} : vector<8x1xf32> -> vector<8x1xf32>
    %195 = vector.broadcast %194 : vector<8x1xf32> to vector<8x8xf32>
    %196 = arith.mulf %191, %195 : vector<8x8xf32>
    %197 = arith.truncf %196 : vector<8x8xf32> to vector<8x8xbf16>
    %cst_70 = arith.constant dense<0.000000e+00> : vector<8x8xf32>
    %198 = tpu.matmul %197, %182, %cst_70 {dimension_numbers = #tpu.dot_dimension_numbers<[1], [0], [0], [1], [0, 0, 1, 1], [], []>} : vector<8x8xbf16>, vector<8x8xbf16>, vector<8x8xf32> -> vector<8x8xf32>
    %199 = vector.extract_strided_slice %167 {offsets = [0, 8], sizes = [8, 8], strides = [1, 1]} : vector<8x32xf32> to vector<8x8xf32>
    %200 = arith.truncf %199 : vector<8x8xf32> to vector<8x8xbf16>
    %201 = vector.extract_strided_slice %175 {offsets = [0, 8], sizes = [8, 8], strides = [1, 1]} : vector<8x32xf32> to vector<8x8xf32>
    %202 = arith.truncf %201 : vector<8x8xf32> to vector<8x8xbf16>
    %203 = vector.extract_strided_slice %176 {offsets = [0, 8], sizes = [8, 8], strides = [1, 1]} : vector<8x32xf32> to vector<8x8xf32>
    %204 = arith.truncf %203 : vector<8x8xf32> to vector<8x8xbf16>
    %cst_71 = arith.constant dense<0.000000e+00> : vector<8x8xf32>
    %205 = tpu.matmul %200, %202, %cst_71 {dimension_numbers = #tpu.dot_dimension_numbers<[1], [1], [0], [0], [0, 0, 1, 0], [], []>} : vector<8x8xbf16>, vector<8x8xbf16>, vector<8x8xf32> -> vector<8x8xf32>
    %cst_72 = arith.constant 0.353553385 : f32
    %206 = vector.broadcast %cst_72 : f32 to vector<8x8xf32>
    %207 = arith.mulf %205, %206 : vector<8x8xf32>
    %208 = arith.addf %207, %5 : vector<8x8xf32>
    %cst_73 = arith.constant dense<0xFF800000> : vector<8xf32>
    %209 = vector.multi_reduction <maximumf>, %208, %cst_73 [1] : vector<8x8xf32> to vector<8xf32>
    %210 = vector.shape_cast %209 : vector<8xf32> to vector<8x1xf32>
    %211 = vector.broadcast %210 : vector<8x1xf32> to vector<8x8xf32>
    %212 = arith.subf %208, %211 : vector<8x8xf32>
    %213 = math.exp %212 : vector<8x8xf32>
    %cst_74 = arith.constant dense<0.000000e+00> : vector<8xf32>
    %214 = vector.multi_reduction <add>, %213, %cst_74 [1] : vector<8x8xf32> to vector<8xf32>
    %215 = vector.shape_cast %214 : vector<8xf32> to vector<8x1xf32>
    %216 = tpu.reciprocal %215 {approx = true} : vector<8x1xf32> -> vector<8x1xf32>
    %217 = vector.broadcast %216 : vector<8x1xf32> to vector<8x8xf32>
    %218 = arith.mulf %213, %217 : vector<8x8xf32>
    %219 = arith.truncf %218 : vector<8x8xf32> to vector<8x8xbf16>
    %cst_75 = arith.constant dense<0.000000e+00> : vector<8x8xf32>
    %220 = tpu.matmul %219, %204, %cst_75 {dimension_numbers = #tpu.dot_dimension_numbers<[1], [0], [0], [1], [0, 0, 1, 1], [], []>} : vector<8x8xbf16>, vector<8x8xbf16>, vector<8x8xf32> -> vector<8x8xf32>
    %221 = vector.extract_strided_slice %167 {offsets = [0, 16], sizes = [8, 8], strides = [1, 1]} : vector<8x32xf32> to vector<8x8xf32>
    %222 = arith.truncf %221 : vector<8x8xf32> to vector<8x8xbf16>
    %223 = vector.extract_strided_slice %175 {offsets = [0, 16], sizes = [8, 8], strides = [1, 1]} : vector<8x32xf32> to vector<8x8xf32>
    %224 = arith.truncf %223 : vector<8x8xf32> to vector<8x8xbf16>
    %225 = vector.extract_strided_slice %176 {offsets = [0, 16], sizes = [8, 8], strides = [1, 1]} : vector<8x32xf32> to vector<8x8xf32>
    %226 = arith.truncf %225 : vector<8x8xf32> to vector<8x8xbf16>
    %cst_76 = arith.constant dense<0.000000e+00> : vector<8x8xf32>
    %227 = tpu.matmul %222, %224, %cst_76 {dimension_numbers = #tpu.dot_dimension_numbers<[1], [1], [0], [0], [0, 0, 1, 0], [], []>} : vector<8x8xbf16>, vector<8x8xbf16>, vector<8x8xf32> -> vector<8x8xf32>
    %cst_77 = arith.constant 0.353553385 : f32
    %228 = vector.broadcast %cst_77 : f32 to vector<8x8xf32>
    %229 = arith.mulf %227, %228 : vector<8x8xf32>
    %230 = arith.addf %229, %5 : vector<8x8xf32>
    %cst_78 = arith.constant dense<0xFF800000> : vector<8xf32>
    %231 = vector.multi_reduction <maximumf>, %230, %cst_78 [1] : vector<8x8xf32> to vector<8xf32>
    %232 = vector.shape_cast %231 : vector<8xf32> to vector<8x1xf32>
    %233 = vector.broadcast %232 : vector<8x1xf32> to vector<8x8xf32>
    %234 = arith.subf %230, %233 : vector<8x8xf32>
    %235 = math.exp %234 : vector<8x8xf32>
    %cst_79 = arith.constant dense<0.000000e+00> : vector<8xf32>
    %236 = vector.multi_reduction <add>, %235, %cst_79 [1] : vector<8x8xf32> to vector<8xf32>
    %237 = vector.shape_cast %236 : vector<8xf32> to vector<8x1xf32>
    %238 = tpu.reciprocal %237 {approx = true} : vector<8x1xf32> -> vector<8x1xf32>
    %239 = vector.broadcast %238 : vector<8x1xf32> to vector<8x8xf32>
    %240 = arith.mulf %235, %239 : vector<8x8xf32>
    %241 = arith.truncf %240 : vector<8x8xf32> to vector<8x8xbf16>
    %cst_80 = arith.constant dense<0.000000e+00> : vector<8x8xf32>
    %242 = tpu.matmul %241, %226, %cst_80 {dimension_numbers = #tpu.dot_dimension_numbers<[1], [0], [0], [1], [0, 0, 1, 1], [], []>} : vector<8x8xbf16>, vector<8x8xbf16>, vector<8x8xf32> -> vector<8x8xf32>
    %243 = vector.extract_strided_slice %167 {offsets = [0, 24], sizes = [8, 8], strides = [1, 1]} : vector<8x32xf32> to vector<8x8xf32>
    %244 = arith.truncf %243 : vector<8x8xf32> to vector<8x8xbf16>
    %245 = vector.extract_strided_slice %175 {offsets = [0, 24], sizes = [8, 8], strides = [1, 1]} : vector<8x32xf32> to vector<8x8xf32>
    %246 = arith.truncf %245 : vector<8x8xf32> to vector<8x8xbf16>
    %247 = vector.extract_strided_slice %176 {offsets = [0, 24], sizes = [8, 8], strides = [1, 1]} : vector<8x32xf32> to vector<8x8xf32>
    %248 = arith.truncf %247 : vector<8x8xf32> to vector<8x8xbf16>
    %cst_81 = arith.constant dense<0.000000e+00> : vector<8x8xf32>
    %249 = tpu.matmul %244, %246, %cst_81 {dimension_numbers = #tpu.dot_dimension_numbers<[1], [1], [0], [0], [0, 0, 1, 0], [], []>} : vector<8x8xbf16>, vector<8x8xbf16>, vector<8x8xf32> -> vector<8x8xf32>
    %cst_82 = arith.constant 0.353553385 : f32
    %250 = vector.broadcast %cst_82 : f32 to vector<8x8xf32>
    %251 = arith.mulf %249, %250 : vector<8x8xf32>
    %252 = arith.addf %251, %5 : vector<8x8xf32>
    %cst_83 = arith.constant dense<0xFF800000> : vector<8xf32>
    %253 = vector.multi_reduction <maximumf>, %252, %cst_83 [1] : vector<8x8xf32> to vector<8xf32>
    %254 = vector.shape_cast %253 : vector<8xf32> to vector<8x1xf32>
    %255 = vector.broadcast %254 : vector<8x1xf32> to vector<8x8xf32>
    %256 = arith.subf %252, %255 : vector<8x8xf32>
    %257 = math.exp %256 : vector<8x8xf32>
    %cst_84 = arith.constant dense<0.000000e+00> : vector<8xf32>
    %258 = vector.multi_reduction <add>, %257, %cst_84 [1] : vector<8x8xf32> to vector<8xf32>
    %259 = vector.shape_cast %258 : vector<8xf32> to vector<8x1xf32>
    %260 = tpu.reciprocal %259 {approx = true} : vector<8x1xf32> -> vector<8x1xf32>
    %261 = vector.broadcast %260 : vector<8x1xf32> to vector<8x8xf32>
    %262 = arith.mulf %257, %261 : vector<8x8xf32>
    %263 = arith.truncf %262 : vector<8x8xf32> to vector<8x8xbf16>
    %cst_85 = arith.constant dense<0.000000e+00> : vector<8x8xf32>
    %264 = tpu.matmul %263, %248, %cst_85 {dimension_numbers = #tpu.dot_dimension_numbers<[1], [0], [0], [1], [0, 0, 1, 1], [], []>} : vector<8x8xbf16>, vector<8x8xbf16>, vector<8x8xf32> -> vector<8x8xf32>
    %265 = tpu.concatenate %198, %220, %242, %264 in 1 : vector<8x8xf32>, vector<8x8xf32>, vector<8x8xf32>, vector<8x8xf32> -> vector<8x32xf32>
    %266 = arith.truncf %265 : vector<8x32xf32> to vector<8x32xbf16>
    %c0_86 = arith.constant 0 : index
    %c0_87 = arith.constant 0 : index
    %267 = vector.load %arg19[%c0_86, %c0_87] : memref<32x32xf32, #tpu.memory_space<vmem>>, vector<32x32xf32>
    %268 = arith.truncf %267 : vector<32x32xf32> to vector<32x32xbf16>
    %cst_88 = arith.constant dense<0.000000e+00> : vector<8x32xf32>
    %269 = tpu.matmul %266, %268, %cst_88 {dimension_numbers = #tpu.dot_dimension_numbers<[1], [0], [0], [1], [0, 0, 1, 1], [], []>} : vector<8x32xbf16>, vector<32x32xbf16>, vector<8x32xf32> -> vector<8x32xf32>
    %c0_89 = arith.constant 0 : index
    %c0_90 = arith.constant 0 : index
    %270 = vector.load %arg20[%c0_89, %c0_90] : memref<1x32xf32, #tpu.memory_space<vmem>>, vector<1x32xf32>
    %271 = vector.broadcast %270 : vector<1x32xf32> to vector<8x32xf32>
    %272 = arith.addf %269, %271 : vector<8x32xf32>
    %273 = arith.addf %136, %272 : vector<8x32xf32>
    %cst_91 = arith.constant dense<0.000000e+00> : vector<8xf32>
    %274 = vector.multi_reduction <add>, %273, %cst_91 [1] : vector<8x32xf32> to vector<8xf32>
    %275 = vector.shape_cast %274 : vector<8xf32> to vector<8x1xf32>
    %cst_92 = arith.constant 3.200000e+01 : f32
    %276 = vector.broadcast %cst_92 : f32 to vector<8x1xf32>
    %277 = arith.divf %275, %276 : vector<8x1xf32>
    %278 = vector.broadcast %277 : vector<8x1xf32> to vector<8x32xf32>
    %279 = arith.subf %273, %278 : vector<8x32xf32>
    %280 = arith.mulf %279, %279 : vector<8x32xf32>
    %cst_93 = arith.constant dense<0.000000e+00> : vector<8xf32>
    %281 = vector.multi_reduction <add>, %280, %cst_93 [1] : vector<8x32xf32> to vector<8xf32>
    %282 = vector.shape_cast %281 : vector<8xf32> to vector<8x1xf32>
    %cst_94 = arith.constant 3.200000e+01 : f32
    %283 = vector.broadcast %cst_94 : f32 to vector<8x1xf32>
    %284 = arith.divf %282, %283 : vector<8x1xf32>
    %285 = vector.broadcast %277 : vector<8x1xf32> to vector<8x32xf32>
    %286 = arith.subf %273, %285 : vector<8x32xf32>
    %cst_95 = arith.constant 9.99999997E-7 : f32
    %287 = vector.broadcast %cst_95 : f32 to vector<8x1xf32>
    %288 = arith.addf %284, %287 : vector<8x1xf32>
    %289 = math.rsqrt %288 : vector<8x1xf32>
    %290 = vector.broadcast %289 : vector<8x1xf32> to vector<8x32xf32>
    %291 = arith.mulf %286, %290 : vector<8x32xf32>
    %c0_96 = arith.constant 0 : index
    %c0_97 = arith.constant 0 : index
    %292 = vector.load %arg9[%c0_96, %c0_97] : memref<1x32xf32, #tpu.memory_space<vmem>>, vector<1x32xf32>
    %293 = vector.broadcast %292 : vector<1x32xf32> to vector<8x32xf32>
    %294 = arith.mulf %291, %293 : vector<8x32xf32>
    %c0_98 = arith.constant 0 : index
    %c0_99 = arith.constant 0 : index
    %295 = vector.load %arg10[%c0_98, %c0_99] : memref<1x32xf32, #tpu.memory_space<vmem>>, vector<1x32xf32>
    %296 = vector.broadcast %295 : vector<1x32xf32> to vector<8x32xf32>
    %297 = arith.addf %294, %296 : vector<8x32xf32>
    %298 = arith.truncf %297 : vector<8x32xf32> to vector<8x32xbf16>
    %c0_100 = arith.constant 0 : index
    %c0_101 = arith.constant 0 : index
    %299 = vector.load %arg21[%c0_100, %c0_101] : memref<32x64xf32, #tpu.memory_space<vmem>>, vector<32x64xf32>
    %300 = arith.truncf %299 : vector<32x64xf32> to vector<32x64xbf16>
    %cst_102 = arith.constant dense<0.000000e+00> : vector<8x64xf32>
    %301 = tpu.matmul %298, %300, %cst_102 {dimension_numbers = #tpu.dot_dimension_numbers<[1], [0], [0], [1], [0, 0, 1, 1], [], []>} : vector<8x32xbf16>, vector<32x64xbf16>, vector<8x64xf32> -> vector<8x64xf32>
    %c0_103 = arith.constant 0 : index
    %c0_104 = arith.constant 0 : index
    %302 = vector.load %arg22[%c0_103, %c0_104] : memref<1x64xf32, #tpu.memory_space<vmem>>, vector<1x64xf32>
    %303 = vector.broadcast %302 : vector<1x64xf32> to vector<8x64xf32>
    %304 = arith.addf %301, %303 : vector<8x64xf32>
    %cst_105 = arith.constant 0.000000e+00 : f32
    %305 = vector.broadcast %cst_105 : f32 to vector<8x64xf32>
    %306 = arith.maximumf %304, %305 : vector<8x64xf32>
    %307 = arith.truncf %306 : vector<8x64xf32> to vector<8x64xbf16>
    %c0_106 = arith.constant 0 : index
    %c0_107 = arith.constant 0 : index
    %308 = vector.load %arg23[%c0_106, %c0_107] : memref<64x32xf32, #tpu.memory_space<vmem>>, vector<64x32xf32>
    %309 = arith.truncf %308 : vector<64x32xf32> to vector<64x32xbf16>
    %cst_108 = arith.constant dense<0.000000e+00> : vector<8x32xf32>
    %310 = tpu.matmul %307, %309, %cst_108 {dimension_numbers = #tpu.dot_dimension_numbers<[1], [0], [0], [1], [0, 0, 1, 1], [], []>} : vector<8x64xbf16>, vector<64x32xbf16>, vector<8x32xf32> -> vector<8x32xf32>
    %c0_109 = arith.constant 0 : index
    %c0_110 = arith.constant 0 : index
    %311 = vector.load %arg24[%c0_109, %c0_110] : memref<1x32xf32, #tpu.memory_space<vmem>>, vector<1x32xf32>
    %312 = vector.broadcast %311 : vector<1x32xf32> to vector<8x32xf32>
    %313 = arith.addf %310, %312 : vector<8x32xf32>
    %314 = arith.addf %273, %313 : vector<8x32xf32>
    %c0_111 = arith.constant 0 : index
    %c0_112 = arith.constant 0 : index
    %315 = vector.load %arg25[%c0_111, %c0_112] : memref<8x32xf32, #tpu.memory_space<vmem>>, vector<8x32xf32>
    tpu.vector_store %arg25[%c0_111, %c0_112], %314 {strides = array<i32>} : memref<8x32xf32, #tpu.memory_space<vmem>>, vector<8x32xf32>,
    return
  }
  func.func @transform_0(%arg0: i32) -> (i32, i32) {
    %c0_i32 = arith.constant 0 : i32
    %c0_i32_0 = arith.constant 0 : i32
    return %arg0, %c0_i32 : i32, i32
  }
  func.func @transform_1(%arg0: i32) -> (i32, i32) {
    %c0_i32 = arith.constant 0 : i32
    %c0_i32_0 = arith.constant 0 : i32
    return %arg0, %c0_i32 : i32, i32
  }
  func.func @transform_2(%arg0: i32) -> (i32, i32, i32) {
    %c0_i32 = arith.constant 0 : i32
    %c0_i32_0 = arith.constant 0 : i32
    %c0_i32_1 = arith.constant 0 : i32
    return %arg0, %c0_i32, %c0_i32_0 : i32, i32, i32
  }
  func.func @transform_3(%arg0: i32) -> (i32, i32, i32) {
    %c0_i32 = arith.constant 0 : i32
    %c0_i32_0 = arith.constant 0 : i32
    %c0_i32_1 = arith.constant 0 : i32
    return %arg0, %c0_i32, %c0_i32_0 : i32, i32, i32
  }
  func.func @transform_4(%arg0: i32) -> (i32, i32) {
    %c0_i32 = arith.constant 0 : i32
    %c0_i32_0 = arith.constant 0 : i32
    %c0_i32_1 = arith.constant 0 : i32
    return %c0_i32, %c0_i32_0 : i32, i32
  }
  func.func @transform_5(%arg0: i32) -> (i32, i32) {
    %c0_i32 = arith.constant 0 : i32
    %c0_i32_0 = arith.constant 0 : i32
    %c0_i32_1 = arith.constant 0 : i32
    return %c0_i32, %c0_i32_0 : i32, i32
  }
  func.func @transform_6(%arg0: i32) -> (i32, i32) {
    %c0_i32 = arith.constant 0 : i32
    %c0_i32_0 = arith.constant 0 : i32
    %c0_i32_1 = arith.constant 0 : i32
    return %c0_i32, %c0_i32_0 : i32, i32
  }
  func.func @transform_7(%arg0: i32) -> (i32, i32) {
    %c0_i32 = arith.constant 0 : i32
    %c0_i32_0 = arith.constant 0 : i32
    %c0_i32_1 = arith.constant 0 : i32
    return %c0_i32, %c0_i32_0 : i32, i32
  }
  func.func @transform_8(%arg0: i32) -> (i32, i32) {
    %c0_i32 = arith.constant 0 : i32
    %c0_i32_0 = arith.constant 0 : i32
    %c0_i32_1 = arith.constant 0 : i32
    return %c0_i32, %c0_i32_0 : i32, i32
  }
  func.func @transform_9(%arg0: i32) -> (i32, i32) {
    %c0_i32 = arith.constant 0 : i32
    %c0_i32_0 = arith.constant 0 : i32
    %c0_i32_1 = arith.constant 0 : i32
    return %c0_i32, %c0_i32_0 : i32, i32
  }
  func.func @transform_10(%arg0: i32) -> (i32, i32) {
    %c0_i32 = arith.constant 0 : i32
    %c0_i32_0 = arith.constant 0 : i32
    %c0_i32_1 = arith.constant 0 : i32
    return %c0_i32, %c0_i32_0 : i32, i32
  }
  func.func @transform_11(%arg0: i32) -> (i32, i32) {
    %c0_i32 = arith.constant 0 : i32
    %c0_i32_0 = arith.constant 0 : i32
    %c0_i32_1 = arith.constant 0 : i32
    return %c0_i32, %c0_i32_0 : i32, i32
  }
  func.func @transform_12(%arg0: i32) -> (i32, i32) {
    %c0_i32 = arith.constant 0 : i32
    %c0_i32_0 = arith.constant 0 : i32
    %c0_i32_1 = arith.constant 0 : i32
    return %c0_i32, %c0_i32_0 : i32, i32
  }
  func.func @transform_13(%arg0: i32) -> (i32, i32) {
    %c0_i32 = arith.constant 0 : i32
    %c0_i32_0 = arith.constant 0 : i32
    %c0_i32_1 = arith.constant 0 : i32
    return %c0_i32, %c0_i32_0 : i32, i32
  }
  func.func @transform_14(%arg0: i32) -> (i32, i32) {
    %c0_i32 = arith.constant 0 : i32
    %c0_i32_0 = arith.constant 0 : i32
    %c0_i32_1 = arith.constant 0 : i32
    return %c0_i32, %c0_i32_0 : i32, i32
  }
  func.func @transform_15(%arg0: i32) -> (i32, i32) {
    %c0_i32 = arith.constant 0 : i32
    %c0_i32_0 = arith.constant 0 : i32
    %c0_i32_1 = arith.constant 0 : i32
    return %c0_i32, %c0_i32_0 : i32, i32
  }
  func.func @transform_16(%arg0: i32) -> (i32, i32) {
    %c0_i32 = arith.constant 0 : i32
    %c0_i32_0 = arith.constant 0 : i32
    %c0_i32_1 = arith.constant 0 : i32
    return %c0_i32, %c0_i32_0 : i32, i32
  }
  func.func @transform_17(%arg0: i32) -> (i32, i32) {
    %c0_i32 = arith.constant 0 : i32
    %c0_i32_0 = arith.constant 0 : i32
    %c0_i32_1 = arith.constant 0 : i32
    return %c0_i32, %c0_i32_0 : i32, i32
  }
  func.func @transform_18(%arg0: i32) -> (i32, i32) {
    %c0_i32 = arith.constant 0 : i32
    %c0_i32_0 = arith.constant 0 : i32
    %c0_i32_1 = arith.constant 0 : i32
    return %c0_i32, %c0_i32_0 : i32, i32
  }
  func.func @transform_19(%arg0: i32) -> (i32, i32) {
    %c0_i32 = arith.constant 0 : i32
    %c0_i32_0 = arith.constant 0 : i32
    %c0_i32_1 = arith.constant 0 : i32
    return %c0_i32, %c0_i32_0 : i32, i32
  }
  func.func @transform_20(%arg0: i32) -> (i32, i32) {
    %c0_i32 = arith.constant 0 : i32
    %c0_i32_0 = arith.constant 0 : i32
    %c0_i32_1 = arith.constant 0 : i32
    return %c0_i32, %c0_i32_0 : i32, i32
  }
  func.func @transform_21(%arg0: i32) -> (i32, i32) {
    %c0_i32 = arith.constant 0 : i32
    %c0_i32_0 = arith.constant 0 : i32
    %c0_i32_1 = arith.constant 0 : i32
    return %c0_i32, %c0_i32_0 : i32, i32
  }
  func.func @transform_22(%arg0: i32) -> (i32, i32) {
    %c0_i32 = arith.constant 0 : i32
    %c0_i32_0 = arith.constant 0 : i32
    %c0_i32_1 = arith.constant 0 : i32
    return %c0_i32, %c0_i32_0 : i32, i32
  }
  func.func @transform_23(%arg0: i32) -> (i32, i32) {
    %c0_i32 = arith.constant 0 : i32
    %c0_i32_0 = arith.constant 0 : i32
    %c0_i32_1 = arith.constant 0 : i32
    return %c0_i32, %c0_i32_0 : i32, i32
  }
  func.func @transform_24(%arg0: i32) -> (i32, i32) {
    %c0_i32 = arith.constant 0 : i32
    %c0_i32_0 = arith.constant 0 : i32
    return %arg0, %c0_i32 : i32, i32
  }
}

</mosaic_0001>

<bundles_post_ra>
// kernel: decoder_forward.5
= control target key start
LH: loop header
LB: loop body
LE: loop exit
PB: predicated region body
PF: predicated region fallthrough
CT: control target
= control target key end

     0   :  { %8 = vsyncpa [#allocation3], 0  ;;  %s504_s0 = inlined_call_operand.vmem [shape: f32[16,32], index: 0, kind: input, shape index: {}]   ;;  %s505_s1 = inlined_call_operand.vmem [shape: f32[1,32], index: 1, kind: input, shape index: {}]   ;;  %s506_s2 = inlined_call_operand.vmem [shape: f32[1,32], index: 2, kind: input, shape index: {}]   ;;  %s507_s3 = inlined_call_operand.hbm [shape: f32[16,32], index: 3, kind: output, shape index: {}]  }
   0x1   :  { %10 = vsyncpa [#allocation3 + $0x1], 0  ;;  %s408_s12 = smov 0   ;;  %s410_s13 = smov 0  }
   0x2   :  { %s412_s14 = smov 0   ;;  %s414_s15 = smov 0  }
   0x3 LB: > { %s429_s16 = sadd.s32 4294967295, %s385_s15   ;;  %s272_s17 = sadd.s32 4294967294, %s385_s15   ;;  %s385_s15 = sphi %s414_s15, %s513_s15   ;;  %s381_s14 = sphi %s412_s14, %s512_s14   ;;  %s377_s13 = sphi %s410_s13, %s511_s13   ;;  %s373_s12 = sphi %s408_s12, %s510_s12  }
   0x4   : > { %s433_s18 = sadd.s32 1, %s385_s15   ;;  %s91_s19 = sadd.s32 1, %s381_s14 }
   0x5   : > { %s88_s20 = ssub.s32 %s385_s15, %s433_s18  ;;  %p101_p0 = scmp.ne.s32.totalorder %s381_s14, %s377_s13 }
   0x6   : > { %p89_p1 = scmp.eq.s32.totalorder %s88_s20, 0  ;;  %p102_p2 = scmp.eq.s32.totalorder %s429_s16, 1 }
   0x7   : > { %p107_p3 = scmp.ne.s32.totalorder %s377_s13, %s373_s12  ;;  %p108_p4 = scmp.eq.s32.totalorder %s272_s17, 1 }
   0x8   : > { %s444_s21 = scalar_select %p89_p1, %s381_s14, %s91_s19  }
   0x9   : > { %p446_p5 = por %p102_p2, %p101_p0  ;;  %p450_p6 = por %p108_p4, %p107_p3 }
   0xa   : > { %p275_p7 = scmp.ge.s32.totalorder %s385_s15, 1  ;;  %p139_p8 = scmp.lt.s32.totalorder %s385_s15, 3 }
   0xc   : > { %p140_p9 = pnand %p275_p7, %p139_p8 }
   0xd   : > { %p162_p10 = scmp.lt.s32.totalorder (!%p140_p9), %s429_s16, 1  ;;  %s159_s29 = sand.u32 (!%p140_p9), 1, %s377_s13  }
   0xe   : > { %143 = sbr.rel (%p140_p9) target bundleno = 345 (0x159), region = 32  ;;  %s276_s30 = sshll.u32 (!%p140_p9), %s159_s29, 3 }
   0xf   : > { %s281_s8 = sshll.u32 (!%p140_p9), %s429_s16, 7  ;;  %s161_s9 = scalar_lea.vmem (!%p140_p9), [#allocation2], %s276_s30 }
  0x10   : > { %s213_s10 = sshll.u32 (!%p140_p9), %s161_s9, 4  ;;  %s211_s19 = scalar_lea.hbm (!%p140_p9), %s507_s3, %s281_s8  ;;  %s214_s10 = int_to_ptr.vmem [resolvable:$true] %s213_s10 }
  0x11   : > { %s200_s20 = scalar_lea.sflag (!%p140_p9), [#allocation3], %s159_s29 }
  0x13   : > { %s163_s24 = scalar_select %p162_p10, %s429_s16, 1  ;;  %vm167_vm0 = vcmask 261120   ;;  %v278_v11 = vld [vmem:[%s505_s1] ss:$0 sm:$0xff] }
  0x14   : > { %v279_v13 = vld [vmem:[%s506_s2] ss:$0 sm:$0xff] }
  0x15   : > { %s277_s25 = sshll.u32 %s163_s24, 3  ;;  %s325_s24 = scalar_lea.vmem %s214_s10, 128 }
  0x16   : > { %s165_s28 = scalar_lea.vmem %s504_s0, %s277_s25  ;;  %p326_p11 = scmp.ne.s32.totalorder %s214_s10, %s325_s24 }
  0x17   : > { %v166_v0 = vld [vmem:[%s165_s28] sm:$0xff]  ;;  %s387_s25 = smov [#allocation2]  }
  0x18   : > { %v168_v1 = vsel %vm167_vm0, %v166_v0, 0.0  ;;  %p327_p12 = pnand %p326_p11, %p446_p5  ;;  %s329_s26 = sshll.u32 %s387_s25, 4  ;;  %s330_s26 = int_to_ptr.vmem [resolvable:$false] %s329_s26 }
  0x19   : > { %169 = vadd.xlane.f32.xlu0 %v168_v1  ;;  %s331_s16 = scalar_lea.vmem %s330_s26, 256  ;;  %p332_p0 = scmp.lt.s32.totalorder %s214_s10, %s330_s26 }
  0x1a   : > { %p328_p13 = pneg %p327_p12  ;;  %p333_p1 = scmp.lt.s32.totalorder %s331_s16, %s325_s24 }
  0x1c   : > { %p334_p2 = por %p333_p1, %p332_p0 }
  0x1e   : > { %p335_p3 = pnand %p334_p2, %p328_p13 }
  0xa2   : > { %v170_v2 = vpop.xlane.xlu0 %169 }
  0xa3   : > { %v172_v3 = vmul.f32 0.03125, %v170_v2 }
  0xa5   : > { %v173_v4 = vsub.f32 %v166_v0, %v172_v3 }
  0xa7   : > { %v174_v5 = vmul.f32 %v173_v4, %v173_v4 }
  0xa9   : > { %v175_v6 = vsel %vm167_vm0, %v174_v5, 0.0 }
  0xaa   : > { %176 = vadd.xlane.f32.xlu0 %v175_v6 }
 0x133   : > { %v177_v7 = vpop.xlane.xlu0 %176 }
 0x134   : > { %v178_v8 = vmul.f32 0.03125, %v177_v7 }
 0x136   : > { %v179_v9 = vadd.f32 1e-06, %v178_v8 }
 0x138   : > { %323 = vrsqrt.f32 %v179_v9 }
 0x145   : > { %v324_v10 = vpop.eup %323 }
 0x146   : > { %v181_v12 = vmul.f32 %v324_v10, %v173_v4 }
 0x148   : > { %v189_v14 = vmul.f32 %v278_v11, %v181_v12 }
 0x14a   : > { %v197_v15 = vadd.f32 %v279_v13, %v189_v14 }
 0x14c   : > { %198 = vst.msk [vmem:[%s161_s9] sm:$0xff] %vm167_vm0, %v197_v15 }
 0x14d   : > { %338 = shalt.err (!%p335_p3)
}
 0x14e   : > { %s339_s27 = scalar_lea.hbm %s211_s19, 128  ;;  %s343_s30 = scalar_lea.hbm %s507_s3, 256 }
 0x14f   : > { %p340_p4 = scmp.ne.s32.totalorder %s211_s19, %s339_s27  ;;  %p344_p9 = scmp.lt.s32.totalorder %s211_s19, %s507_s3 }
 0x150   : > { %p345_p10 = scmp.lt.s32.totalorder %s343_s30, %s339_s27 }
 0x151   : > { %p341_p7 = pnand %p340_p4, %p446_p5 }
 0x152   : > { %p346_p11 = por %p345_p10, %p344_p9 }
 0x153   : > { %p342_p8 = pneg %p341_p7 }
 0x155   : > { %p347_p12 = pnand %p346_p11, %p342_p8 }
 0x157   : > { %350 = shalt.err (!%p347_p12)
}
 0x158   : > { %284 = dma.vmem_to_hbm [thread:$0]  (%p446_p5), %s214_s10, 128, %s211_s19, %s200_s20  }
 0x159 PF: > { %p290_p13 = scmp.ge.s32.totalorder %s385_s15, 2  ;;  %s225_s6 = sand.u32 1, %s373_s12  }
 0x15a   : > { %s226_s7 = scalar_lea.sflag [#allocation3], %s225_s6 }
 0x15b   : > { %p287_p0 = pnand %p290_p13, %p450_p6 }
 0x15d   : > { %p288_p1 = pneg %p287_p0 }
 0x15f   : > { %368 = dma.done.wait (%p288_p1), %s226_s7, 128  }
 0x160   : > { %370 = vsyncadd (%p288_p1), %s226_s7, 4294967168  ;;  %p13_p2 = scmp.ge.s32.totalorder %s433_s18, 4   ;;  %s510_s12 = smov %s377_s13 }
 0x161   : > { %s511_s13 = smov %s381_s14  ;;  %s512_s14 = smov %s444_s21 }
 0x162   : > { %s513_s15 = smov %s433_s18  ;;  %15 = sbr.rel (!%p13_p2) target bundleno = 3 (0x3), region = 67 }
 0x167   :  { %231 = vsyncpa [#allocation3], 1 }
 0x168   :  { %233 = vsyncpa [#allocation3 + $0x1], 1 }

// kernel: decoder_forward.4
= control target key start
LH: loop header
LB: loop body
LE: loop exit
PB: predicated region body
PF: predicated region fallthrough
CT: control target
= control target key end

     0   :  { %s3233_s0 = inlined_call_operand.vmem [shape: f32[16,32], index: 0, kind: input, shape index: {}]   ;;  %s3234_s1 = inlined_call_operand.vmem [shape: f32[16,32], index: 1, kind: input, shape index: {}]   ;;  %s3235_s2 = inlined_call_operand.vmem [shape: f32[2,8,8], index: 2, kind: input, shape index: {}]   ;;  %s3236_s3 = inlined_call_operand.vmem [shape: f32[2,8,8], index: 3, kind: input, shape index: {}]   ;;  %s3237_s4 = inlined_call_operand.vmem [shape: f32[1,32], index: 4, kind: input, shape index: {}]   ;;  %s3238_s5 = inlined_call_operand.vmem [shape: f32[1,32], index: 5, kind: input, shape index: {}]   ;;  %s3239_s6 = inlined_call_operand.vmem [shape: f32[1,32], index: 6, kind: input, shape index: {}]   ;;  %s3240_s7 = inlined_call_operand.vmem [shape: f32[1,32], index: 7, kind: input, shape index: {}]   ;;  %s3241_s8 = inlined_call_operand.vmem [shape: f32[1,32], index: 8, kind: input, shape index: {}]   ;;  %s3242_s9 = inlined_call_operand.vmem [shape: f32[1,32], index: 9, kind: input, shape index: {}]   ;;  %s3243_s10 = inlined_call_operand.vmem [shape: f32[32,96], index: 10, kind: input, shape index: {}]   ;;  %s3244_s11 = inlined_call_operand.vmem [shape: f32[1,96], index: 11, kind: input, shape index: {}]   ;;  %s3245_s12 = inlined_call_operand.vmem [shape: f32[32,32], index: 12, kind: input, shape index: {}]   ;;  %s3246_s13 = inlined_call_operand.vmem [shape: f32[1,32], index: 13, kind: input, shape index: {}]   ;;  %s3247_s14 = inlined_call_operand.vmem [shape: f32[32,32], index: 14, kind: input, shape index: {}]   ;;  %s3248_s15 = inlined_call_operand.vmem [shape: f32[1,32], index: 15, kind: input, shape index: {}]   ;;  %s3249_s16 = inlined_call_operand.vmem [shape: f32[32,64], index: 16, kind: input, shape index: {}]   ;;  %s3250_s17 = inlined_call_operand.vmem [shape: f32[1,64], index: 17, kind: input, shape index: {}]   ;;  %s3251_s18 = inlined_call_operand.vmem [shape: f32[32,32], index: 18, kind: input, shape index: {}]   ;;  %s3252_s19 = inlined_call_operand.vmem [shape: f32[1,32], index: 19, kind: input, shape index: {}]   ;;  %s3253_s20 = inlined_call_operand.vmem [shape: f32[32,64], index: 20, kind: input, shape index: {}]   ;;  %s3254_s21 = inlined_call_operand.vmem [shape: f32[1,64], index: 21, kind: input, shape index: {}]   ;;  %s3255_s22 = inlined_call_operand.vmem [shape: f32[64,32], index: 22, kind: input, shape index: {}]   ;;  %s3256_s23 = inlined_call_operand.hbm [shape: f32[1,32], index: 23, kind: input, shape index: {}]   ;;  %s3257_s24 = inlined_call_operand.vmem [shape: f32[16,32], index: 24, kind: output, shape index: {}]  }
   0x1   :  { %3265 = sst [smem:[#allocation5_spill]] %s3233_s0 }
   0x2   :  { %3266 = sst [smem:[#allocation6_spill]] %s3234_s1 }
   0x3   :  { %3267 = sst [smem:[#allocation7_spill]] %s3235_s2 }
   0x4   :  { %3268 = sst [smem:[#allocation8_spill]] %s3236_s3 }
   0x5   :  { %3269 = sst [smem:[#allocation9_spill]] %s3237_s4 }
   0x6   :  { %3270 = sst [smem:[#allocation10_spill]] %s3238_s5 }
   0x7   :  { %3271 = sst [smem:[#allocation11_spill]] %s3239_s6 }
   0x8   :  { %3272 = sst [smem:[#allocation12_spill]] %s3240_s7 }
   0x9   :  { %3273 = sst [smem:[#allocation13_spill]] %s3241_s8 }
   0xa   :  { %29 = vsyncpa [#allocation3], 0  ;;  %s2847_s5 = smov 0  }
   0xb LB: > { %s2333_s26 = sadd.s32 4294967295, %s2703_s5   ;;  %p2335_p0 = scmp.ge.s32.totalorder %s2703_s5, 1  ;;  %s2703_s5 = sphi %s2847_s5, %s35_s5  }
   0xc   : > { %p590_p1 = scmp.lt.s32.totalorder %s2703_s5, 3  ;;  %p2602_p3 = scmp.eq.s32.totalorder %s2333_s26, 0 }
   0xd   : > { %s2705_s28 = smov [#allocation2]  }
   0xe   : > { %p2855_p2 = pnand %p2335_p0, %p590_p1  ;;  %s660_s6 = sshll.u32 %s2705_s28, 4  ;;  %s661_s6 = int_to_ptr.vmem [resolvable:$true] %s660_s6 }
   0xf   : > { %s2678_s2 = scalar_lea.vmem %s661_s6, 16  ;;  %s2685_s29 = scalar_lea.vmem %s661_s6, 32 }
  0x10   : > { %p2598_p4 = pneg %p2855_p2  ;;  %p2679_p7 = scmp.ne.s32.totalorder %s661_s6, %s2678_s2 }
  0x11   : > { %p2686_p10 = scmp.lt.s32.totalorder %s661_s6, %s661_s6  ;;  %p2687_p11 = scmp.lt.s32.totalorder %s2685_s29, %s2678_s2 }
  0x12   : > { %p2599_p5 = pnand %p2602_p3, %p2598_p4 }
  0x13   : > { %p2688_p12 = por %p2687_p11, %p2686_p10 }
  0x14   : > { %p2669_p6 = pneg %p2599_p5 }
  0x16   : > { %p2681_p8 = pnand %p2679_p7, %p2669_p6 }
  0x18   : > { %p2682_p9 = pneg %p2681_p8 }
  0x1a   : > { %p2689_p13 = pnand %p2688_p12, %p2682_p9 }
  0x1c   : > { %2692 = shalt.err (!%p2689_p13)
}
  0x1d   : > { %2601 = dma.hbm_to_vmem [thread:$0]  (!%p2599_p5), %s3256_s23, 16, %s661_s6, [#allocation3]  }
  0x1e   : > { %701 = sbr.rel (%p2855_p2) target bundleno = 4156 (0x103c), region = 116 }
  0x23   : > { %2698 = dma.done.wait (%p2602_p3), [#allocation3], 16  }
  0x24   : > { %2700 = vsyncadd (%p2602_p3), [#allocation3], 4294967280  ;;  %p777_p0 = scmp.lt.s32.totalorder %s2333_s26, 1  ;;  %s3275_s8 = sld [smem:[#allocation5_spill]]  ;;  %vm802_vm0 = vcmask 261120   ;;  %v836_v7 = vld [vmem:[%s3243_s10 + $0x10] sm:$0xff] }
  0x25   : > { %v837_v8 = vld [vmem:[%s3243_s10 + $0x18] sm:$0xff]  ;;  %v834_v9 = vld [vmem:[%s3243_s10] sm:$0xff]  ;;  %v2706_v10 = vmov 0.0   ;;  %v835_v12 = vld [vmem:[%s3243_s10 + $0x8] sm:$0xff]  ;;  %vm2707_vm1 = vmmov 0   ;;  %s3276_s25 = sld [smem:[#allocation9_spill]] }
  0x26   : > { %s3292_s26 = smov (!%p777_p0, %s2333_s26), 1  ;;  %2438 = vmatprep.subr.bf16.mxu1 %v2706_v10  ;;  %v839_v11 = vpack.c.bf16 %v837_v8, %v836_v7  ;;  %2442 = vmatprep.mubr.msk.bf16.mxu1 %vm2707_vm1, %v2706_v10  ;;  %v838_v13 = vpack.c.bf16 %v835_v12, %v834_v9  ;;  %s3277_s1 = sld [smem:[#allocation10_spill]]  ;;  %v2347_v24 = vld [vmem:[%s3244_s11] ss:$0 sm:$0xff]  ;;  %vm894_vm2 = vcmask 64512   ;;  %vm960_vm3 = vcmask 1043456  }
  0x27   : > { %s2869_s30 = sshll.u32 %s3292_s26, 3  ;;  %2452 = vmatprep.subr.bf16.mxu0 %v2706_v10  ;;  %2454 = vmatprep.mubr.msk.bf16.mxu0 %vm2707_vm1, %v2706_v10  ;;  %s2708_s28 = smov 120   ;;  %vm1353_vm4 = vcmask 130048   ;;  %vm1355_vm5 = vcmask 195584   ;;  %vm2186_vm6 = vcmask 523264  }
  0x28   : > { %2439 = vmatpush3.bf16.msra.mxu1 %v839_v11  ;;  %s3263_s6 = smov 96   ;;  %s3264_s2 = smov 88  }
  0x29   : > { %2440 = vmatprep.subr.bf16.mxu1 %v2706_v10  ;;  %s3258_s29 = smov 80   ;;  %s2712_s0 = smov 112  }
  0x2a   : > { %s780_s4 = scalar_lea.vmem %s3275_s8, %s2869_s30  ;;  %s3260_s7 = smov 72  }
  0x2b   : > { %v2875_v0 = vld [vmem:[%s780_s4] sm:$0xff]  ;;  %s2714_s3 = smov 104   ;;  %s3278_s4 = sld [smem:[#allocation7_spill]] }
  0x2c   : > { %v803_v1 = vsel %vm802_vm0, %v2875_v0, 0.0  ;;  %2441 = vmatpush3.bf16.msra.mxu1 %v838_v13  ;;  %v2345_v18 = vld [vmem:[%s3276_s25] ss:$0 sm:$0xff]  ;;  %s2715_s26 = smov 64   ;;  %s2716_s27 = smov 56  }
  0x2d   : > { %804 = vadd.xlane.f32.xlu0 %v803_v1  ;;  %2446 = vmatprep.subr.bf16.mxu1 %v2706_v10  ;;  %v2346_v20 = vld [vmem:[%s3277_s1] ss:$0 sm:$0xff]  ;;  %s2717_s25 = smov 48   ;;  %s2718_s8 = smov 40  }
  0x31   : > { %s788_s1 = scalar_lea.vmem %s3278_s4, %s2869_s30  ;;  %s3259_s4 = smov 8  }
  0x32   : > { %v800_v43 = vld [vmem:[%s788_s1] sm:$0xff]  ;;  %s3262_s1 = smov 16  }
  0xb6   : > { %v805_v2 = vpop.xlane.xlu0 %804 }
  0xb7   : > { %v807_v3 = vmul.f32 0.03125, %v805_v2 }
  0xb9   : > { %v808_v4 = vsub.f32 %v2875_v0, %v807_v3 }
  0xbb   : > { %v809_v5 = vmul.f32 %v808_v4, %v808_v4 }
  0xbd   : > { %v810_v6 = vsel %vm802_vm0, %v809_v5, 0.0 }
  0xbe   : > { %811 = vadd.xlane.f32.xlu0 %v810_v6 }
 0x147   : > { %v812_v14 = vpop.xlane.xlu0 %811 }
 0x148   : > { %v813_v15 = vmul.f32 0.03125, %v812_v14 }
 0x14a   : > { %v814_v16 = vadd.f32 1e-06, %v813_v15 }
 0x14c   : > { %2629 = vrsqrt.f32 %v814_v16 }
 0x159   : > { %v2630_v17 = vpop.eup %2629 }
 0x15a   : > { %v816_v19 = vmul.f32 %v2630_v17, %v808_v4 }
 0x15c   : > { %v824_v21 = vmul.f32 %v2345_v18, %v816_v19 }
 0x15e   : > { %v832_v22 = vadd.f32 %v2346_v20, %v824_v21 }
 0x160   : > { %v833_v23 = vpack.c.bf16 %v832_v22, %v832_v22 }
 0x162   : > { %2443 = vmatmul.mubr.msk.bf16.vlgmr.msra.gmra.mxu1 %vm802_vm0, %v833_v23 }
 0x163   : > { %2448 = vmatprep.mubr.msk.bf16.mxu1 %vm2707_vm1, %v2706_v10 }
 0x222   : > { %v884_v25 = vpop.f32.mrf.mxu1 }
 0x223   : > { %v885_v26 = vadd.f32 %v2347_v24, %v884_v25 }
 0x224   : > { %v2444_v27 = vpop.f32.mrf.mxu1 }
 0x225   : > { %v2913_v28 = vpack.c.bf16 %v885_v26, %v885_v26 }
 0x226   : > { %v887_v29 = vpop.f32.mrf.mxu1 }
 0x227   : > { %1004 = vrot.lane.b32.xlu0 %v2913_v28, %s2708_s28  ;;  %892 = vrot.lane.b32.xlu1 %v2913_v28, %s3263_s6 }
 0x228   : > { %v2445_v30 = vpop.f32.mrf.mxu1 }
 0x22b   : > { %1006 = vrot.lane.b32.xlu1 %v2913_v28, %s3264_s2 }
 0x22f   : > { %1118 = vrot.lane.b32.xlu1 %v2913_v28, %s3258_s29 }
 0x233   : > { %1116 = vrot.lane.b32.xlu1 %v2913_v28, %s2712_s0 }
 0x237   : > { %1230 = vrot.lane.b32.xlu1 %v2913_v28, %s3260_s7 }
 0x23b   : > { %1228 = vrot.lane.b32.xlu1 %v2913_v28, %s2714_s3 }
 0x299   : > { %v893_v31 = vpop.permute.xlu1 %892  ;;  %v1005_v36 = vpop.permute.xlu0 %1004 }
 0x29a   : > { %v899_v32 = vsel %vm894_vm2, %v893_v31, 0 }
 0x29b   : > { %2447 = vmatpush3.bf16.xpose.msra.mxu1 %v899_v32 }
 0x29c   : > { %2458 = vmatprep.subr.bf16.mxu1 %v2706_v10 }
 0x29d   : > { %v1007_v33 = vpop.permute.xlu1 %1006 }
 0x29e   : > { %v1012_v34 = vsel %vm894_vm2, %v1007_v33, 0 }
 0x2a1   : > { %v1119_v35 = vpop.permute.xlu1 %1118 }
 0x2a2   : > { %2449 = vmatmul.mubr.msk.bf16.vlgmr.msra.gmra.mxu1 %vm894_vm2, %v2913_v28  ;;  %v1124_v38 = vsel %vm894_vm2, %v1119_v35, 0 }
 0x2a3   : > { %2459 = vmatpush3.bf16.xpose.msra.mxu1 %v1012_v34  ;;  %2460 = vmatprep.mubr.msk.bf16.mxu1 %vm2707_vm1, %v2706_v10 }
 0x2a4   : > { %2470 = vmatprep.subr.bf16.mxu1 %v2706_v10 }
 0x2a5   : > { %v1117_v37 = vpop.permute.xlu1 %1116 }
 0x2a9   : > { %v1231_v39 = vpop.permute.xlu1 %1230 }
 0x2aa   : > { %2461 = vmatmul.mubr.msk.bf16.vlgmr.msra.gmra.mxu1 %vm894_vm2, %v1005_v36  ;;  %v1236_v40 = vsel %vm894_vm2, %v1231_v39, 0 }
 0x2ab   : > { %2471 = vmatpush3.bf16.xpose.msra.mxu1 %v1124_v38  ;;  %2472 = vmatprep.mubr.msk.bf16.mxu1 %vm2707_vm1, %v2706_v10 }
 0x2ac   : > { %2482 = vmatprep.subr.bf16.mxu1 %v2706_v10 }
 0x2ad   : > { %v1229_v41 = vpop.permute.xlu1 %1228 }
 0x2b2   : > { %2473 = vmatmul.mubr.msk.bf16.vlgmr.msra.gmra.mxu1 %vm894_vm2, %v1117_v37 }
 0x2b3   : > { %2483 = vmatpush3.bf16.xpose.msra.mxu1 %v1236_v40  ;;  %2484 = vmatprep.mubr.msk.bf16.mxu1 %vm2707_vm1, %v2706_v10 }
 0x2b4   : > { %2494 = vmatprep.subr.bf16.mxu1 %v2706_v10 }
 0x2ba   : > { %2485 = vmatmul.mubr.msk.bf16.vlgmr.msra.gmra.mxu1 %vm894_vm2, %v1229_v41 }
 0x2bb   : > { %2498 = vmatprep.mubr.msk.bf16.mxu1 %vm2707_vm1, %v2706_v10 }
 0x362   : > { %v935_v42 = vpop.f32.mrf.mxu1 }
 0x363   : > { %v941_v44 = vmul.f32 0.35355338, %v935_v42 }
 0x364   : > { %v2450_v45 = vpop.f32.mrf.mxu1 }
 0x365   : > { %v942_v46 = vadd.f32 %v941_v44, %v800_v43 }
 0x366   : > { %v938_v47 = vpop.f32.mrf.mxu1 }
 0x367   : > { %v943_v48 = vsel %vm894_vm2, %v942_v46, -inf }
 0x368   : > { %944 = vmax.xlane.f32.xlu1 %v943_v48  ;;  %v2451_v49 = vpop.f32.mrf.mxu1 }
 0x36a   : > { %v1048_v50 = vpop.f32.mrf.mxu1 }
 0x36b   : > { %v1054_v51 = vmul.f32 0.35355338, %v1048_v50 }
 0x36c   : > { %v2462_v52 = vpop.f32.mrf.mxu1 }
 0x36d   : > { %v1055_v53 = vadd.f32 %v1054_v51, %v800_v43 }
 0x36e   : > { %v1051_v54 = vpop.f32.mrf.mxu1 }
 0x36f   : > { %v1056_v55 = vsel %vm894_vm2, %v1055_v53, -inf }
 0x370   : > { %1057 = vmax.xlane.f32.xlu0 %v1056_v55  ;;  %v2463_v56 = vpop.f32.mrf.mxu1 }
 0x372   : > { %v1160_v57 = vpop.f32.mrf.mxu1 }
 0x373   : > { %v1166_v58 = vmul.f32 0.35355338, %v1160_v57 }
 0x374   : > { %v2474_v59 = vpop.f32.mrf.mxu1 }
 0x375   : > { %v1167_v60 = vadd.f32 %v1166_v58, %v800_v43 }
 0x376   : > { %v1163_v61 = vpop.f32.mrf.mxu1 }
 0x377   : > { %v1168_v62 = vsel %vm894_vm2, %v1167_v60, -inf  ;;  %v1360_v61 = vld [vmem:[%s3245_s12 + $0x10] sm:$0xff] }
 0x378   : > { %1169 = vmax.xlane.f32.xlu1 %v1168_v62  ;;  %v2475_v63 = vpop.f32.mrf.mxu1  ;;  %v1361_v62 = vld [vmem:[%s3245_s12 + $0x18] sm:$0xff] }
 0x379   : > { %v1363_v63 = vpack.c.bf16 %v1361_v62, %v1360_v61 }
 0x37a   : > { %v1272_v1 = vpop.f32.mrf.mxu1 }
 0x37b   : > { %v1278_v2 = vmul.f32 0.35355338, %v1272_v1  ;;  %2495 = vmatpush3.bf16.msra.mxu1 %v1363_v63  ;;  %v1358_v1 = vld [vmem:[%s3245_s12] sm:$0xff] }
 0x37c   : > { %v2486_v3 = vpop.f32.mrf.mxu1  ;;  %2496 = vmatprep.subr.bf16.mxu1 %v2706_v10 }
 0x37d   : > { %v1279_v4 = vadd.f32 %v1278_v2, %v800_v43  ;;  %v1359_v2 = vld [vmem:[%s3245_s12 + $0x8] sm:$0xff] }
 0x37e   : > { %v1275_v5 = vpop.f32.mrf.mxu1  ;;  %v1362_v3 = vpack.c.bf16 %v1359_v2, %v1358_v1  ;;  %v2361_v1 = vld [vmem:[%s3248_s15] ss:$0 sm:$0xff] }
 0x37f   : > { %v1280_v6 = vsel %vm894_vm2, %v1279_v4, -inf }
 0x380   : > { %1281 = vmax.xlane.f32.xlu0 %v1280_v6  ;;  %v2487_v7 = vpop.f32.mrf.mxu1  ;;  %2497 = vmatpush3.bf16.msra.mxu1 %v1362_v3 }
 0x381   : > { %2510 = vmatprep.subr.bf16.mxu1 %v2706_v10 }
 0x3f1   : > { %v945_v8 = vpop.xlane.xlu1 %944 }
 0x3f2   : > { %v946_v9 = vsub.f32 %v942_v46, %v945_v8 }
 0x3f4   : > { %v947_v11 = vmul.f32 1.442695, %v946_v9 }
 0x3f6   : > { %2631 = vpow2.f32 %v947_v11 }
 0x3f9   : > { %v1058_v12 = vpop.xlane.xlu0 %1057 }
 0x3fa   : > { %v1059_v13 = vsub.f32 %v1055_v53, %v1058_v12 }
 0x3fc   : > { %v1060_v14 = vmul.f32 1.442695, %v1059_v13 }
 0x3fe   : > { %2633 = vpow2.f32 %v1060_v14 }
 0x401   : > { %v1170_v24 = vpop.xlane.xlu1 %1169 }
 0x402   : > { %v1171_v25 = vsub.f32 %v1167_v60, %v1170_v24 }
 0x403   : > { %v2632_v15 = vpop.eup %2631 }
 0x404   : > { %v949_v16 = vsel %vm894_vm2, %v2632_v15, 0.0  ;;  %v1172_v26 = vmul.f32 1.442695, %v1171_v25 }
 0x405   : > { %950 = vadd.xlane.f32.xlu1 %v949_v16 }
 0x409   : > { %v1282_v17 = vpop.xlane.xlu0 %1281 }
 0x40a   : > { %v1283_v18 = vsub.f32 %v1279_v4, %v1282_v17 }
 0x40b   : > { %v2634_v19 = vpop.eup %2633 }
 0x40c   : > { %v1284_v20 = vmul.f32 1.442695, %v1283_v18  ;;  %v1062_v21 = vsel %vm894_vm2, %v2634_v19, 0.0 }
 0x40d   : > { %1063 = vadd.xlane.f32.xlu0 %v1062_v21 }
 0x40e   : > { %2635 = vpow2.f32 %v1284_v20  ;;  %v2357_v20 = vld [vmem:[%s3246_s13] ss:$0 sm:$0xff] }
 0x40f   : > { %2637 = vpow2.f32 %v1172_v26 }
 0x416   : > { %955 = vrot.lane.b32.xlu1 %v2913_v28, %s2715_s26  ;;  %s3261_s26 = smov 24  }
 0x41b   : > { %v2636_v22 = vpop.eup %2635 }
 0x41c   : > { %v1286_v23 = vsel %vm894_vm2, %v2636_v22, 0.0  ;;  %v2638_v27 = vpop.eup %2637 }
 0x41d   : > { %1287 = vadd.xlane.f32.xlu0 %v1286_v23  ;;  %v1174_v29 = vsel %vm894_vm2, %v2638_v27, 0.0 }
 0x433   : > { %1068 = vrot.lane.b32.xlu0 %v2913_v28, %s2716_s27  ;;  %s3279_s27 = sld [smem:[#allocation6_spill]] }
 0x439   : > { %s784_s2 = scalar_lea.vmem %s3279_s27, %s2869_s30  ;;  %s3283_s27 = smov 88  }
 0x43a   : > { %1175 = vadd.xlane.f32.xlu1 %v1174_v29 }
 0x44b   : > { %1180 = vrot.lane.b32.xlu1 %v2913_v28, %s2717_s25  ;;  %s3280_s25 = sld [smem:[#allocation11_spill]] }
 0x44f   : > { %1292 = vrot.lane.b32.xlu1 %v2913_v28, %s2718_s8  ;;  %s3285_s8 = smov 72  }
 0x48e   : > { %v951_v30 = vpop.xlane.xlu1 %950 }
 0x48f   : > { %2639 = vrcp.f32 %v951_v30 }
 0x492   : > { %v956_v31 = vpop.permute.xlu1 %955 }
 0x493   : > { %v962_v32 = vsel %vm960_vm3, %v956_v31, 0 }
 0x494   : > { %2453 = vmatpush3.bf16.msra.mxu0 %v962_v32 }
 0x495   : > { %2464 = vmatprep.subr.bf16.mxu0 %v2706_v10 }
 0x496   : > { %v1064_v33 = vpop.xlane.xlu0 %1063 }
 0x497   : > { %2641 = vrcp.f32 %v1064_v33 }
 0x49c   : > { %v2640_v34 = vpop.eup %2639 }
 0x49d   : > { %v953_v35 = vmul.f32 %v2640_v34, %v2632_v15  ;;  %v1505_v34 = vld [vmem:[%s3249_s16 + $0x18] sm:$0xff] }
 0x49f   : > { %v954_v36 = vpack.c.bf16 %v953_v35, %v953_v35 }
 0x4a1   : > { %2455 = vmatmul.mubr.msk.bf16.vlgmr.msra.gmra.mxu0 %vm894_vm2, %v954_v36  ;;  %v1502_v36 = vld [vmem:[%s3249_s16] sm:$0xff] }
 0x4a2   : > { %2466 = vmatprep.mubr.msk.bf16.mxu0 %vm2707_vm1, %v2706_v10 }
 0x4a4   : > { %v2642_v28 = vpop.eup %2641 }
 0x4a5   : > { %v1066_v38 = vmul.f32 %v2642_v28, %v2634_v19  ;;  %v1503_v28 = vld [vmem:[%s3249_s16 + $0x8] sm:$0xff] }
 0x4a6   : > { %v1288_v37 = vpop.xlane.xlu0 %1287 }
 0x4a7   : > { %v1067_v41 = vpack.c.bf16 %v1066_v38, %v1066_v38  ;;  %v799_v38 = vld [vmem:[%s784_s2] sm:$0xff] }
 0x4aa   : > { %v1069_v39 = vpop.permute.xlu0 %1068 }
 0x4ab   : > { %v1074_v40 = vsel %vm960_vm3, %v1069_v39, 0  ;;  %v1501_v39 = vpack.c.bf16 %v799_v38, %v799_v38 }
 0x4ac   : > { %2465 = vmatpush3.bf16.msra.mxu0 %v1074_v40  ;;  %v1447_v40 = vld [vmem:[%s3247_s14 + $0x10] sm:$0xff] }
 0x4ad   : > { %2476 = vmatprep.subr.bf16.mxu0 %v2706_v10 }
 0x4af   : > { %2467 = vmatmul.mubr.msk.bf16.vlgmr.msra.gmra.mxu0 %vm894_vm2, %v1067_v41  ;;  %v1448_v41 = vld [vmem:[%s3247_s14 + $0x18] sm:$0xff] }
 0x4b0   : > { %2478 = vmatprep.mubr.msk.bf16.mxu0 %vm2707_vm1, %v2706_v10 }
 0x4c3   : > { %v1176_v42 = vpop.xlane.xlu1 %1175 }
 0x4c4   : > { %2643 = vrcp.f32 %v1176_v42  ;;  %v1450_v42 = vpack.c.bf16 %v1448_v41, %v1447_v40 }
 0x4c5   : > { %2645 = vrcp.f32 %v1288_v37  ;;  %v1506_v37 = vpack.c.bf16 %v1503_v28, %v1502_v36 }
 0x4c7   : > { %v1181_v43 = vpop.permute.xlu1 %1180 }
 0x4c8   : > { %v1186_v44 = vsel %vm960_vm3, %v1181_v43, 0  ;;  %v1445_v43 = vld [vmem:[%s3247_s14] sm:$0xff] }
 0x4c9   : > { %2477 = vmatpush3.bf16.msra.mxu0 %v1186_v44  ;;  %v1446_v44 = vld [vmem:[%s3247_s14 + $0x8] sm:$0xff] }
 0x4ca   : > { %2488 = vmatprep.subr.bf16.mxu0 %v2706_v10 }
 0x4cb   : > { %v1293_v47 = vpop.permute.xlu1 %1292 }
 0x4cc   : > { %v1298_v50 = vsel %vm960_vm3, %v1293_v47, 0 }
 0x4d1   : > { %v2644_v45 = vpop.eup %2643 }
 0x4d2   : > { %v1178_v46 = vmul.f32 %v2644_v45, %v2638_v27  ;;  %v2646_v49 = vpop.eup %2645  ;;  %v1449_v45 = vpack.c.bf16 %v1446_v44, %v1445_v43 }
 0x4d3   : > { %v1290_v51 = vmul.f32 %v2646_v49, %v2636_v22 }
 0x4d4   : > { %v1179_v48 = vpack.c.bf16 %v1178_v46, %v1178_v46 }
 0x4d5   : > { %v1291_v52 = vpack.c.bf16 %v1290_v51, %v1290_v51 }
 0x4d6   : > { %2479 = vmatmul.mubr.msk.bf16.vlgmr.msra.gmra.mxu0 %vm894_vm2, %v1179_v48 }
 0x4d7   : > { %2489 = vmatpush3.bf16.msra.mxu0 %v1298_v50  ;;  %2490 = vmatprep.mubr.msk.bf16.mxu0 %vm2707_vm1, %v2706_v10  ;;  %v2359_v50 = vld [vmem:[%s3280_s25] ss:$0 sm:$0xff]  ;;  %s3284_s25 = smov 96  }
 0x4d8   : > { %2502 = vmatprep.subr.bf16.mxu0 %v2706_v10 }
 0x4de   : > { %2491 = vmatmul.mubr.msk.bf16.vlgmr.msra.gmra.mxu0 %vm894_vm2, %v1291_v52 }
 0x4df   : > { %2506 = vmatprep.mubr.msk.bf16.mxu0 %vm2707_vm1, %v2706_v10  ;;  %2503 = vmatpush3.bf16.msra.mxu0 %v1450_v42 }
 0x4e0   : > { %2504 = vmatprep.subr.bf16.mxu0 %v2706_v10 }
 0x4e3   : > { %2505 = vmatpush3.bf16.msra.mxu0 %v1449_v45 }
 0x4e4   : > { %2518 = vmatprep.subr.bf16.mxu0 %v2706_v10 }
 0x561   : > { %v998_v53 = vpop.f32.mrf.mxu0 }
 0x563   : > { %v2456_v54 = vpop.f32.mrf.mxu0 }
 0x565   : > { %v1001_v55 = vpop.f32.mrf.mxu0 }
 0x567   : > { %v2457_v56 = vpop.f32.mrf.mxu0 }
 0x568   : > { %v2363_v56 = vld [vmem:[%s3250_s17] ss:$0 sm:$0xff] }
 0x56f   : > { %v1110_v57 = vpop.f32.mrf.mxu0 }
 0x570   : > { %1341 = vrot.lane.b32.xlu0 %v1110_v57, %s3259_s4 }
 0x571   : > { %v2468_v58 = vpop.f32.mrf.mxu0 }
 0x573   : > { %v1113_v59 = vpop.f32.mrf.mxu0 }
 0x575   : > { %v2469_v60 = vpop.f32.mrf.mxu0 }
 0x596   : > { %v1222_v4 = vpop.f32.mrf.mxu0 }
 0x597   : > { %1345 = vrot.lane.b32.xlu1 %v1222_v4, %s3262_s1  ;;  %s3286_s1 = smov 80  }
 0x598   : > { %v2480_v5 = vpop.f32.mrf.mxu0 }
 0x59a   : > { %v1225_v6 = vpop.f32.mrf.mxu0 }
 0x59c   : > { %v2481_v7 = vpop.f32.mrf.mxu0 }
 0x59e   : > { %v1334_v8 = vpop.f32.mrf.mxu0 }
 0x59f   : > { %1349 = vrot.lane.b32.xlu0 %v1334_v8, %s3261_s26  ;;  %s3281_s26 = sld [smem:[#allocation12_spill]] }
 0x5a0   : > { %v2492_v9 = vpop.f32.mrf.mxu0 }
 0x5a2   : > { %v1337_v11 = vpop.f32.mrf.mxu0 }
 0x5a4   : > { %v2493_v12 = vpop.f32.mrf.mxu0 }
 0x5a5   : > { %v2360_v52 = vld [vmem:[%s3281_s26] ss:$0 sm:$0xff]  ;;  %s3287_s26 = smov 8  }
 0x5e2   : > { %v1342_v13 = vpop.permute.xlu0 %1341 }
 0x5e3   : > { %v1352_v15 = vsel %vm894_vm2, %v998_v53, %v1342_v13 }
 0x609   : > { %v1346_v14 = vpop.permute.xlu1 %1345 }
 0x60a   : > { %v1354_v16 = vsel %vm1353_vm4, %v1352_v15, %v1346_v14 }
 0x611   : > { %v1350_v17 = vpop.permute.xlu0 %1349 }
 0x612   : > { %v1356_v18 = vsel %vm1355_vm5, %v1354_v16, %v1350_v17 }
 0x613   : > { %v1357_v19 = vpack.c.bf16 %v1356_v18, %v1356_v18 }
 0x615   : > { %2499 = vmatmul.mubr.msk.bf16.vlgmr.msra.gmra.mxu1 %vm802_vm0, %v1357_v19 }
 0x616   : > { %2514 = vmatprep.mubr.msk.bf16.mxu1 %vm2707_vm1, %v2706_v10 }
 0x6d5   : > { %v1408_v21 = vpop.f32.mrf.mxu1 }
 0x6d6   : > { %v1409_v22 = vadd.f32 %v2357_v20, %v1408_v21 }
 0x6d7   : > { %v2500_v23 = vpop.f32.mrf.mxu1 }
 0x6d8   : > { %v3013_v24 = vadd.f32 %v1409_v22, %v2875_v0  ;;  %v1504_v0 = vld [vmem:[%s3249_s16 + $0x10] sm:$0xff] }
 0x6d9   : > { %v1411_v25 = vpop.f32.mrf.mxu1  ;;  %v1507_v35 = vpack.c.bf16 %v1505_v34, %v1504_v0 }
 0x6da   : > { %v1415_v26 = vsel %vm802_vm0, %v3013_v24, 0.0 }
 0x6db   : > { %1416 = vadd.xlane.f32.xlu1 %v1415_v26  ;;  %v2501_v27 = vpop.f32.mrf.mxu1  ;;  %2511 = vmatpush3.bf16.msra.mxu1 %v1507_v35 }
 0x6dc   : > { %2512 = vmatprep.subr.bf16.mxu1 %v2706_v10 }
 0x6df   : > { %2513 = vmatpush3.bf16.msra.mxu1 %v1506_v37 }
 0x6e0   : > { %2524 = vmatprep.subr.bf16.mxu1 %v2706_v10 }
 0x6e2   : > { %2515 = vmatmul.mubr.msk.bf16.vlgmr.msra.gmra.mxu1 %vm802_vm0, %v1501_v39 }
 0x6e3   : > { %2526 = vmatprep.mubr.msk.bf16.mxu1 %vm2707_vm1, %v2706_v10 }
 0x764   : > { %v1417_v29 = vpop.xlane.xlu1 %1416 }
 0x765   : > { %v1418_v30 = vmul.f32 0.03125, %v1417_v29 }
 0x767   : > { %v1419_v31 = vsub.f32 %v3013_v24, %v1418_v30 }
 0x769   : > { %v1420_v32 = vmul.f32 %v1419_v31, %v1419_v31 }
 0x76b   : > { %v1421_v33 = vsel %vm802_vm0, %v1420_v32, 0.0 }
 0x76c   : > { %1422 = vadd.xlane.f32.xlu0 %v1421_v33 }
 0x7a2   : > { %v1552_v57 = vpop.f32.mrf.mxu1 }
 0x7a3   : > { %v1553_v58 = vadd.f32 %v2363_v56, %v1552_v57 }
 0x7a4   : > { %v2516_v59 = vpop.f32.mrf.mxu1 }
 0x7a5   : > { %v3066_v60 = vpack.c.bf16 %v1553_v58, %v1553_v58 }
 0x7a6   : > { %v1555_v61 = vpop.f32.mrf.mxu1 }
 0x7a7   : > { %1672 = vrot.lane.b32.xlu0 %v3066_v60, %s2708_s28  ;;  %v1564_v62 = vsel %vm894_vm2, %v3066_v60, 0 }
 0x7a8   : > { %v2517_v63 = vpop.f32.mrf.mxu1 }
 0x7f5   : > { %v1423_v46 = vpop.xlane.xlu0 %1422 }
 0x7f6   : > { %v1424_v47 = vmul.f32 0.03125, %v1423_v46 }
 0x7f8   : > { %v1425_v48 = vadd.f32 1e-06, %v1424_v47 }
 0x7fa   : > { %2647 = vrsqrt.f32 %v1425_v48 }
 0x807   : > { %v2648_v49 = vpop.eup %2647 }
 0x808   : > { %v1427_v51 = vmul.f32 %v2648_v49, %v1419_v31 }
 0x80a   : > { %v1435_v53 = vmul.f32 %v2359_v50, %v1427_v51 }
 0x80c   : > { %v1443_v54 = vadd.f32 %v2360_v52, %v1435_v53 }
 0x80e   : > { %v1444_v55 = vpack.c.bf16 %v1443_v54, %v1443_v54 }
 0x810   : > { %2507 = vmatmul.mubr.msk.bf16.vlgmr.msra.gmra.mxu0 %vm802_vm0, %v1444_v55 }
 0x811   : > { %2520 = vmatprep.mubr.msk.bf16.mxu0 %vm2707_vm1, %v2706_v10  ;;  %2519 = vmatpush3.bf16.xpose.msra.mxu0 %v1564_v62 }
 0x812   : > { %2530 = vmatprep.subr.bf16.mxu0 %v2706_v10 }
 0x819   : > { %v1673_v4 = vpop.permute.xlu0 %1672 }
 0x81a   : > { %v1678_v8 = vsel %vm894_vm2, %v1673_v4, 0 }
 0x8d0   : > { %v1495_v2 = vpop.f32.mrf.mxu0 }
 0x8d1   : > { %v1496_v3 = vadd.f32 %v2361_v1, %v1495_v2 }
 0x8d2   : > { %v2508_v5 = vpop.f32.mrf.mxu0 }
 0x8d3   : > { %v1558_v6 = vpack.c.bf16 %v1496_v3, %v1496_v3 }
 0x8d4   : > { %v1498_v7 = vpop.f32.mrf.mxu0 }
 0x8d5   : > { %1670 = vrot.lane.b32.xlu1 %v1558_v6, %s2708_s28  ;;  %1782 = vrot.lane.b32.xlu0 %v1558_v6, %s2712_s0  ;;  %s3290_s28 = sld [smem:[#allocation13_spill]] }
 0x8d6   : > { %2521 = vmatmul.mubr.msk.bf16.vlgmr.msra.gmra.mxu0 %vm894_vm2, %v1558_v6  ;;  %v2509_v9 = vpop.f32.mrf.mxu0 }
 0x8d7   : > { %2531 = vmatpush3.bf16.xpose.msra.mxu0 %v1678_v8  ;;  %2532 = vmatprep.mubr.msk.bf16.mxu0 %vm2707_vm1, %v2706_v10 }
 0x8d8   : > { %2542 = vmatprep.subr.bf16.mxu0 %v2706_v10 }
 0x8d9   : > { %1784 = vrot.lane.b32.xlu1 %v3066_v60, %s2712_s0  ;;  %1894 = vrot.lane.b32.xlu0 %v1558_v6, %s2714_s3 }
 0x8dd   : > { %1896 = vrot.lane.b32.xlu1 %v3066_v60, %s2714_s3  ;;  %s3282_s3 = sld [smem:[#allocation8_spill]] }
 0x8e3   : > { %s792_s4 = scalar_lea.vmem %s3282_s3, %s2869_s30  ;;  %s796_s3 = scalar_lea.vmem %s3257_s24, %s2869_s30 }
 0x8e4   : > { %v801_v19 = vld [vmem:[%s792_s4] sm:$0xff] }
 0x947   : > { %v1671_v11 = vpop.permute.xlu1 %1670  ;;  %v1783_v15 = vpop.permute.xlu0 %1782 }
 0x948   : > { %2533 = vmatmul.mubr.msk.bf16.vlgmr.msra.gmra.mxu0 %vm894_vm2, %v1671_v11 }
 0x949   : > { %2544 = vmatprep.mubr.msk.bf16.mxu0 %vm2707_vm1, %v2706_v10 }
 0x94b   : > { %v1785_v12 = vpop.permute.xlu1 %1784  ;;  %v1895_v17 = vpop.permute.xlu0 %1894 }
 0x94c   : > { %v1790_v13 = vsel %vm894_vm2, %v1785_v12, 0 }
 0x94d   : > { %2543 = vmatpush3.bf16.xpose.msra.mxu0 %v1790_v13 }
 0x94e   : > { %2554 = vmatprep.subr.bf16.mxu0 %v2706_v10 }
 0x94f   : > { %v1897_v14 = vpop.permute.xlu1 %1896 }
 0x950   : > { %v1902_v16 = vsel %vm894_vm2, %v1897_v14, 0 }
 0x954   : > { %2545 = vmatmul.mubr.msk.bf16.vlgmr.msra.gmra.mxu0 %vm894_vm2, %v1783_v15 }
 0x955   : > { %2555 = vmatpush3.bf16.xpose.msra.mxu0 %v1902_v16  ;;  %2556 = vmatprep.mubr.msk.bf16.mxu0 %vm2707_vm1, %v2706_v10 }
 0x956   : > { %2566 = vmatprep.subr.bf16.mxu0 %v2706_v10 }
 0x95c   : > { %2557 = vmatmul.mubr.msk.bf16.vlgmr.msra.gmra.mxu0 %vm894_vm2, %v1895_v17 }
 0x95d   : > { %2570 = vmatprep.mubr.msk.bf16.mxu0 %vm2707_vm1, %v2706_v10 }
 0x996   : > { %v1600_v18 = vpop.f32.mrf.mxu0 }
 0x997   : > { %v1606_v20 = vmul.f32 0.35355338, %v1600_v18 }
 0x998   : > { %v2522_v21 = vpop.f32.mrf.mxu0 }
 0x999   : > { %v1607_v22 = vadd.f32 %v1606_v20, %v801_v19 }
 0x99a   : > { %v1603_v23 = vpop.f32.mrf.mxu0 }
 0x99b   : > { %v1608_v25 = vsel %vm894_vm2, %v1607_v22, -inf }
 0x99c   : > { %1609 = vmax.xlane.f32.xlu1 %v1608_v25  ;;  %v2523_v26 = vpop.f32.mrf.mxu0 }
 0xa08   : > { %v1714_v27 = vpop.f32.mrf.mxu0 }
 0xa09   : > { %v1720_v29 = vmul.f32 0.35355338, %v1714_v27 }
 0xa0a   : > { %v2534_v30 = vpop.f32.mrf.mxu0 }
 0xa0b   : > { %v1721_v31 = vadd.f32 %v1720_v29, %v801_v19 }
 0xa0c   : > { %v1717_v32 = vpop.f32.mrf.mxu0 }
 0xa0d   : > { %v1722_v33 = vsel %vm894_vm2, %v1721_v31, -inf }
 0xa0e   : > { %1723 = vmax.xlane.f32.xlu0 %v1722_v33  ;;  %v2535_v0 = vpop.f32.mrf.mxu0 }
 0xa14   : > { %v1826_v34 = vpop.f32.mrf.mxu0 }
 0xa15   : > { %v1832_v35 = vmul.f32 0.35355338, %v1826_v34 }
 0xa16   : > { %v2546_v36 = vpop.f32.mrf.mxu0 }
 0xa17   : > { %v1833_v28 = vadd.f32 %v1832_v35, %v801_v19 }
 0xa18   : > { %v1829_v37 = vpop.f32.mrf.mxu0 }
 0xa19   : > { %v1834_v38 = vsel %vm894_vm2, %v1833_v28, -inf  ;;  %v2024_v37 = vld [vmem:[%s3251_s18 + $0x10] sm:$0xff] }
 0xa1a   : > { %1835 = vmax.xlane.f32.xlu0 %v1834_v38  ;;  %v2547_v39 = vpop.f32.mrf.mxu0  ;;  %v2025_v38 = vld [vmem:[%s3251_s18 + $0x18] sm:$0xff] }
 0xa1b   : > { %v2027_v39 = vpack.c.bf16 %v2025_v38, %v2024_v37 }
 0xa1c   : > { %v1938_v40 = vpop.f32.mrf.mxu0 }
 0xa1d   : > { %v1944_v41 = vmul.f32 0.35355338, %v1938_v40  ;;  %2567 = vmatpush3.bf16.msra.mxu0 %v2027_v39  ;;  %v2022_v40 = vld [vmem:[%s3251_s18] sm:$0xff] }
 0xa1e   : > { %v2558_v42 = vpop.f32.mrf.mxu0  ;;  %2568 = vmatprep.subr.bf16.mxu0 %v2706_v10 }
 0xa1f   : > { %v1945_v43 = vadd.f32 %v1944_v41, %v801_v19  ;;  %v2023_v41 = vld [vmem:[%s3251_s18 + $0x8] sm:$0xff] }
 0xa20   : > { %v1941_v44 = vpop.f32.mrf.mxu0  ;;  %v2026_v42 = vpack.c.bf16 %v2023_v41, %v2022_v40 }
 0xa21   : > { %v1946_v45 = vsel %vm894_vm2, %v1945_v43, -inf }
 0xa22   : > { %1947 = vmax.xlane.f32.xlu1 %v1946_v45  ;;  %v2559_v46 = vpop.f32.mrf.mxu0  ;;  %2569 = vmatpush3.bf16.msra.mxu0 %v2026_v42 }
 0xa23   : > { %2582 = vmatprep.subr.bf16.mxu0 %v2706_v10 }
 0xa25   : > { %v1610_v47 = vpop.xlane.xlu1 %1609 }
 0xa26   : > { %v1611_v48 = vsub.f32 %v1607_v22, %v1610_v47 }
 0xa28   : > { %v1612_v49 = vmul.f32 1.442695, %v1611_v48 }
 0xa2a   : > { %2649 = vpow2.f32 %v1612_v49 }
 0xa37   : > { %v2650_v50 = vpop.eup %2649 }
 0xa38   : > { %v1614_v51 = vsel %vm894_vm2, %v2650_v50, 0.0 }
 0xa39   : > { %1615 = vadd.xlane.f32.xlu0 %v1614_v51 }
 0xa97   : > { %v1724_v52 = vpop.xlane.xlu0 %1723 }
 0xa98   : > { %v1725_v53 = vsub.f32 %v1721_v31, %v1724_v52 }
 0xa9a   : > { %v1726_v54 = vmul.f32 1.442695, %v1725_v53 }
 0xa9c   : > { %2651 = vpow2.f32 %v1726_v54 }
 0xaa3   : > { %v1836_v55 = vpop.xlane.xlu0 %1835 }
 0xaa4   : > { %v1837_v56 = vsub.f32 %v1833_v28, %v1836_v55 }
 0xaa6   : > { %v1838_v57 = vmul.f32 1.442695, %v1837_v56 }
 0xaa8   : > { %2653 = vpow2.f32 %v1838_v57 }
 0xaa9   : > { %v2652_v58 = vpop.eup %2651 }
 0xaaa   : > { %v1728_v59 = vsel %vm894_vm2, %v2652_v58, 0.0 }
 0xaab   : > { %1729 = vadd.xlane.f32.xlu1 %v1728_v59  ;;  %v1948_v63 = vpop.xlane.xlu1 %1947 }
 0xaac   : > { %v1949_v1 = vsub.f32 %v1945_v43, %v1948_v63 }
 0xaae   : > { %v1950_v2 = vmul.f32 1.442695, %v1949_v1 }
 0xab0   : > { %2655 = vpow2.f32 %v1950_v2 }
 0xab5   : > { %v2654_v61 = vpop.eup %2653 }
 0xab6   : > { %v1840_v62 = vsel %vm894_vm2, %v2654_v61, 0.0 }
 0xab7   : > { %1841 = vadd.xlane.f32.xlu0 %v1840_v62 }
 0xabc   : > { %1734 = vrot.lane.b32.xlu1 %v3066_v60, %s3283_s27  ;;  %s3288_s27 = smov 16  }
 0xabd   : > { %v2656_v3 = vpop.eup %2655 }
 0xabe   : > { %v1952_v4 = vsel %vm894_vm2, %v2656_v3, 0.0 }
 0xac2   : > { %v1616_v5 = vpop.xlane.xlu0 %1615 }
 0xac3   : > { %2657 = vrcp.f32 %v1616_v5 }
 0xacd   : > { %1621 = vrot.lane.b32.xlu0 %v3066_v60, %s3284_s25  ;;  %s3289_s25 = smov 24  }
 0xad0   : > { %v2658_v7 = vpop.eup %2657 }
 0xad1   : > { %1958 = vrot.lane.b32.xlu0 %v3066_v60, %s3285_s8  ;;  %v1618_v9 = vmul.f32 %v2658_v7, %v2650_v50 }
 0xad3   : > { %v1619_v14 = vpack.c.bf16 %v1618_v9, %v1618_v9  ;;  %v2111_v9 = vld [vmem:[%s3253_s20 + $0x10] sm:$0xff] }
 0xae0   : > { %1953 = vadd.xlane.f32.xlu1 %v1952_v4 }
 0xaf1   : > { %1846 = vrot.lane.b32.xlu1 %v3066_v60, %s3286_s1 }
 0xb34   : > { %v1730_v6 = vpop.xlane.xlu1 %1729 }
 0xb35   : > { %2659 = vrcp.f32 %v1730_v6 }
 0xb38   : > { %v1735_v13 = vpop.permute.xlu1 %1734 }
 0xb39   : > { %v1740_v16 = vsel %vm960_vm3, %v1735_v13, 0  ;;  %v2110_v13 = vld [vmem:[%s3253_s20 + $0x8] sm:$0xff] }
 0xb40   : > { %v1842_v8 = vpop.xlane.xlu0 %1841 }
 0xb41   : > { %2661 = vrcp.f32 %v1842_v8 }
 0xb42   : > { %v2660_v15 = vpop.eup %2659 }
 0xb43   : > { %v1732_v60 = vmul.f32 %v2660_v15, %v2652_v58  ;;  %v2373_v58 = vld [vmem:[%s3252_s19] ss:$0 sm:$0xff]  ;;  %v2173_v15 = vld [vmem:[%s3255_s22 + $0x30] sm:$0xff] }
 0xb44   : > { %v1622_v11 = vpop.permute.xlu0 %1621 }
 0xb45   : > { %v1627_v12 = vsel %vm960_vm3, %v1622_v11, 0  ;;  %v1733_v17 = vpack.c.bf16 %v1732_v60, %v1732_v60  ;;  %v2171_v60 = vld [vmem:[%s3255_s22 + $0x20] sm:$0xff] }
 0xb46   : > { %2525 = vmatpush3.bf16.msra.mxu1 %v1627_v12  ;;  %v2109_v12 = vld [vmem:[%s3253_s20] sm:$0xff] }
 0xb47   : > { %2536 = vmatprep.subr.bf16.mxu1 %v2706_v10 }
 0xb48   : > { %v1959_v23 = vpop.permute.xlu0 %1958 }
 0xb49   : > { %2527 = vmatmul.mubr.msk.bf16.vlgmr.msra.gmra.mxu1 %vm894_vm2, %v1619_v14  ;;  %v1964_v26 = vsel %vm960_vm3, %v1959_v23, 0  ;;  %v2113_v14 = vpack.c.bf16 %v2110_v13, %v2109_v12 }
 0xb4a   : > { %2537 = vmatpush3.bf16.msra.mxu1 %v1740_v16  ;;  %2538 = vmatprep.mubr.msk.bf16.mxu1 %vm2707_vm1, %v2706_v10  ;;  %v2174_v16 = vld [vmem:[%s3255_s22 + $0x38] sm:$0xff] }
 0xb4b   : > { %2548 = vmatprep.subr.bf16.mxu1 %v2706_v10 }
 0xb4e   : > { %v2662_v18 = vpop.eup %2661 }
 0xb4f   : > { %v1844_v20 = vmul.f32 %v2662_v18, %v2654_v61  ;;  %v2172_v18 = vld [vmem:[%s3255_s22 + $0x28] sm:$0xff] }
 0xb51   : > { %2539 = vmatmul.mubr.msk.bf16.vlgmr.msra.gmra.mxu1 %vm894_vm2, %v1733_v17  ;;  %v1845_v25 = vpack.c.bf16 %v1844_v20, %v1844_v20  ;;  %v2178_v17 = vpack.c.bf16 %v2174_v16, %v2173_v15 }
 0xb52   : > { %2550 = vmatprep.mubr.msk.bf16.mxu1 %vm2707_vm1, %v2706_v10 }
 0xb69   : > { %v1954_v19 = vpop.xlane.xlu1 %1953 }
 0xb6a   : > { %2663 = vrcp.f32 %v1954_v19  ;;  %v2177_v19 = vpack.c.bf16 %v2172_v18, %v2171_v60 }
 0xb6d   : > { %v1847_v21 = vpop.permute.xlu1 %1846 }
 0xb6e   : > { %v1852_v22 = vsel %vm960_vm3, %v1847_v21, 0 }
 0xb6f   : > { %2549 = vmatpush3.bf16.msra.mxu1 %v1852_v22 }
 0xb70   : > { %2560 = vmatprep.subr.bf16.mxu1 %v2706_v10 }
 0xb72   : > { %2551 = vmatmul.mubr.msk.bf16.vlgmr.msra.gmra.mxu1 %vm894_vm2, %v1845_v25  ;;  %v2375_v25 = vld [vmem:[%s3290_s28] ss:$0 sm:$0xff] }
 0xb73   : > { %2561 = vmatpush3.bf16.msra.mxu1 %v1964_v26  ;;  %2562 = vmatprep.mubr.msk.bf16.mxu1 %vm2707_vm1, %v2706_v10 }
 0xb74   : > { %2574 = vmatprep.subr.bf16.mxu1 %v2706_v10 }
 0xb77   : > { %v2664_v27 = vpop.eup %2663 }
 0xb78   : > { %v1956_v29 = vmul.f32 %v2664_v27, %v2656_v3  ;;  %v2376_v27 = vld [vmem:[%s3242_s9] ss:$0 sm:$0xff] }
 0xb7a   : > { %v1957_v30 = vpack.c.bf16 %v1956_v29, %v1956_v29 }
 0xb7c   : > { %2563 = vmatmul.mubr.msk.bf16.vlgmr.msra.gmra.mxu1 %vm894_vm2, %v1957_v30 }
 0xb7d   : > { %2578 = vmatprep.mubr.msk.bf16.mxu1 %vm2707_vm1, %v2706_v10 }
 0xc09   : > { %v1663_v31 = vpop.f32.mrf.mxu1 }
 0xc0b   : > { %v2528_v32 = vpop.f32.mrf.mxu1 }
 0xc0c   : > { %v2169_v32 = vld [vmem:[%s3255_s22 + $0x10] sm:$0xff] }
 0xc0d   : > { %v1666_v33 = vpop.f32.mrf.mxu1 }
 0xc0e   : > { %v2170_v33 = vld [vmem:[%s3255_s22 + $0x18] sm:$0xff] }
 0xc0f   : > { %v2529_v0 = vpop.f32.mrf.mxu1 }
 0xc10   : > { %v2176_v0 = vpack.c.bf16 %v2170_v33, %v2169_v32 }
 0xc11   : > { %v1776_v34 = vpop.f32.mrf.mxu1 }
 0xc12   : > { %2007 = vrot.lane.b32.xlu1 %v1776_v34, %s3287_s26  ;;  %v2167_v34 = vld [vmem:[%s3255_s22] sm:$0xff] }
 0xc13   : > { %v2540_v35 = vpop.f32.mrf.mxu1 }
 0xc14   : > { %v2168_v35 = vld [vmem:[%s3255_s22 + $0x8] sm:$0xff] }
 0xc15   : > { %v1779_v36 = vpop.f32.mrf.mxu1 }
 0xc16   : > { %v2175_v36 = vpack.c.bf16 %v2168_v35, %v2167_v34 }
 0xc17   : > { %v2541_v28 = vpop.f32.mrf.mxu1 }
 0xc18   : > { %v2377_v28 = vld [vmem:[%s3254_s21] ss:$0 sm:$0xff] }
 0xc32   : > { %v1888_v43 = vpop.f32.mrf.mxu1 }
 0xc33   : > { %2011 = vrot.lane.b32.xlu0 %v1888_v43, %s3288_s27  ;;  %v2379_v43 = vld [vmem:[#allocation2] ss:$0 sm:$0xff] }
 0xc34   : > { %v2552_v44 = vpop.f32.mrf.mxu1 }
 0xc36   : > { %v1891_v45 = vpop.f32.mrf.mxu1 }
 0xc38   : > { %v2553_v46 = vpop.f32.mrf.mxu1 }
 0xc3c   : > { %v2000_v47 = vpop.f32.mrf.mxu1 }
 0xc3d   : > { %2015 = vrot.lane.b32.xlu1 %v2000_v47, %s3289_s25 }
 0xc3e   : > { %v2564_v48 = vpop.f32.mrf.mxu1 }
 0xc40   : > { %v2003_v49 = vpop.f32.mrf.mxu1 }
 0xc42   : > { %v2565_v50 = vpop.f32.mrf.mxu1 }
 0xc84   : > { %v2008_v51 = vpop.permute.xlu1 %2007 }
 0xc85   : > { %v2018_v53 = vsel %vm894_vm2, %v1663_v31, %v2008_v51 }
 0xca5   : > { %v2012_v52 = vpop.permute.xlu0 %2011 }
 0xca6   : > { %v2019_v54 = vsel %vm1353_vm4, %v2018_v53, %v2012_v52 }
 0xcaf   : > { %v2016_v55 = vpop.permute.xlu1 %2015 }
 0xcb0   : > { %v2020_v56 = vsel %vm1355_vm5, %v2019_v54, %v2016_v55 }
 0xcb1   : > { %v2021_v57 = vpack.c.bf16 %v2020_v56, %v2020_v56 }
 0xcb3   : > { %2571 = vmatmul.mubr.msk.bf16.vlgmr.msra.gmra.mxu0 %vm802_vm0, %v2021_v57 }
 0xcb4   : > { %2590 = vmatprep.mubr.msk.bf16.mxu0 %vm2707_vm1, %v2706_v10  ;;  %2583 = vmatpush3.bf16.msra.mxu0 %v2178_v17 }
 0xcb5   : > { %2584 = vmatprep.subr.bf16.mxu0 %v2706_v10 }
 0xcb8   : > { %2585 = vmatpush3.bf16.msra.mxu0 %v2177_v19 }
 0xcb9   : > { %2586 = vmatprep.subr.bf16.mxu0 %v2706_v10 }
 0xcbc   : > { %2587 = vmatpush3.bf16.msra.mxu0 %v2176_v0 }
 0xcbd   : > { %2588 = vmatprep.subr.bf16.mxu0 %v2706_v10 }
 0xcc0   : > { %2589 = vmatpush3.bf16.msra.mxu0 %v2175_v36 }
 0xd73   : > { %v2072_v59 = vpop.f32.mrf.mxu0 }
 0xd74   : > { %v2073_v61 = vadd.f32 %v2373_v58, %v2072_v59 }
 0xd75   : > { %v2572_v62 = vpop.f32.mrf.mxu0 }
 0xd76   : > { %v3168_v63 = vadd.f32 %v2073_v61, %v3013_v24  ;;  %v2112_v24 = vld [vmem:[%s3253_s20 + $0x18] sm:$0xff] }
 0xd77   : > { %v2075_v1 = vpop.f32.mrf.mxu0  ;;  %v2114_v11 = vpack.c.bf16 %v2112_v24, %v2111_v9 }
 0xd78   : > { %v2079_v2 = vsel %vm802_vm0, %v3168_v63, 0.0 }
 0xd79   : > { %2080 = vadd.xlane.f32.xlu0 %v2079_v2  ;;  %v2573_v3 = vpop.f32.mrf.mxu0  ;;  %2575 = vmatpush3.bf16.msra.mxu1 %v2114_v11 }
 0xd7a   : > { %2576 = vmatprep.subr.bf16.mxu1 %v2706_v10 }
 0xd7d   : > { %2577 = vmatpush3.bf16.msra.mxu1 %v2113_v14 }
 0xe02   : > { %v2081_v4 = vpop.xlane.xlu0 %2080 }
 0xe03   : > { %v2082_v5 = vmul.f32 0.03125, %v2081_v4 }
 0xe05   : > { %v2083_v6 = vsub.f32 %v3168_v63, %v2082_v5 }
 0xe07   : > { %v2084_v7 = vmul.f32 %v2083_v6, %v2083_v6 }
 0xe09   : > { %v2085_v8 = vsel %vm802_vm0, %v2084_v7, 0.0 }
 0xe0a   : > { %2086 = vadd.xlane.f32.xlu1 %v2085_v8 }
 0xe93   : > { %v2087_v20 = vpop.xlane.xlu1 %2086 }
 0xe94   : > { %v2088_v21 = vmul.f32 0.03125, %v2087_v20 }
 0xe96   : > { %v2089_v22 = vadd.f32 1e-06, %v2088_v21 }
 0xe98   : > { %2665 = vrsqrt.f32 %v2089_v22 }
 0xea5   : > { %v2666_v23 = vpop.eup %2665 }
 0xea6   : > { %v2091_v26 = vmul.f32 %v2666_v23, %v2083_v6 }
 0xea8   : > { %v2099_v29 = vmul.f32 %v2375_v25, %v2091_v26 }
 0xeaa   : > { %v2107_v30 = vadd.f32 %v2376_v27, %v2099_v29 }
 0xeac   : > { %v2108_v31 = vpack.c.bf16 %v2107_v30, %v2107_v30 }
 0xeae   : > { %2579 = vmatmul.mubr.msk.bf16.vlgmr.msra.gmra.mxu1 %vm802_vm0, %v2108_v31 }
 0xf6e   : > { %v2159_v37 = vpop.f32.mrf.mxu1 }
 0xf6f   : > { %v2160_v38 = vadd.f32 %v2377_v28, %v2159_v37 }
 0xf70   : > { %v2580_v39 = vpop.f32.mrf.mxu1 }
 0xf71   : > { %v2165_v40 = vmax.f32 %v2160_v38, 0.0 }
 0xf72   : > { %v2162_v10 = vpop.f32.mrf.mxu1 }
 0xf73   : > { %v2166_v41 = vpack.c.bf16 %v2165_v40, %v2165_v40 }
 0xf74   : > { %v2581_v42 = vpop.f32.mrf.mxu1 }
 0xf75   : > { %2591 = vmatmul.mubr.msk.bf16.vlgmr.msra.gmra.mxu0 %vm2186_vm6, %v2166_v41 }
0x1035   : > { %v2224_v44 = vpop.f32.mrf.mxu0 }
0x1036   : > { %v2225_v45 = vadd.f32 %v2379_v43, %v2224_v44 }
0x1037   : > { %v2592_v46 = vpop.f32.mrf.mxu0 }
0x1038   : > { %v2230_v47 = vadd.f32 %v2225_v45, %v3168_v63 }
0x1039   : > { %v2227_v48 = vpop.f32.mrf.mxu0 }
0x103a   : > { %2231 = vst.msk [vmem:[%s796_s3] sm:$0xff] %vm802_vm0, %v2230_v47 }
0x103b   : > { %v2593_v49 = vpop.f32.mrf.mxu0 }
0x103c PF: > { %s35_s5 = sadd.s32 1, %s2703_s5  }
0x103d   : > { %p32_p1 = scmp.ge.s32.totalorder %s35_s5, 4  }
0x103f   :  { %34 = sbr.rel (!%p32_p1) target bundleno = 11 (0xb), region = 160 }
0x1044   :  { %2251 = vsyncpa [#allocation3], 1 }
0x1045   :  { %2253 = vsyncpa [#allocation3 + $0x1], 1 }

// kernel: decoder_forward.3
= control target key start
LH: loop header
LB: loop body
LE: loop exit
PB: predicated region body
PF: predicated region fallthrough
CT: control target
= control target key end

     0   :  { %s3153_s0 = inlined_call_operand.vmem [shape: f32[16,32], index: 0, kind: input, shape index: {}]   ;;  %s3154_s1 = inlined_call_operand.vmem [shape: f32[16,32], index: 1, kind: input, shape index: {}]   ;;  %s3155_s2 = inlined_call_operand.vmem [shape: f32[2,8,8], index: 2, kind: input, shape index: {}]   ;;  %s3156_s3 = inlined_call_operand.vmem [shape: f32[2,8,8], index: 3, kind: input, shape index: {}]   ;;  %s3157_s4 = inlined_call_operand.vmem [shape: f32[1,32], index: 4, kind: input, shape index: {}]   ;;  %s3158_s5 = inlined_call_operand.vmem [shape: f32[1,32], index: 5, kind: input, shape index: {}]   ;;  %s3159_s6 = inlined_call_operand.vmem [shape: f32[1,32], index: 6, kind: input, shape index: {}]   ;;  %s3160_s7 = inlined_call_operand.vmem [shape: f32[1,32], index: 7, kind: input, shape index: {}]   ;;  %s3161_s8 = inlined_call_operand.vmem [shape: f32[1,32], index: 8, kind: input, shape index: {}]   ;;  %s3162_s9 = inlined_call_operand.vmem [shape: f32[1,32], index: 9, kind: input, shape index: {}]   ;;  %s3163_s10 = inlined_call_operand.vmem [shape: f32[32,96], index: 10, kind: input, shape index: {}]   ;;  %s3164_s11 = inlined_call_operand.vmem [shape: f32[1,96], index: 11, kind: input, shape index: {}]   ;;  %s3165_s12 = inlined_call_operand.vmem [shape: f32[32,32], index: 12, kind: input, shape index: {}]   ;;  %s3166_s13 = inlined_call_operand.vmem [shape: f32[1,32], index: 13, kind: input, shape index: {}]   ;;  %s3167_s14 = inlined_call_operand.vmem [shape: f32[32,32], index: 14, kind: input, shape index: {}]   ;;  %s3168_s15 = inlined_call_operand.vmem [shape: f32[1,32], index: 15, kind: input, shape index: {}]   ;;  %s3169_s16 = inlined_call_operand.vmem [shape: f32[32,64], index: 16, kind: input, shape index: {}]   ;;  %s3170_s17 = inlined_call_operand.vmem [shape: f32[1,64], index: 17, kind: input, shape index: {}]   ;;  %s3171_s18 = inlined_call_operand.vmem [shape: f32[32,32], index: 18, kind: input, shape index: {}]   ;;  %s3172_s19 = inlined_call_operand.vmem [shape: f32[1,32], index: 19, kind: input, shape index: {}]   ;;  %s3173_s20 = inlined_call_operand.vmem [shape: f32[32,64], index: 20, kind: input, shape index: {}]   ;;  %s3174_s21 = inlined_call_operand.vmem [shape: f32[1,64], index: 21, kind: input, shape index: {}]   ;;  %s3175_s22 = inlined_call_operand.vmem [shape: f32[64,32], index: 22, kind: input, shape index: {}]   ;;  %s3176_s23 = inlined_call_operand.vmem [shape: f32[1,32], index: 23, kind: input, shape index: {}]   ;;  %s3177_s24 = inlined_call_operand.vmem [shape: f32[16,32], index: 24, kind: output, shape index: {}]  }
   0x1   :  { %3185 = sst [smem:[#allocation2_spill]] %s3153_s0 }
   0x2   :  { %3186 = sst [smem:[#allocation3_spill]] %s3154_s1 }
   0x3   :  { %3187 = sst [smem:[#allocation4_spill]] %s3155_s2 }
   0x4   :  { %3188 = sst [smem:[#allocation5_spill]] %s3156_s3 }
   0x5   :  { %3189 = sst [smem:[#allocation6_spill]] %s3157_s4 }
   0x6   :  { %3190 = sst [smem:[#allocation7_spill]] %s3158_s5  ;;  %s2778_s5 = smov 0  }
   0x7   :  { %3191 = sst [smem:[#allocation8_spill]] %s3159_s6 }
   0x8   :  { %3192 = sst [smem:[#allocation9_spill]] %s3160_s7 }
   0x9   :  { %3193 = sst [smem:[#allocation10_spill]] %s3161_s8 }
   0xa LB: > { %s2308_s26 = sadd.s32 4294967295, %s2635_s5   ;;  %p2312_p0 = scmp.ge.s32.totalorder %s2635_s5, 1  ;;  %s2635_s5 = sphi %s2778_s5, %s34_s5  }
   0xb   : > { %p688_p1 = scmp.lt.s32.totalorder %s2635_s5, 3 }
   0xd   : > { %p689_p2 = pnand %p2312_p0, %p688_p1 }
   0xe   : > { %p764_p3 = scmp.lt.s32.totalorder (!%p689_p2), %s2308_s26, 1  ;;  %s3194_s2 = sld [smem:[#allocation2_spill]] (!%p689_p2) }
   0xf   : > { %692 = sbr.rel (%p689_p2) target bundleno = 4136 (0x1028), region = 116  ;;  %s3195_s6 = sld [smem:[#allocation6_spill]] (!%p689_p2) }
  0x10   : > { %s3196_s0 = sld [smem:[#allocation7_spill]] (!%p689_p2)  ;;  %s2639_s3 = smov (!%p689_p2), 120  }
  0x11   : > { %s3183_s25 = smov (!%p689_p2), 96   ;;  %s3184_s8 = smov (!%p689_p2), 88  }
  0x12   : > { %s3178_s4 = smov (!%p689_p2), 80   ;;  %s2643_s1 = smov (!%p689_p2), 112  }
  0x13   : > { %s2645_s28 = smov (!%p689_p2), 104   ;;  %s2646_s7 = smov (!%p689_p2), 64  }
  0x14   : > { %s3211_s26 = smov (!%p764_p3, %s2308_s26), 1  ;;  %vm789_vm0 = vcmask 261120   ;;  %v823_v7 = vld [vmem:[%s3163_s10 + $0x10] sm:$0xff]  ;;  %v824_v8 = vld [vmem:[%s3163_s10 + $0x18] sm:$0xff]  ;;  %v821_v9 = vld [vmem:[%s3163_s10] sm:$0xff]  ;;  %v2637_v10 = vmov 0.0  }
  0x15   : > { %s2786_s27 = sshll.u32 %s3211_s26, 3  ;;  %2411 = vmatprep.subr.bf16.mxu1 %v2637_v10  ;;  %v826_v11 = vpack.c.bf16 %v824_v8, %v823_v7  ;;  %v822_v12 = vld [vmem:[%s3163_s10 + $0x8] sm:$0xff]  ;;  %vm2638_vm1 = vmmov 0   ;;  %2425 = vmatprep.subr.bf16.mxu0 %v2637_v10  ;;  %v2318_v18 = vld [vmem:[%s3195_s6] ss:$0 sm:$0xff]  ;;  %s3180_s26 = smov 72  }
  0x16   : > { %s767_s29 = scalar_lea.vmem %s3194_s2, %s2786_s27  ;;  %2415 = vmatprep.mubr.msk.bf16.mxu1 %vm2638_vm1, %v2637_v10  ;;  %2427 = vmatprep.mubr.msk.bf16.mxu0 %vm2638_vm1, %v2637_v10  ;;  %v825_v13 = vpack.c.bf16 %v822_v12, %v821_v9  ;;  %v2319_v20 = vld [vmem:[%s3196_s0] ss:$0 sm:$0xff]  ;;  %vm881_vm2 = vcmask 64512   ;;  %s2647_s30 = smov 56   ;;  %vm947_vm3 = vcmask 1043456   ;;  %vm1340_vm4 = vcmask 130048  }
  0x17   : > { %v2792_v0 = vld [vmem:[%s767_s29] sm:$0xff]  ;;  %2412 = vmatpush3.bf16.msra.mxu1 %v826_v11  ;;  %s3197_s29 = sld [smem:[#allocation4_spill]]  ;;  %s2648_s6 = smov 48   ;;  %vm1342_vm5 = vcmask 195584   ;;  %vm2173_vm6 = vcmask 523264  }
  0x18   : > { %v790_v1 = vsel %vm789_vm0, %v2792_v0, 0.0  ;;  %2413 = vmatprep.subr.bf16.mxu1 %v2637_v10  ;;  %v2320_v24 = vld [vmem:[%s3164_s11] ss:$0 sm:$0xff]  ;;  %s2649_s2 = smov 40  }
  0x19   : > { %791 = vadd.xlane.f32.xlu0 %v790_v1 }
  0x1b   : > { %2414 = vmatpush3.bf16.msra.mxu1 %v825_v13 }
  0x1c   : > { %2419 = vmatprep.subr.bf16.mxu1 %v2637_v10 }
  0x1d   : > { %s775_s0 = scalar_lea.vmem %s3197_s29, %s2786_s27  ;;  %s3179_s29 = smov 8  }
  0x1e   : > { %v787_v43 = vld [vmem:[%s775_s0] sm:$0xff]  ;;  %s3182_s0 = smov 16  }
  0xa2   : > { %v792_v2 = vpop.xlane.xlu0 %791 }
  0xa3   : > { %v794_v3 = vmul.f32 0.03125, %v792_v2 }
  0xa5   : > { %v795_v4 = vsub.f32 %v2792_v0, %v794_v3 }
  0xa7   : > { %v796_v5 = vmul.f32 %v795_v4, %v795_v4 }
  0xa9   : > { %v797_v6 = vsel %vm789_vm0, %v796_v5, 0.0 }
  0xaa   : > { %798 = vadd.xlane.f32.xlu0 %v797_v6 }
 0x133   : > { %v799_v14 = vpop.xlane.xlu0 %798 }
 0x134   : > { %v800_v15 = vmul.f32 0.03125, %v799_v14 }
 0x136   : > { %v801_v16 = vadd.f32 1e-06, %v800_v15 }
 0x138   : > { %2591 = vrsqrt.f32 %v801_v16 }
 0x145   : > { %v2592_v17 = vpop.eup %2591 }
 0x146   : > { %v803_v19 = vmul.f32 %v2592_v17, %v795_v4 }
 0x148   : > { %v811_v21 = vmul.f32 %v2318_v18, %v803_v19 }
 0x14a   : > { %v819_v22 = vadd.f32 %v2319_v20, %v811_v21 }
 0x14c   : > { %v820_v23 = vpack.c.bf16 %v819_v22, %v819_v22 }
 0x14e   : > { %2416 = vmatmul.mubr.msk.bf16.vlgmr.msra.gmra.mxu1 %vm789_vm0, %v820_v23 }
 0x14f   : > { %2421 = vmatprep.mubr.msk.bf16.mxu1 %vm2638_vm1, %v2637_v10 }
 0x20e   : > { %v871_v25 = vpop.f32.mrf.mxu1 }
 0x20f   : > { %v872_v26 = vadd.f32 %v2320_v24, %v871_v25 }
 0x210   : > { %v2417_v27 = vpop.f32.mrf.mxu1 }
 0x211   : > { %v2830_v28 = vpack.c.bf16 %v872_v26, %v872_v26 }
 0x212   : > { %v874_v29 = vpop.f32.mrf.mxu1 }
 0x213   : > { %991 = vrot.lane.b32.xlu0 %v2830_v28, %s2639_s3  ;;  %879 = vrot.lane.b32.xlu1 %v2830_v28, %s3183_s25 }
 0x214   : > { %v2418_v30 = vpop.f32.mrf.mxu1 }
 0x217   : > { %993 = vrot.lane.b32.xlu1 %v2830_v28, %s3184_s8 }
 0x21b   : > { %1105 = vrot.lane.b32.xlu1 %v2830_v28, %s3178_s4 }
 0x21f   : > { %1103 = vrot.lane.b32.xlu1 %v2830_v28, %s2643_s1 }
 0x223   : > { %1217 = vrot.lane.b32.xlu1 %v2830_v28, %s3180_s26 }
 0x227   : > { %1215 = vrot.lane.b32.xlu1 %v2830_v28, %s2645_s28 }
 0x285   : > { %v880_v31 = vpop.permute.xlu1 %879  ;;  %v992_v36 = vpop.permute.xlu0 %991 }
 0x286   : > { %v886_v32 = vsel %vm881_vm2, %v880_v31, 0 }
 0x287   : > { %2420 = vmatpush3.bf16.xpose.msra.mxu1 %v886_v32 }
 0x288   : > { %2431 = vmatprep.subr.bf16.mxu1 %v2637_v10 }
 0x289   : > { %v994_v33 = vpop.permute.xlu1 %993 }
 0x28a   : > { %v999_v34 = vsel %vm881_vm2, %v994_v33, 0 }
 0x28d   : > { %v1106_v35 = vpop.permute.xlu1 %1105 }
 0x28e   : > { %2422 = vmatmul.mubr.msk.bf16.vlgmr.msra.gmra.mxu1 %vm881_vm2, %v2830_v28  ;;  %v1111_v38 = vsel %vm881_vm2, %v1106_v35, 0 }
 0x28f   : > { %2432 = vmatpush3.bf16.xpose.msra.mxu1 %v999_v34  ;;  %2433 = vmatprep.mubr.msk.bf16.mxu1 %vm2638_vm1, %v2637_v10 }
 0x290   : > { %2443 = vmatprep.subr.bf16.mxu1 %v2637_v10 }
 0x291   : > { %v1104_v37 = vpop.permute.xlu1 %1103 }
 0x295   : > { %v1218_v39 = vpop.permute.xlu1 %1217 }
 0x296   : > { %2434 = vmatmul.mubr.msk.bf16.vlgmr.msra.gmra.mxu1 %vm881_vm2, %v992_v36  ;;  %v1223_v40 = vsel %vm881_vm2, %v1218_v39, 0 }
 0x297   : > { %2444 = vmatpush3.bf16.xpose.msra.mxu1 %v1111_v38  ;;  %2445 = vmatprep.mubr.msk.bf16.mxu1 %vm2638_vm1, %v2637_v10 }
 0x298   : > { %2455 = vmatprep.subr.bf16.mxu1 %v2637_v10 }
 0x299   : > { %v1216_v41 = vpop.permute.xlu1 %1215 }
 0x29e   : > { %2446 = vmatmul.mubr.msk.bf16.vlgmr.msra.gmra.mxu1 %vm881_vm2, %v1104_v37 }
 0x29f   : > { %2456 = vmatpush3.bf16.xpose.msra.mxu1 %v1223_v40  ;;  %2457 = vmatprep.mubr.msk.bf16.mxu1 %vm2638_vm1, %v2637_v10 }
 0x2a0   : > { %2467 = vmatprep.subr.bf16.mxu1 %v2637_v10 }
 0x2a6   : > { %2458 = vmatmul.mubr.msk.bf16.vlgmr.msra.gmra.mxu1 %vm881_vm2, %v1216_v41 }
 0x2a7   : > { %2471 = vmatprep.mubr.msk.bf16.mxu1 %vm2638_vm1, %v2637_v10 }
 0x34e   : > { %v922_v42 = vpop.f32.mrf.mxu1 }
 0x34f   : > { %v928_v44 = vmul.f32 0.35355338, %v922_v42 }
 0x350   : > { %v2423_v45 = vpop.f32.mrf.mxu1 }
 0x351   : > { %v929_v46 = vadd.f32 %v928_v44, %v787_v43 }
 0x352   : > { %v925_v47 = vpop.f32.mrf.mxu1 }
 0x353   : > { %v930_v48 = vsel %vm881_vm2, %v929_v46, -inf }
 0x354   : > { %931 = vmax.xlane.f32.xlu1 %v930_v48  ;;  %v2424_v49 = vpop.f32.mrf.mxu1 }
 0x356   : > { %v1035_v50 = vpop.f32.mrf.mxu1 }
 0x357   : > { %v1041_v51 = vmul.f32 0.35355338, %v1035_v50 }
 0x358   : > { %v2435_v52 = vpop.f32.mrf.mxu1 }
 0x359   : > { %v1042_v53 = vadd.f32 %v1041_v51, %v787_v43 }
 0x35a   : > { %v1038_v54 = vpop.f32.mrf.mxu1 }
 0x35b   : > { %v1043_v55 = vsel %vm881_vm2, %v1042_v53, -inf }
 0x35c   : > { %1044 = vmax.xlane.f32.xlu0 %v1043_v55  ;;  %v2436_v56 = vpop.f32.mrf.mxu1 }
 0x35e   : > { %v1147_v57 = vpop.f32.mrf.mxu1 }
 0x35f   : > { %v1153_v58 = vmul.f32 0.35355338, %v1147_v57 }
 0x360   : > { %v2447_v59 = vpop.f32.mrf.mxu1 }
 0x361   : > { %v1154_v60 = vadd.f32 %v1153_v58, %v787_v43 }
 0x362   : > { %v1150_v61 = vpop.f32.mrf.mxu1 }
 0x363   : > { %v1155_v62 = vsel %vm881_vm2, %v1154_v60, -inf  ;;  %v1347_v61 = vld [vmem:[%s3165_s12 + $0x10] sm:$0xff] }
 0x364   : > { %1156 = vmax.xlane.f32.xlu1 %v1155_v62  ;;  %v2448_v63 = vpop.f32.mrf.mxu1  ;;  %v1348_v62 = vld [vmem:[%s3165_s12 + $0x18] sm:$0xff] }
 0x365   : > { %v1350_v63 = vpack.c.bf16 %v1348_v62, %v1347_v61 }
 0x366   : > { %v1259_v1 = vpop.f32.mrf.mxu1 }
 0x367   : > { %v1265_v2 = vmul.f32 0.35355338, %v1259_v1  ;;  %2468 = vmatpush3.bf16.msra.mxu1 %v1350_v63  ;;  %v1345_v1 = vld [vmem:[%s3165_s12] sm:$0xff] }
 0x368   : > { %v2459_v3 = vpop.f32.mrf.mxu1  ;;  %2469 = vmatprep.subr.bf16.mxu1 %v2637_v10 }
 0x369   : > { %v1266_v4 = vadd.f32 %v1265_v2, %v787_v43  ;;  %v1346_v2 = vld [vmem:[%s3165_s12 + $0x8] sm:$0xff] }
 0x36a   : > { %v1262_v5 = vpop.f32.mrf.mxu1  ;;  %v1349_v3 = vpack.c.bf16 %v1346_v2, %v1345_v1  ;;  %v2334_v1 = vld [vmem:[%s3168_s15] ss:$0 sm:$0xff] }
 0x36b   : > { %v1267_v6 = vsel %vm881_vm2, %v1266_v4, -inf }
 0x36c   : > { %1268 = vmax.xlane.f32.xlu0 %v1267_v6  ;;  %v2460_v7 = vpop.f32.mrf.mxu1  ;;  %2470 = vmatpush3.bf16.msra.mxu1 %v1349_v3 }
 0x36d   : > { %2483 = vmatprep.subr.bf16.mxu1 %v2637_v10 }
 0x3dd   : > { %v932_v8 = vpop.xlane.xlu1 %931 }
 0x3de   : > { %v933_v9 = vsub.f32 %v929_v46, %v932_v8 }
 0x3e0   : > { %v934_v11 = vmul.f32 1.442695, %v933_v9 }
 0x3e2   : > { %2593 = vpow2.f32 %v934_v11 }
 0x3e5   : > { %v1045_v12 = vpop.xlane.xlu0 %1044 }
 0x3e6   : > { %v1046_v13 = vsub.f32 %v1042_v53, %v1045_v12 }
 0x3e8   : > { %v1047_v14 = vmul.f32 1.442695, %v1046_v13 }
 0x3ea   : > { %2595 = vpow2.f32 %v1047_v14 }
 0x3ed   : > { %v1157_v24 = vpop.xlane.xlu1 %1156 }
 0x3ee   : > { %v1158_v25 = vsub.f32 %v1154_v60, %v1157_v24 }
 0x3ef   : > { %v2594_v15 = vpop.eup %2593 }
 0x3f0   : > { %v936_v16 = vsel %vm881_vm2, %v2594_v15, 0.0  ;;  %v1159_v26 = vmul.f32 1.442695, %v1158_v25 }
 0x3f1   : > { %937 = vadd.xlane.f32.xlu1 %v936_v16 }
 0x3f5   : > { %v1269_v17 = vpop.xlane.xlu0 %1268 }
 0x3f6   : > { %v1270_v18 = vsub.f32 %v1266_v4, %v1269_v17 }
 0x3f7   : > { %v2596_v19 = vpop.eup %2595 }
 0x3f8   : > { %v1271_v20 = vmul.f32 1.442695, %v1270_v18  ;;  %v1049_v21 = vsel %vm881_vm2, %v2596_v19, 0.0 }
 0x3f9   : > { %1050 = vadd.xlane.f32.xlu0 %v1049_v21 }
 0x3fa   : > { %2597 = vpow2.f32 %v1271_v20  ;;  %v2330_v20 = vld [vmem:[%s3166_s13] ss:$0 sm:$0xff] }
 0x3fb   : > { %2599 = vpow2.f32 %v1159_v26 }
 0x402   : > { %942 = vrot.lane.b32.xlu1 %v2830_v28, %s2646_s7  ;;  %s3181_s7 = smov 24  }
 0x407   : > { %v2598_v22 = vpop.eup %2597 }
 0x408   : > { %v1273_v23 = vsel %vm881_vm2, %v2598_v22, 0.0  ;;  %v2600_v27 = vpop.eup %2599 }
 0x409   : > { %1274 = vadd.xlane.f32.xlu0 %v1273_v23  ;;  %v1161_v29 = vsel %vm881_vm2, %v2600_v27, 0.0 }
 0x41f   : > { %1055 = vrot.lane.b32.xlu0 %v2830_v28, %s2647_s30  ;;  %s3198_s30 = sld [smem:[#allocation3_spill]] }
 0x425   : > { %s771_s8 = scalar_lea.vmem %s3198_s30, %s2786_s27  ;;  %s3202_s30 = smov 88  }
 0x426   : > { %1162 = vadd.xlane.f32.xlu1 %v1161_v29 }
 0x437   : > { %1167 = vrot.lane.b32.xlu1 %v2830_v28, %s2648_s6  ;;  %s3199_s6 = sld [smem:[#allocation8_spill]] }
 0x43b   : > { %1279 = vrot.lane.b32.xlu1 %v2830_v28, %s2649_s2  ;;  %s3204_s2 = smov 72  }
 0x47a   : > { %v938_v30 = vpop.xlane.xlu1 %937 }
 0x47b   : > { %2601 = vrcp.f32 %v938_v30 }
 0x47e   : > { %v943_v31 = vpop.permute.xlu1 %942 }
 0x47f   : > { %v949_v32 = vsel %vm947_vm3, %v943_v31, 0 }
 0x480   : > { %2426 = vmatpush3.bf16.msra.mxu0 %v949_v32 }
 0x481   : > { %2437 = vmatprep.subr.bf16.mxu0 %v2637_v10 }
 0x482   : > { %v1051_v33 = vpop.xlane.xlu0 %1050 }
 0x483   : > { %2603 = vrcp.f32 %v1051_v33 }
 0x488   : > { %v2602_v34 = vpop.eup %2601 }
 0x489   : > { %v940_v35 = vmul.f32 %v2602_v34, %v2594_v15  ;;  %v1492_v34 = vld [vmem:[%s3169_s16 + $0x18] sm:$0xff] }
 0x48b   : > { %v941_v36 = vpack.c.bf16 %v940_v35, %v940_v35 }
 0x48d   : > { %2428 = vmatmul.mubr.msk.bf16.vlgmr.msra.gmra.mxu0 %vm881_vm2, %v941_v36  ;;  %v1489_v36 = vld [vmem:[%s3169_s16] sm:$0xff] }
 0x48e   : > { %2439 = vmatprep.mubr.msk.bf16.mxu0 %vm2638_vm1, %v2637_v10 }
 0x490   : > { %v2604_v28 = vpop.eup %2603 }
 0x491   : > { %v1053_v38 = vmul.f32 %v2604_v28, %v2596_v19  ;;  %v1490_v28 = vld [vmem:[%s3169_s16 + $0x8] sm:$0xff] }
 0x492   : > { %v1275_v37 = vpop.xlane.xlu0 %1274 }
 0x493   : > { %v1054_v41 = vpack.c.bf16 %v1053_v38, %v1053_v38  ;;  %v786_v38 = vld [vmem:[%s771_s8] sm:$0xff] }
 0x496   : > { %v1056_v39 = vpop.permute.xlu0 %1055 }
 0x497   : > { %v1061_v40 = vsel %vm947_vm3, %v1056_v39, 0  ;;  %v1488_v39 = vpack.c.bf16 %v786_v38, %v786_v38 }
 0x498   : > { %2438 = vmatpush3.bf16.msra.mxu0 %v1061_v40  ;;  %v1434_v40 = vld [vmem:[%s3167_s14 + $0x10] sm:$0xff] }
 0x499   : > { %2449 = vmatprep.subr.bf16.mxu0 %v2637_v10 }
 0x49b   : > { %2440 = vmatmul.mubr.msk.bf16.vlgmr.msra.gmra.mxu0 %vm881_vm2, %v1054_v41  ;;  %v1435_v41 = vld [vmem:[%s3167_s14 + $0x18] sm:$0xff] }
 0x49c   : > { %2451 = vmatprep.mubr.msk.bf16.mxu0 %vm2638_vm1, %v2637_v10 }
 0x4af   : > { %v1163_v42 = vpop.xlane.xlu1 %1162 }
 0x4b0   : > { %2605 = vrcp.f32 %v1163_v42  ;;  %v1437_v42 = vpack.c.bf16 %v1435_v41, %v1434_v40 }
 0x4b1   : > { %2607 = vrcp.f32 %v1275_v37  ;;  %v1493_v37 = vpack.c.bf16 %v1490_v28, %v1489_v36 }
 0x4b3   : > { %v1168_v43 = vpop.permute.xlu1 %1167 }
 0x4b4   : > { %v1173_v44 = vsel %vm947_vm3, %v1168_v43, 0  ;;  %v1432_v43 = vld [vmem:[%s3167_s14] sm:$0xff] }
 0x4b5   : > { %2450 = vmatpush3.bf16.msra.mxu0 %v1173_v44  ;;  %v1433_v44 = vld [vmem:[%s3167_s14 + $0x8] sm:$0xff] }
 0x4b6   : > { %2461 = vmatprep.subr.bf16.mxu0 %v2637_v10 }
 0x4b7   : > { %v1280_v47 = vpop.permute.xlu1 %1279 }
 0x4b8   : > { %v1285_v50 = vsel %vm947_vm3, %v1280_v47, 0 }
 0x4bd   : > { %v2606_v45 = vpop.eup %2605 }
 0x4be   : > { %v1165_v46 = vmul.f32 %v2606_v45, %v2600_v27  ;;  %v2608_v49 = vpop.eup %2607  ;;  %v1436_v45 = vpack.c.bf16 %v1433_v44, %v1432_v43 }
 0x4bf   : > { %v1277_v51 = vmul.f32 %v2608_v49, %v2598_v22 }
 0x4c0   : > { %v1166_v48 = vpack.c.bf16 %v1165_v46, %v1165_v46 }
 0x4c1   : > { %v1278_v52 = vpack.c.bf16 %v1277_v51, %v1277_v51 }
 0x4c2   : > { %2452 = vmatmul.mubr.msk.bf16.vlgmr.msra.gmra.mxu0 %vm881_vm2, %v1166_v48 }
 0x4c3   : > { %2462 = vmatpush3.bf16.msra.mxu0 %v1285_v50  ;;  %2463 = vmatprep.mubr.msk.bf16.mxu0 %vm2638_vm1, %v2637_v10  ;;  %v2332_v50 = vld [vmem:[%s3199_s6] ss:$0 sm:$0xff]  ;;  %s3203_s6 = smov 96  }
 0x4c4   : > { %2475 = vmatprep.subr.bf16.mxu0 %v2637_v10 }
 0x4ca   : > { %2464 = vmatmul.mubr.msk.bf16.vlgmr.msra.gmra.mxu0 %vm881_vm2, %v1278_v52 }
 0x4cb   : > { %2479 = vmatprep.mubr.msk.bf16.mxu0 %vm2638_vm1, %v2637_v10  ;;  %2476 = vmatpush3.bf16.msra.mxu0 %v1437_v42 }
 0x4cc   : > { %2477 = vmatprep.subr.bf16.mxu0 %v2637_v10 }
 0x4cf   : > { %2478 = vmatpush3.bf16.msra.mxu0 %v1436_v45 }
 0x4d0   : > { %2491 = vmatprep.subr.bf16.mxu0 %v2637_v10 }
 0x54d   : > { %v985_v53 = vpop.f32.mrf.mxu0 }
 0x54f   : > { %v2429_v54 = vpop.f32.mrf.mxu0 }
 0x551   : > { %v988_v55 = vpop.f32.mrf.mxu0 }
 0x553   : > { %v2430_v56 = vpop.f32.mrf.mxu0 }
 0x554   : > { %v2336_v56 = vld [vmem:[%s3170_s17] ss:$0 sm:$0xff] }
 0x55b   : > { %v1097_v57 = vpop.f32.mrf.mxu0 }
 0x55c   : > { %1328 = vrot.lane.b32.xlu0 %v1097_v57, %s3179_s29 }
 0x55d   : > { %v2441_v58 = vpop.f32.mrf.mxu0 }
 0x55f   : > { %v1100_v59 = vpop.f32.mrf.mxu0 }
 0x561   : > { %v2442_v60 = vpop.f32.mrf.mxu0 }
 0x582   : > { %v1209_v4 = vpop.f32.mrf.mxu0 }
 0x583   : > { %1332 = vrot.lane.b32.xlu1 %v1209_v4, %s3182_s0  ;;  %s3205_s0 = smov 80  }
 0x584   : > { %v2453_v5 = vpop.f32.mrf.mxu0 }
 0x586   : > { %v1212_v6 = vpop.f32.mrf.mxu0 }
 0x588   : > { %v2454_v7 = vpop.f32.mrf.mxu0 }
 0x58a   : > { %v1321_v8 = vpop.f32.mrf.mxu0 }
 0x58b   : > { %1336 = vrot.lane.b32.xlu0 %v1321_v8, %s3181_s7  ;;  %s3200_s7 = sld [smem:[#allocation9_spill]] }
 0x58c   : > { %v2465_v9 = vpop.f32.mrf.mxu0 }
 0x58e   : > { %v1324_v11 = vpop.f32.mrf.mxu0 }
 0x590   : > { %v2466_v12 = vpop.f32.mrf.mxu0 }
 0x591   : > { %v2333_v52 = vld [vmem:[%s3200_s7] ss:$0 sm:$0xff]  ;;  %s3206_s7 = smov 8  }
 0x5ce   : > { %v1329_v13 = vpop.permute.xlu0 %1328 }
 0x5cf   : > { %v1339_v15 = vsel %vm881_vm2, %v985_v53, %v1329_v13 }
 0x5f5   : > { %v1333_v14 = vpop.permute.xlu1 %1332 }
 0x5f6   : > { %v1341_v16 = vsel %vm1340_vm4, %v1339_v15, %v1333_v14 }
 0x5fd   : > { %v1337_v17 = vpop.permute.xlu0 %1336 }
 0x5fe   : > { %v1343_v18 = vsel %vm1342_vm5, %v1341_v16, %v1337_v17 }
 0x5ff   : > { %v1344_v19 = vpack.c.bf16 %v1343_v18, %v1343_v18 }
 0x601   : > { %2472 = vmatmul.mubr.msk.bf16.vlgmr.msra.gmra.mxu1 %vm789_vm0, %v1344_v19 }
 0x602   : > { %2487 = vmatprep.mubr.msk.bf16.mxu1 %vm2638_vm1, %v2637_v10 }
 0x6c1   : > { %v1395_v21 = vpop.f32.mrf.mxu1 }
 0x6c2   : > { %v1396_v22 = vadd.f32 %v2330_v20, %v1395_v21 }
 0x6c3   : > { %v2473_v23 = vpop.f32.mrf.mxu1 }
 0x6c4   : > { %v2930_v24 = vadd.f32 %v1396_v22, %v2792_v0  ;;  %v1491_v0 = vld [vmem:[%s3169_s16 + $0x10] sm:$0xff] }
 0x6c5   : > { %v1398_v25 = vpop.f32.mrf.mxu1  ;;  %v1494_v35 = vpack.c.bf16 %v1492_v34, %v1491_v0 }
 0x6c6   : > { %v1402_v26 = vsel %vm789_vm0, %v2930_v24, 0.0 }
 0x6c7   : > { %1403 = vadd.xlane.f32.xlu1 %v1402_v26  ;;  %v2474_v27 = vpop.f32.mrf.mxu1  ;;  %2484 = vmatpush3.bf16.msra.mxu1 %v1494_v35 }
 0x6c8   : > { %2485 = vmatprep.subr.bf16.mxu1 %v2637_v10 }
 0x6cb   : > { %2486 = vmatpush3.bf16.msra.mxu1 %v1493_v37 }
 0x6cc   : > { %2497 = vmatprep.subr.bf16.mxu1 %v2637_v10 }
 0x6ce   : > { %2488 = vmatmul.mubr.msk.bf16.vlgmr.msra.gmra.mxu1 %vm789_vm0, %v1488_v39 }
 0x6cf   : > { %2499 = vmatprep.mubr.msk.bf16.mxu1 %vm2638_vm1, %v2637_v10 }
 0x750   : > { %v1404_v29 = vpop.xlane.xlu1 %1403 }
 0x751   : > { %v1405_v30 = vmul.f32 0.03125, %v1404_v29 }
 0x753   : > { %v1406_v31 = vsub.f32 %v2930_v24, %v1405_v30 }
 0x755   : > { %v1407_v32 = vmul.f32 %v1406_v31, %v1406_v31 }
 0x757   : > { %v1408_v33 = vsel %vm789_vm0, %v1407_v32, 0.0 }
 0x758   : > { %1409 = vadd.xlane.f32.xlu0 %v1408_v33 }
 0x78e   : > { %v1539_v57 = vpop.f32.mrf.mxu1 }
 0x78f   : > { %v1540_v58 = vadd.f32 %v2336_v56, %v1539_v57 }
 0x790   : > { %v2489_v59 = vpop.f32.mrf.mxu1 }
 0x791   : > { %v2983_v60 = vpack.c.bf16 %v1540_v58, %v1540_v58 }
 0x792   : > { %v1542_v61 = vpop.f32.mrf.mxu1 }
 0x793   : > { %1659 = vrot.lane.b32.xlu0 %v2983_v60, %s2639_s3  ;;  %v1551_v62 = vsel %vm881_vm2, %v2983_v60, 0 }
 0x794   : > { %v2490_v63 = vpop.f32.mrf.mxu1 }
 0x7e1   : > { %v1410_v46 = vpop.xlane.xlu0 %1409 }
 0x7e2   : > { %v1411_v47 = vmul.f32 0.03125, %v1410_v46 }
 0x7e4   : > { %v1412_v48 = vadd.f32 1e-06, %v1411_v47 }
 0x7e6   : > { %2609 = vrsqrt.f32 %v1412_v48 }
 0x7f3   : > { %v2610_v49 = vpop.eup %2609 }
 0x7f4   : > { %v1414_v51 = vmul.f32 %v2610_v49, %v1406_v31 }
 0x7f6   : > { %v1422_v53 = vmul.f32 %v2332_v50, %v1414_v51 }
 0x7f8   : > { %v1430_v54 = vadd.f32 %v2333_v52, %v1422_v53 }
 0x7fa   : > { %v1431_v55 = vpack.c.bf16 %v1430_v54, %v1430_v54 }
 0x7fc   : > { %2480 = vmatmul.mubr.msk.bf16.vlgmr.msra.gmra.mxu0 %vm789_vm0, %v1431_v55 }
 0x7fd   : > { %2493 = vmatprep.mubr.msk.bf16.mxu0 %vm2638_vm1, %v2637_v10  ;;  %2492 = vmatpush3.bf16.xpose.msra.mxu0 %v1551_v62 }
 0x7fe   : > { %2503 = vmatprep.subr.bf16.mxu0 %v2637_v10 }
 0x805   : > { %v1660_v4 = vpop.permute.xlu0 %1659 }
 0x806   : > { %v1665_v8 = vsel %vm881_vm2, %v1660_v4, 0 }
 0x8bc   : > { %v1482_v2 = vpop.f32.mrf.mxu0 }
 0x8bd   : > { %v1483_v3 = vadd.f32 %v2334_v1, %v1482_v2 }
 0x8be   : > { %v2481_v5 = vpop.f32.mrf.mxu0 }
 0x8bf   : > { %v1545_v6 = vpack.c.bf16 %v1483_v3, %v1483_v3 }
 0x8c0   : > { %v1485_v7 = vpop.f32.mrf.mxu0 }
 0x8c1   : > { %1657 = vrot.lane.b32.xlu1 %v1545_v6, %s2639_s3  ;;  %1769 = vrot.lane.b32.xlu0 %v1545_v6, %s2643_s1  ;;  %s3209_s3 = sld [smem:[#allocation10_spill]] }
 0x8c2   : > { %2494 = vmatmul.mubr.msk.bf16.vlgmr.msra.gmra.mxu0 %vm881_vm2, %v1545_v6  ;;  %v2482_v9 = vpop.f32.mrf.mxu0 }
 0x8c3   : > { %2504 = vmatpush3.bf16.xpose.msra.mxu0 %v1665_v8  ;;  %2505 = vmatprep.mubr.msk.bf16.mxu0 %vm2638_vm1, %v2637_v10 }
 0x8c4   : > { %2515 = vmatprep.subr.bf16.mxu0 %v2637_v10 }
 0x8c5   : > { %1771 = vrot.lane.b32.xlu1 %v2983_v60, %s2643_s1  ;;  %1881 = vrot.lane.b32.xlu0 %v1545_v6, %s2645_s28 }
 0x8c9   : > { %1883 = vrot.lane.b32.xlu1 %v2983_v60, %s2645_s28  ;;  %s3201_s28 = sld [smem:[#allocation5_spill]] }
 0x8cf   : > { %s779_s29 = scalar_lea.vmem %s3201_s28, %s2786_s27 }
 0x8d0   : > { %v788_v19 = vld [vmem:[%s779_s29] sm:$0xff] }
 0x933   : > { %v1658_v11 = vpop.permute.xlu1 %1657  ;;  %v1770_v15 = vpop.permute.xlu0 %1769 }
 0x934   : > { %2506 = vmatmul.mubr.msk.bf16.vlgmr.msra.gmra.mxu0 %vm881_vm2, %v1658_v11 }
 0x935   : > { %2517 = vmatprep.mubr.msk.bf16.mxu0 %vm2638_vm1, %v2637_v10 }
 0x937   : > { %v1772_v12 = vpop.permute.xlu1 %1771  ;;  %v1882_v17 = vpop.permute.xlu0 %1881 }
 0x938   : > { %v1777_v13 = vsel %vm881_vm2, %v1772_v12, 0 }
 0x939   : > { %2516 = vmatpush3.bf16.xpose.msra.mxu0 %v1777_v13 }
 0x93a   : > { %2527 = vmatprep.subr.bf16.mxu0 %v2637_v10 }
 0x93b   : > { %v1884_v14 = vpop.permute.xlu1 %1883 }
 0x93c   : > { %v1889_v16 = vsel %vm881_vm2, %v1884_v14, 0 }
 0x940   : > { %2518 = vmatmul.mubr.msk.bf16.vlgmr.msra.gmra.mxu0 %vm881_vm2, %v1770_v15 }
 0x941   : > { %2528 = vmatpush3.bf16.xpose.msra.mxu0 %v1889_v16  ;;  %2529 = vmatprep.mubr.msk.bf16.mxu0 %vm2638_vm1, %v2637_v10 }
 0x942   : > { %2539 = vmatprep.subr.bf16.mxu0 %v2637_v10 }
 0x948   : > { %2530 = vmatmul.mubr.msk.bf16.vlgmr.msra.gmra.mxu0 %vm881_vm2, %v1882_v17 }
 0x949   : > { %2543 = vmatprep.mubr.msk.bf16.mxu0 %vm2638_vm1, %v2637_v10 }
 0x982   : > { %v1587_v18 = vpop.f32.mrf.mxu0 }
 0x983   : > { %v1593_v20 = vmul.f32 0.35355338, %v1587_v18 }
 0x984   : > { %v2495_v21 = vpop.f32.mrf.mxu0 }
 0x985   : > { %v1594_v22 = vadd.f32 %v1593_v20, %v788_v19 }
 0x986   : > { %v1590_v23 = vpop.f32.mrf.mxu0 }
 0x987   : > { %v1595_v25 = vsel %vm881_vm2, %v1594_v22, -inf }
 0x988   : > { %1596 = vmax.xlane.f32.xlu1 %v1595_v25  ;;  %v2496_v26 = vpop.f32.mrf.mxu0 }
 0x9f4   : > { %v1701_v27 = vpop.f32.mrf.mxu0 }
 0x9f5   : > { %v1707_v29 = vmul.f32 0.35355338, %v1701_v27 }
 0x9f6   : > { %v2507_v30 = vpop.f32.mrf.mxu0 }
 0x9f7   : > { %v1708_v31 = vadd.f32 %v1707_v29, %v788_v19 }
 0x9f8   : > { %v1704_v32 = vpop.f32.mrf.mxu0 }
 0x9f9   : > { %v1709_v33 = vsel %vm881_vm2, %v1708_v31, -inf }
 0x9fa   : > { %1710 = vmax.xlane.f32.xlu0 %v1709_v33  ;;  %v2508_v0 = vpop.f32.mrf.mxu0 }
 0xa00   : > { %v1813_v34 = vpop.f32.mrf.mxu0 }
 0xa01   : > { %v1819_v35 = vmul.f32 0.35355338, %v1813_v34 }
 0xa02   : > { %v2519_v36 = vpop.f32.mrf.mxu0 }
 0xa03   : > { %v1820_v28 = vadd.f32 %v1819_v35, %v788_v19 }
 0xa04   : > { %v1816_v37 = vpop.f32.mrf.mxu0 }
 0xa05   : > { %v1821_v38 = vsel %vm881_vm2, %v1820_v28, -inf  ;;  %v2011_v37 = vld [vmem:[%s3171_s18 + $0x10] sm:$0xff] }
 0xa06   : > { %1822 = vmax.xlane.f32.xlu0 %v1821_v38  ;;  %v2520_v39 = vpop.f32.mrf.mxu0  ;;  %v2012_v38 = vld [vmem:[%s3171_s18 + $0x18] sm:$0xff] }
 0xa07   : > { %v2014_v39 = vpack.c.bf16 %v2012_v38, %v2011_v37 }
 0xa08   : > { %v1925_v40 = vpop.f32.mrf.mxu0 }
 0xa09   : > { %v1931_v41 = vmul.f32 0.35355338, %v1925_v40  ;;  %2540 = vmatpush3.bf16.msra.mxu0 %v2014_v39  ;;  %v2009_v40 = vld [vmem:[%s3171_s18] sm:$0xff] }
 0xa0a   : > { %v2531_v42 = vpop.f32.mrf.mxu0  ;;  %2541 = vmatprep.subr.bf16.mxu0 %v2637_v10 }
 0xa0b   : > { %v1932_v43 = vadd.f32 %v1931_v41, %v788_v19  ;;  %v2010_v41 = vld [vmem:[%s3171_s18 + $0x8] sm:$0xff] }
 0xa0c   : > { %v1928_v44 = vpop.f32.mrf.mxu0  ;;  %v2013_v42 = vpack.c.bf16 %v2010_v41, %v2009_v40 }
 0xa0d   : > { %v1933_v45 = vsel %vm881_vm2, %v1932_v43, -inf }
 0xa0e   : > { %1934 = vmax.xlane.f32.xlu1 %v1933_v45  ;;  %v2532_v46 = vpop.f32.mrf.mxu0  ;;  %2542 = vmatpush3.bf16.msra.mxu0 %v2013_v42 }
 0xa0f   : > { %2555 = vmatprep.subr.bf16.mxu0 %v2637_v10 }
 0xa11   : > { %v1597_v47 = vpop.xlane.xlu1 %1596 }
 0xa12   : > { %v1598_v48 = vsub.f32 %v1594_v22, %v1597_v47 }
 0xa14   : > { %v1599_v49 = vmul.f32 1.442695, %v1598_v48 }
 0xa16   : > { %2611 = vpow2.f32 %v1599_v49 }
 0xa23   : > { %v2612_v50 = vpop.eup %2611 }
 0xa24   : > { %v1601_v51 = vsel %vm881_vm2, %v2612_v50, 0.0 }
 0xa25   : > { %1602 = vadd.xlane.f32.xlu0 %v1601_v51 }
 0xa83   : > { %v1711_v52 = vpop.xlane.xlu0 %1710 }
 0xa84   : > { %v1712_v53 = vsub.f32 %v1708_v31, %v1711_v52 }
 0xa86   : > { %v1713_v54 = vmul.f32 1.442695, %v1712_v53 }
 0xa88   : > { %2613 = vpow2.f32 %v1713_v54 }
 0xa8f   : > { %v1823_v55 = vpop.xlane.xlu0 %1822 }
 0xa90   : > { %v1824_v56 = vsub.f32 %v1820_v28, %v1823_v55 }
 0xa92   : > { %v1825_v57 = vmul.f32 1.442695, %v1824_v56 }
 0xa94   : > { %2615 = vpow2.f32 %v1825_v57 }
 0xa95   : > { %v2614_v58 = vpop.eup %2613 }
 0xa96   : > { %v1715_v59 = vsel %vm881_vm2, %v2614_v58, 0.0 }
 0xa97   : > { %1716 = vadd.xlane.f32.xlu1 %v1715_v59  ;;  %v1935_v63 = vpop.xlane.xlu1 %1934 }
 0xa98   : > { %v1936_v1 = vsub.f32 %v1932_v43, %v1935_v63 }
 0xa9a   : > { %v1937_v2 = vmul.f32 1.442695, %v1936_v1 }
 0xa9c   : > { %2617 = vpow2.f32 %v1937_v2 }
 0xaa1   : > { %v2616_v61 = vpop.eup %2615 }
 0xaa2   : > { %v1827_v62 = vsel %vm881_vm2, %v2616_v61, 0.0 }
 0xaa3   : > { %1828 = vadd.xlane.f32.xlu0 %v1827_v62 }
 0xaa8   : > { %1721 = vrot.lane.b32.xlu1 %v2983_v60, %s3202_s30  ;;  %s3207_s30 = smov 16  }
 0xaa9   : > { %v2618_v3 = vpop.eup %2617 }
 0xaaa   : > { %v1939_v4 = vsel %vm881_vm2, %v2618_v3, 0.0 }
 0xaae   : > { %v1603_v5 = vpop.xlane.xlu0 %1602 }
 0xaaf   : > { %2619 = vrcp.f32 %v1603_v5 }
 0xab9   : > { %1608 = vrot.lane.b32.xlu0 %v2983_v60, %s3203_s6  ;;  %s3208_s6 = smov 24  }
 0xabc   : > { %v2620_v7 = vpop.eup %2619 }
 0xabd   : > { %1945 = vrot.lane.b32.xlu0 %v2983_v60, %s3204_s2  ;;  %v1605_v9 = vmul.f32 %v2620_v7, %v2612_v50 }
 0xabf   : > { %v1606_v14 = vpack.c.bf16 %v1605_v9, %v1605_v9  ;;  %v2098_v9 = vld [vmem:[%s3173_s20 + $0x10] sm:$0xff] }
 0xacc   : > { %1940 = vadd.xlane.f32.xlu1 %v1939_v4 }
 0xadd   : > { %1833 = vrot.lane.b32.xlu1 %v2983_v60, %s3205_s0 }
 0xb20   : > { %v1717_v6 = vpop.xlane.xlu1 %1716 }
 0xb21   : > { %2621 = vrcp.f32 %v1717_v6 }
 0xb24   : > { %v1722_v13 = vpop.permute.xlu1 %1721 }
 0xb25   : > { %v1727_v16 = vsel %vm947_vm3, %v1722_v13, 0  ;;  %v2097_v13 = vld [vmem:[%s3173_s20 + $0x8] sm:$0xff] }
 0xb2c   : > { %v1829_v8 = vpop.xlane.xlu0 %1828 }
 0xb2d   : > { %2623 = vrcp.f32 %v1829_v8 }
 0xb2e   : > { %v2622_v15 = vpop.eup %2621 }
 0xb2f   : > { %v1719_v60 = vmul.f32 %v2622_v15, %v2614_v58  ;;  %v2346_v58 = vld [vmem:[%s3172_s19] ss:$0 sm:$0xff]  ;;  %v2160_v15 = vld [vmem:[%s3175_s22 + $0x30] sm:$0xff] }
 0xb30   : > { %v1609_v11 = vpop.permute.xlu0 %1608 }
 0xb31   : > { %v1614_v12 = vsel %vm947_vm3, %v1609_v11, 0  ;;  %v1720_v17 = vpack.c.bf16 %v1719_v60, %v1719_v60  ;;  %v2158_v60 = vld [vmem:[%s3175_s22 + $0x20] sm:$0xff] }
 0xb32   : > { %2498 = vmatpush3.bf16.msra.mxu1 %v1614_v12  ;;  %v2096_v12 = vld [vmem:[%s3173_s20] sm:$0xff] }
 0xb33   : > { %2509 = vmatprep.subr.bf16.mxu1 %v2637_v10 }
 0xb34   : > { %v1946_v23 = vpop.permute.xlu0 %1945 }
 0xb35   : > { %2500 = vmatmul.mubr.msk.bf16.vlgmr.msra.gmra.mxu1 %vm881_vm2, %v1606_v14  ;;  %v1951_v26 = vsel %vm947_vm3, %v1946_v23, 0  ;;  %v2100_v14 = vpack.c.bf16 %v2097_v13, %v2096_v12 }
 0xb36   : > { %2510 = vmatpush3.bf16.msra.mxu1 %v1727_v16  ;;  %2511 = vmatprep.mubr.msk.bf16.mxu1 %vm2638_vm1, %v2637_v10  ;;  %v2161_v16 = vld [vmem:[%s3175_s22 + $0x38] sm:$0xff] }
 0xb37   : > { %2521 = vmatprep.subr.bf16.mxu1 %v2637_v10 }
 0xb3a   : > { %v2624_v18 = vpop.eup %2623 }
 0xb3b   : > { %v1831_v20 = vmul.f32 %v2624_v18, %v2616_v61  ;;  %v2159_v18 = vld [vmem:[%s3175_s22 + $0x28] sm:$0xff] }
 0xb3d   : > { %2512 = vmatmul.mubr.msk.bf16.vlgmr.msra.gmra.mxu1 %vm881_vm2, %v1720_v17  ;;  %v1832_v25 = vpack.c.bf16 %v1831_v20, %v1831_v20  ;;  %v2165_v17 = vpack.c.bf16 %v2161_v16, %v2160_v15 }
 0xb3e   : > { %2523 = vmatprep.mubr.msk.bf16.mxu1 %vm2638_vm1, %v2637_v10 }
 0xb55   : > { %v1941_v19 = vpop.xlane.xlu1 %1940 }
 0xb56   : > { %2625 = vrcp.f32 %v1941_v19  ;;  %v2164_v19 = vpack.c.bf16 %v2159_v18, %v2158_v60 }
 0xb59   : > { %v1834_v21 = vpop.permute.xlu1 %1833 }
 0xb5a   : > { %v1839_v22 = vsel %vm947_vm3, %v1834_v21, 0 }
 0xb5b   : > { %2522 = vmatpush3.bf16.msra.mxu1 %v1839_v22 }
 0xb5c   : > { %2533 = vmatprep.subr.bf16.mxu1 %v2637_v10 }
 0xb5e   : > { %2524 = vmatmul.mubr.msk.bf16.vlgmr.msra.gmra.mxu1 %vm881_vm2, %v1832_v25  ;;  %v2348_v25 = vld [vmem:[%s3209_s3] ss:$0 sm:$0xff] }
 0xb5f   : > { %2534 = vmatpush3.bf16.msra.mxu1 %v1951_v26  ;;  %2535 = vmatprep.mubr.msk.bf16.mxu1 %vm2638_vm1, %v2637_v10 }
 0xb60   : > { %2547 = vmatprep.subr.bf16.mxu1 %v2637_v10 }
 0xb63   : > { %v2626_v27 = vpop.eup %2625 }
 0xb64   : > { %v1943_v29 = vmul.f32 %v2626_v27, %v2618_v3  ;;  %v2349_v27 = vld [vmem:[%s3162_s9] ss:$0 sm:$0xff] }
 0xb66   : > { %v1944_v30 = vpack.c.bf16 %v1943_v29, %v1943_v29 }
 0xb68   : > { %2536 = vmatmul.mubr.msk.bf16.vlgmr.msra.gmra.mxu1 %vm881_vm2, %v1944_v30 }
 0xb69   : > { %2551 = vmatprep.mubr.msk.bf16.mxu1 %vm2638_vm1, %v2637_v10 }
 0xbf5   : > { %v1650_v31 = vpop.f32.mrf.mxu1 }
 0xbf7   : > { %v2501_v32 = vpop.f32.mrf.mxu1 }
 0xbf8   : > { %v2156_v32 = vld [vmem:[%s3175_s22 + $0x10] sm:$0xff] }
 0xbf9   : > { %v1653_v33 = vpop.f32.mrf.mxu1 }
 0xbfa   : > { %v2157_v33 = vld [vmem:[%s3175_s22 + $0x18] sm:$0xff] }
 0xbfb   : > { %v2502_v0 = vpop.f32.mrf.mxu1 }
 0xbfc   : > { %v2163_v0 = vpack.c.bf16 %v2157_v33, %v2156_v32 }
 0xbfd   : > { %v1763_v34 = vpop.f32.mrf.mxu1 }
 0xbfe   : > { %1994 = vrot.lane.b32.xlu1 %v1763_v34, %s3206_s7  ;;  %v2154_v34 = vld [vmem:[%s3175_s22] sm:$0xff] }
 0xbff   : > { %v2513_v35 = vpop.f32.mrf.mxu1 }
 0xc00   : > { %v2155_v35 = vld [vmem:[%s3175_s22 + $0x8] sm:$0xff] }
 0xc01   : > { %v1766_v36 = vpop.f32.mrf.mxu1 }
 0xc02   : > { %v2162_v36 = vpack.c.bf16 %v2155_v35, %v2154_v34 }
 0xc03   : > { %v2514_v28 = vpop.f32.mrf.mxu1 }
 0xc04   : > { %v2350_v28 = vld [vmem:[%s3174_s21] ss:$0 sm:$0xff] }
 0xc1e   : > { %v1875_v43 = vpop.f32.mrf.mxu1 }
 0xc1f   : > { %1998 = vrot.lane.b32.xlu0 %v1875_v43, %s3207_s30  ;;  %v2352_v43 = vld [vmem:[%s3176_s23] ss:$0 sm:$0xff]  ;;  %s783_s30 = scalar_lea.vmem %s3177_s24, %s2786_s27 }
 0xc20   : > { %v2525_v44 = vpop.f32.mrf.mxu1 }
 0xc22   : > { %v1878_v45 = vpop.f32.mrf.mxu1 }
 0xc24   : > { %v2526_v46 = vpop.f32.mrf.mxu1 }
 0xc28   : > { %v1987_v47 = vpop.f32.mrf.mxu1 }
 0xc29   : > { %2002 = vrot.lane.b32.xlu1 %v1987_v47, %s3208_s6 }
 0xc2a   : > { %v2537_v48 = vpop.f32.mrf.mxu1 }
 0xc2c   : > { %v1990_v49 = vpop.f32.mrf.mxu1 }
 0xc2e   : > { %v2538_v50 = vpop.f32.mrf.mxu1 }
 0xc70   : > { %v1995_v51 = vpop.permute.xlu1 %1994 }
 0xc71   : > { %v2005_v53 = vsel %vm881_vm2, %v1650_v31, %v1995_v51 }
 0xc91   : > { %v1999_v52 = vpop.permute.xlu0 %1998 }
 0xc92   : > { %v2006_v54 = vsel %vm1340_vm4, %v2005_v53, %v1999_v52 }
 0xc9b   : > { %v2003_v55 = vpop.permute.xlu1 %2002 }
 0xc9c   : > { %v2007_v56 = vsel %vm1342_vm5, %v2006_v54, %v2003_v55 }
 0xc9d   : > { %v2008_v57 = vpack.c.bf16 %v2007_v56, %v2007_v56 }
 0xc9f   : > { %2544 = vmatmul.mubr.msk.bf16.vlgmr.msra.gmra.mxu0 %vm789_vm0, %v2008_v57 }
 0xca0   : > { %2563 = vmatprep.mubr.msk.bf16.mxu0 %vm2638_vm1, %v2637_v10  ;;  %2556 = vmatpush3.bf16.msra.mxu0 %v2165_v17 }
 0xca1   : > { %2557 = vmatprep.subr.bf16.mxu0 %v2637_v10 }
 0xca4   : > { %2558 = vmatpush3.bf16.msra.mxu0 %v2164_v19 }
 0xca5   : > { %2559 = vmatprep.subr.bf16.mxu0 %v2637_v10 }
 0xca8   : > { %2560 = vmatpush3.bf16.msra.mxu0 %v2163_v0 }
 0xca9   : > { %2561 = vmatprep.subr.bf16.mxu0 %v2637_v10 }
 0xcac   : > { %2562 = vmatpush3.bf16.msra.mxu0 %v2162_v36 }
 0xd5f   : > { %v2059_v59 = vpop.f32.mrf.mxu0 }
 0xd60   : > { %v2060_v61 = vadd.f32 %v2346_v58, %v2059_v59 }
 0xd61   : > { %v2545_v62 = vpop.f32.mrf.mxu0 }
 0xd62   : > { %v3085_v63 = vadd.f32 %v2060_v61, %v2930_v24  ;;  %v2099_v24 = vld [vmem:[%s3173_s20 + $0x18] sm:$0xff] }
 0xd63   : > { %v2062_v1 = vpop.f32.mrf.mxu0  ;;  %v2101_v11 = vpack.c.bf16 %v2099_v24, %v2098_v9 }
 0xd64   : > { %v2066_v2 = vsel %vm789_vm0, %v3085_v63, 0.0 }
 0xd65   : > { %2067 = vadd.xlane.f32.xlu0 %v2066_v2  ;;  %v2546_v3 = vpop.f32.mrf.mxu0  ;;  %2548 = vmatpush3.bf16.msra.mxu1 %v2101_v11 }
 0xd66   : > { %2549 = vmatprep.subr.bf16.mxu1 %v2637_v10 }
 0xd69   : > { %2550 = vmatpush3.bf16.msra.mxu1 %v2100_v14 }
 0xdee   : > { %v2068_v4 = vpop.xlane.xlu0 %2067 }
 0xdef   : > { %v2069_v5 = vmul.f32 0.03125, %v2068_v4 }
 0xdf1   : > { %v2070_v6 = vsub.f32 %v3085_v63, %v2069_v5 }
 0xdf3   : > { %v2071_v7 = vmul.f32 %v2070_v6, %v2070_v6 }
 0xdf5   : > { %v2072_v8 = vsel %vm789_vm0, %v2071_v7, 0.0 }
 0xdf6   : > { %2073 = vadd.xlane.f32.xlu1 %v2072_v8 }
 0xe7f   : > { %v2074_v20 = vpop.xlane.xlu1 %2073 }
 0xe80   : > { %v2075_v21 = vmul.f32 0.03125, %v2074_v20 }
 0xe82   : > { %v2076_v22 = vadd.f32 1e-06, %v2075_v21 }
 0xe84   : > { %2627 = vrsqrt.f32 %v2076_v22 }
 0xe91   : > { %v2628_v23 = vpop.eup %2627 }
 0xe92   : > { %v2078_v26 = vmul.f32 %v2628_v23, %v2070_v6 }
 0xe94   : > { %v2086_v29 = vmul.f32 %v2348_v25, %v2078_v26 }
 0xe96   : > { %v2094_v30 = vadd.f32 %v2349_v27, %v2086_v29 }
 0xe98   : > { %v2095_v31 = vpack.c.bf16 %v2094_v30, %v2094_v30 }
 0xe9a   : > { %2552 = vmatmul.mubr.msk.bf16.vlgmr.msra.gmra.mxu1 %vm789_vm0, %v2095_v31 }
 0xf5a   : > { %v2146_v37 = vpop.f32.mrf.mxu1 }
 0xf5b   : > { %v2147_v38 = vadd.f32 %v2350_v28, %v2146_v37 }
 0xf5c   : > { %v2553_v39 = vpop.f32.mrf.mxu1 }
 0xf5d   : > { %v2152_v40 = vmax.f32 %v2147_v38, 0.0 }
 0xf5e   : > { %v2149_v10 = vpop.f32.mrf.mxu1 }
 0xf5f   : > { %v2153_v41 = vpack.c.bf16 %v2152_v40, %v2152_v40 }
 0xf60   : > { %v2554_v42 = vpop.f32.mrf.mxu1 }
 0xf61   : > { %2564 = vmatmul.mubr.msk.bf16.vlgmr.msra.gmra.mxu0 %vm2173_vm6, %v2153_v41 }
0x1021   : > { %v2211_v44 = vpop.f32.mrf.mxu0 }
0x1022   : > { %v2212_v45 = vadd.f32 %v2352_v43, %v2211_v44 }
0x1023   : > { %v2565_v46 = vpop.f32.mrf.mxu0 }
0x1024   : > { %v2217_v47 = vadd.f32 %v2212_v45, %v3085_v63 }
0x1025   : > { %v2214_v48 = vpop.f32.mrf.mxu0 }
0x1026   : > { %2218 = vst.msk [vmem:[%s783_s30] sm:$0xff] %vm789_vm0, %v2217_v47 }
0x1027   : > { %v2566_v49 = vpop.f32.mrf.mxu0 }
0x1028 PF: > { %s34_s5 = sadd.s32 1, %s2635_s5  }
0x1029   : > { %p31_p4 = scmp.ge.s32.totalorder %s34_s5, 4  }
0x102b   :  { %33 = sbr.rel (!%p31_p4) target bundleno = 10 (0xa), region = 155 }

</bundles_post_ra>
